<compile_context>
chip_gen: v7x
topology: tpu7x:2x2x1
jax: 0.10.0
libtpu: 0.0.40
codegen_flags: <defaults>
</compile_context>

<pallas_src>
import functools

import jax
import jax.numpy as jnp
from jax.experimental import pallas as pl
from jax.experimental.pallas import tpu as pltpu

# YOLO v1 backbone config: (kernel, out_channels, stride, padding) | 'M' | [c1, c2, repeats]
CFG_FULL = [(7, 64, 2, 3), 'M', (3, 192, 1, 1), 'M', (1, 128, 1, 0), (3, 256, 1, 1),
            (1, 256, 1, 0), (3, 512, 1, 1), 'M', [(1, 256, 1, 0), (3, 512, 1, 1), 4],
            (1, 512, 1, 0), (3, 1024, 1, 1), 'M', [(1, 512, 1, 0), (3, 1024, 1, 1), 2],
            (3, 1024, 1, 1), (3, 1024, 2, 1), (3, 1024, 1, 1), (3, 1024, 1, 1)]


def _round_up(x, m):
    return ((x + m - 1) // m) * m


def _tile_and_pad(n, base, cap):
    """Pick a tile size (multiple of `base`, at most `cap`) and the padded extent."""
    t = min(_round_up(n, base), cap)
    return t, _round_up(n, t)


# ----------------------------------------------------------------------------
# Pallas kernels
# ----------------------------------------------------------------------------
def _matmul_kernel(a_ref, b_ref, bias_ref, o_ref, acc_ref, *, leaky):
    """Tiled bf16 matmul, f32 accumulation, K-reduction on the last grid axis,
    fused bias (+ optional LeakyReLU(0.1)) on the final K step."""
    @pl.when(pl.program_id(2) == 0)
    def _():
        acc_ref[...] = jnp.zeros_like(acc_ref)

    acc_ref[...] += jnp.dot(a_ref[...], b_ref[...],
                            preferred_element_type=jnp.float32)

    @pl.when(pl.program_id(2) == pl.num_programs(2) - 1)
    def _():
        out = acc_ref[...] + bias_ref[...].astype(jnp.float32)
        if leaky:
            out = jnp.where(out > 0, out, 0.1 * out)
        o_ref[...] = out.astype(o_ref.dtype)


_MATMUL_LEAKY = functools.partial(_matmul_kernel, leaky=True)
_MATMUL_PLAIN = functools.partial(_matmul_kernel, leaky=False)

# Module-level index maps (stable identity -> compilation cache hits across layers).
_A_MAP = lambda i, j, k: (i, k)
_B_MAP = lambda i, j, k: (k, j)
_BIAS_ROW_MAP = lambda i, j, k: (i, 0)
_BIAS_COL_MAP = lambda i, j, k: (0, j)
_O_MAP = lambda i, j, k: (i, j)
_POOL_MAP = lambda i, j: (i, j)


def matmul_bias(a, b, bias, *, leaky, bias_per_row, out_dtype=jnp.bfloat16,
                tm_cap=256, tn_cap=512, tk_cap=1024):
    """out = a @ b + bias (optionally LeakyReLU(0.1)) via a Pallas MXU kernel.

    a: (M, K), b: (K, N); operands are cast to bf16, accumulation stays f32,
    output is written in `out_dtype` (bf16 for activations, f32 for the head).
    bias_per_row=True  -> bias shape (M,) broadcast along columns (conv layout).
    bias_per_row=False -> bias shape (N,) broadcast along rows   (linear layout).
    """
    M, K = a.shape
    K2, N = b.shape
    assert K == K2
    tm, Mp = _tile_and_pad(M, 8, tm_cap)
    tn, Np = _tile_and_pad(N, 128, tn_cap)
    tk, Kp = _tile_and_pad(K, 128, tk_cap)

    a_p = jnp.pad(a.astype(jnp.bfloat16), ((0, Mp - M), (0, Kp - K)))
    b_p = jnp.pad(b.astype(jnp.bfloat16), ((0, Kp - K), (0, Np - N)))
    bias = bias.astype(jnp.float32)
    if bias_per_row:
        bias_p = jnp.pad(bias, (0, Mp - M)).reshape(Mp, 1)
        bias_spec = pl.BlockSpec((tm, 1), _BIAS_ROW_MAP)
    else:
        bias_p = jnp.pad(bias, (0, Np - N)).reshape(1, Np)
        bias_spec = pl.BlockSpec((1, tn), _BIAS_COL_MAP)

    kernel = _MATMUL_LEAKY if leaky else _MATMUL_PLAIN
    out = pl.pallas_call(
        kernel,
        out_shape=jax.ShapeDtypeStruct((Mp, Np), out_dtype),
        grid_spec=pltpu.PrefetchScalarGridSpec(
            num_scalar_prefetch=0,
            grid=(Mp // tm, Np // tn, Kp // tk),
            in_specs=[pl.BlockSpec((tm, tk), _A_MAP),
                      pl.BlockSpec((tk, tn), _B_MAP),
                      bias_spec],
            out_specs=pl.BlockSpec((tm, tn), _O_MAP),
            scratch_shapes=[pltpu.VMEM((tm, tn), jnp.float32)]),
        compiler_params=pltpu.CompilerParams(
            dimension_semantics=("parallel", "parallel", "arbitrary")),
    )(a_p, b_p, bias_p)
    return out[:M, :N]


def _max4_kernel(a_ref, b_ref, c_ref, d_ref, o_ref):
    # Elementwise max of the four 2x2-window taps -- pure VPU, full vreg occupancy.
    o_ref[...] = jnp.maximum(jnp.maximum(a_ref[...], b_ref[...]),
                             jnp.maximum(c_ref[...], d_ref[...]))


def maxpool2x2(x):
    """nn.MaxPool2d(kernel_size=2, stride=2) on a (C, H, W) tensor via a Pallas kernel."""
    C, H, W = x.shape
    Ho, Wo = H // 2, W // 2
    L = Ho * Wo
    taps = [x[:, 0::2, 0::2], x[:, 0::2, 1::2],
            x[:, 1::2, 0::2], x[:, 1::2, 1::2]]
    taps = [t.reshape(C, L) for t in taps]

    # Sublane base 16 so bf16 (16,128) packed tiles stay unmasked.
    tc, Cp = _tile_and_pad(C, 16, 256)
    tl, Lp = _tile_and_pad(L, 128, 2048)
    taps = [jnp.pad(t, ((0, Cp - C), (0, Lp - L))) for t in taps]

    spec = pl.BlockSpec((tc, tl), _POOL_MAP)
    out = pl.pallas_call(
        _max4_kernel,
        out_shape=jax.ShapeDtypeStruct((Cp, Lp), x.dtype),
        grid=(Cp // tc, Lp // tl),
        in_specs=[spec, spec, spec, spec],
        out_specs=spec,
    )(*taps)
    return out[:C, :L].reshape(C, Ho, Wo)


# ----------------------------------------------------------------------------
# Conv / Linear wrappers (light XLA glue, compute in Pallas)
# ----------------------------------------------------------------------------
def conv2d_leaky(x, w2d, b, k, stride, padding):
    """Conv2d + LeakyReLU(0.1) in channel-major layout.

    x: (Cin, H, W) bf16, w2d: (Cout, Cin*k*k) bf16, b: (Cout,) -> (Cout, Ho, Wo) bf16."""
    Cin, H, W = x.shape
    Cout = w2d.shape[0]
    Ho = (H + 2 * padding - k) // stride + 1
    Wo = (W + 2 * padding - k) // stride + 1

    if k == 1 and stride == 1 and padding == 0:
        patches = x.reshape(Cin, H * W)               # 1x1 conv: pure matmul, no im2col
    else:
        xp = jnp.pad(x, ((0, 0), (padding, padding), (padding, padding)))
        taps = []
        for dy in range(k):
            for dx in range(k):
                taps.append(xp[:, dy:dy + stride * (Ho - 1) + 1:stride,
                                  dx:dx + stride * (Wo - 1) + 1:stride])
        # (Cin, k*k, Ho, Wo) -> (Cin*k*k, Ho*Wo); K ordered (Cin, kh, kw) to match w2d.
        patches = jnp.stack(taps, axis=1).reshape(Cin * k * k, Ho * Wo)
        # TODO(synk): the (kh, kw) taps are still materialized by XLA (inside the jit)
        #             instead of being folded into the Pallas K-reduction grid.

    out = matmul_bias(w2d, patches, b, leaky=True, bias_per_row=True)  # (Cout, Ho*Wo) bf16
    return out.reshape(Cout, Ho, Wo)


def linear(x_vec, w, b, *, leaky, out_dtype):
    """x_vec: (K,), w: (K, N) bf16 (pre-transposed), b: (N,) -> (N,).
    Fat-tile GEMV path: tm=8 (M=1 padded), large tn/tk to keep the grid tiny."""
    out = matmul_bias(x_vec[None, :], w, b, leaky=leaky, bias_per_row=False,
                      out_dtype=out_dtype, tm_cap=8, tn_cap=1024, tk_cap=2048)
    return out[0]


# ----------------------------------------------------------------------------
# Model construction (mirrors YoloV1.build()) and forward pass
# ----------------------------------------------------------------------------
def conv_layer_specs(cfg):
    specs = []
    in_ch = 3
    for v in cfg:
        if v == 'M':
            specs.append(('pool',))
        elif isinstance(v, tuple):
            k, cout, s, p = v
            specs.append(('conv', k, in_ch, cout, s, p))
            in_ch = cout
        elif isinstance(v, list):
            c1, c2, repeats = v
            for _ in range(repeats):
                k, cout, s, p = c1
                specs.append(('conv', k, in_ch, cout, s, p))
                in_ch = cout
                k, cout, s, p = c2
                specs.append(('conv', k, in_ch, cout, s, p))
                in_ch = cout
    return specs


def init_params(key, specs, img_size, fc_hidden, fc_out):
    convs = []
    s, c = img_size, 3
    for spec in specs:
        if spec[0] == 'pool':
            s = s // 2
            continue
        _, k, cin, cout, stride, pad = spec
        s = (s + 2 * pad - k) // stride + 1
        c = cout
        key, kw, kb = jax.random.split(key, 3)
        fan_in = cin * k * k
        w = (jax.random.normal(kw, (cout, cin, k, k), jnp.float32)
             * jnp.sqrt(2.0 / fan_in)).reshape(cout, fan_in).astype(jnp.bfloat16)
        b = jax.random.normal(kb, (cout,), jnp.float32) * 0.01
        convs.append((w, b))

    d_in = c * s * s  # == 1024*7*7 for the full-size model
    key, k0, kb0, k1, kb1 = jax.random.split(key, 5)
    # fl0 / fl1 weights stored pre-transposed (in_features, out_features), bf16.
    w0 = (jax.random.normal(k0, (d_in, fc_hidden), jnp.float32)
          * jnp.sqrt(1.0 / d_in)).astype(jnp.bfloat16)
    b0 = jax.random.normal(kb0, (fc_hidden,), jnp.float32) * 0.01
    w1 = (jax.random.normal(k1, (fc_hidden, fc_out), jnp.float32)
          * jnp.sqrt(1.0 / fc_hidden)).astype(jnp.bfloat16)
    b1 = jax.random.normal(kb1, (fc_out,), jnp.float32) * 0.01
    return {'convs': convs, 'fl0': (w0, b0), 'fl1': (w1, b1)}


def make_forward(specs):
    """Builds a jitted forward: x (1, Cin, H, W) NCHW -> (30, 7, 7)."""
    def fwd(x, convs, fl0, fl1):
        h = x[0].astype(jnp.bfloat16)  # (C, H, W), bf16 activations end-to-end
        ci = 0
        for spec in specs:
            if spec[0] == 'pool':
                h = maxpool2x2(h)
            else:
                _, k, cin, cout, stride, pad = spec
                w2d, b = convs[ci]
                ci += 1
                h = conv2d_leaky(h, w2d, b, k, stride, pad)

        flat = h.reshape(-1)  # (C,H,W) flatten == torch .view(-1) on NCHW with N=1
        w0, b0 = fl0
        # forward order: fl0 -> dropout -> leaky -> fl1
        # TODO(synk): nn.Dropout(0.5) train-mode stochastic masking has no deterministic
        #             equivalent here; implemented as eval-mode identity.
        z = linear(flat, w0, b0, leaky=True, out_dtype=jnp.bfloat16)
        w1, b1 = fl1
        z = linear(z, w1, b1, leaky=False, out_dtype=jnp.float32)
        return z.reshape(30, 7, 7)

    return jax.jit(fwd)


if __name__ == "__main__":
    # Small instantiation of the YoloV1 architecture: identical cfg structure / layer
    # order / head, channels divided by WIDTH_DIV, 64x64 input (final feature map
    # C_last x 1 x 1).  Full-size: WIDTH_DIV=1, IMG=448.
    WIDTH_DIV = 16
    IMG = 64

    def _scale(v):
        if v == 'M':
            return 'M'
        if isinstance(v, tuple):
            k, c, s, p = v
            return (k, c // WIDTH_DIV, s, p)
        c1, c2, r = v
        return [_scale(c1), _scale(c2), r]

    cfg = [_scale(v) for v in CFG_FULL]
    fc_hidden = 4096 // WIDTH_DIV
    fc_out = 30 * 7 * 7  # fixed detection head size -> final view(30, 7, 7)

    specs = conv_layer_specs(cfg)
    key = jax.random.PRNGKey(0)
    key, kx = jax.random.split(key)
    x = jax.random.normal(kx, (1, 3, IMG, IMG), dtype=jnp.float32)
    params = init_params(key, specs, IMG, fc_hidden, fc_out)

    forward = make_forward(specs)
    y = forward(x, params['convs'], params['fl0'], params['fl1'])
    y = jax.block_until_ready(y)
    assert y.shape == (30, 7, 7)
    assert bool(jnp.all(jnp.isfinite(y)))
    print("KERNEL_OK")
</pallas_src>

<mosaic_0001>
module attributes {stable_mosaic.version = 11 : i64} {
  func.func @_matmul_kernel(%arg0: i32, %arg1: i32, %arg2: i32, %arg3: memref<8x256xbf16, #tpu.memory_space<vmem>>, %arg4: memref<256x512xbf16, #tpu.memory_space<vmem>>, %arg5: memref<8x1xf32, #tpu.memory_space<vmem>>, %arg6: memref<8x512xbf16, #tpu.memory_space<vmem>>, %arg7: memref<8x512xf32, #tpu.memory_space<vmem>>) attributes {dimension_semantics = [#tpu.dimension_semantics<parallel>, #tpu.dimension_semantics<parallel>, #tpu.dimension_semantics<arbitrary>], iteration_bounds = array<i64: 1, 2, 1>, scalar_prefetch = 0 : i64, scratch_operands = 1 : i64, tpu.core_type = #tpu.core_type<tc>, window_params = [{transform_indices = @transform_0, window_bounds = array<i64: 8, 256>}, {transform_indices = @transform_1, window_bounds = array<i64: 256, 512>}, {transform_indices = @transform_2, window_bounds = array<i64: 8, 1>}, {transform_indices = @transform_3, window_bounds = array<i64: 8, 512>}]} {
    %c0_i32 = arith.constant 0 : i32
    %0 = arith.cmpi eq, %arg2, %c0_i32 : i32
    %1 = arith.extui %0 : i1 to i32
    %c0_i32_0 = arith.constant 0 : i32
    %2 = arith.cmpi ne, %1, %c0_i32_0 : i32
    scf.if %2 {
      %cst_10 = arith.constant 0.000000e+00 : f32
      %12 = vector.broadcast %cst_10 : f32 to vector<8x512xf32>
      %c0_11 = arith.constant 0 : index
      %c0_12 = arith.constant 0 : index
      %13 = vector.load %arg7[%c0_11, %c0_12] : memref<8x512xf32, #tpu.memory_space<vmem>>, vector<8x512xf32>
      tpu.vector_store %arg7[%c0_11, %c0_12], %12 {strides = array<i32>} : memref<8x512xf32, #tpu.memory_space<vmem>>, vector<8x512xf32>,
    } else {
    }
    %c0 = arith.constant 0 : index
    %c0_1 = arith.constant 0 : index
    %3 = vector.load %arg7[%c0, %c0_1] : memref<8x512xf32, #tpu.memory_space<vmem>>, vector<8x512xf32>
    %c0_2 = arith.constant 0 : index
    %c0_3 = arith.constant 0 : index
    %4 = vector.load %arg3[%c0_2, %c0_3] : memref<8x256xbf16, #tpu.memory_space<vmem>>, vector<8x256xbf16>
    %c0_4 = arith.constant 0 : index
    %c0_5 = arith.constant 0 : index
    %5 = vector.load %arg4[%c0_4, %c0_5] : memref<256x512xbf16, #tpu.memory_space<vmem>>, vector<256x512xbf16>
    %cst = arith.constant dense<0.000000e+00> : vector<8x512xf32>
    %6 = tpu.matmul %4, %5, %cst {dimension_numbers = #tpu.dot_dimension_numbers<[1], [0], [0], [1], [0, 0, 1, 1], [], []>} : vector<8x256xbf16>, vector<256x512xbf16>, vector<8x512xf32> -> vector<8x512xf32>
    %7 = arith.addf %3, %6 : vector<8x512xf32>
    %c0_6 = arith.constant 0 : index
    %c0_7 = arith.constant 0 : index
    %8 = vector.load %arg7[%c0_6, %c0_7] : memref<8x512xf32, #tpu.memory_space<vmem>>, vector<8x512xf32>
    tpu.vector_store %arg7[%c0_6, %c0_7], %7 {strides = array<i32>} : memref<8x512xf32, #tpu.memory_space<vmem>>, vector<8x512xf32>,
    %c0_i32_8 = arith.constant 0 : i32
    %9 = arith.cmpi eq, %arg2, %c0_i32_8 : i32
    %10 = arith.extui %9 : i1 to i32
    %c0_i32_9 = arith.constant 0 : i32
    %11 = arith.cmpi ne, %10, %c0_i32_9 : i32
    scf.if %11 {
      %c0_10 = arith.constant 0 : index
      %c0_11 = arith.constant 0 : index
      %12 = vector.load %arg7[%c0_10, %c0_11] : memref<8x512xf32, #tpu.memory_space<vmem>>, vector<8x512xf32>
      %c0_12 = arith.constant 0 : index
      %c0_13 = arith.constant 0 : index
      %13 = vector.load %arg5[%c0_12, %c0_13] : memref<8x1xf32, #tpu.memory_space<vmem>>, vector<8x1xf32>
      %14 = vector.broadcast %13 : vector<8x1xf32> to vector<8x512xf32>
      %15 = arith.addf %12, %14 : vector<8x512xf32>
      %cst_14 = arith.constant 0.000000e+00 : f32
      %16 = vector.broadcast %cst_14 : f32 to vector<8x512xf32>
      %17 = arith.cmpf ogt, %15, %16 : vector<8x512xf32>
      %cst_15 = arith.constant 1.000000e-01 : f32
      %18 = vector.broadcast %cst_15 : f32 to vector<8x512xf32>
      %19 = arith.mulf %18, %15 : vector<8x512xf32>
      %20 = arith.select %17, %15, %19 : vector<8x512xi1>, vector<8x512xf32>
      %21 = arith.truncf %20 : vector<8x512xf32> to vector<8x512xbf16>
      %c0_16 = arith.constant 0 : index
      %c0_17 = arith.constant 0 : index
      %22 = vector.load %arg6[%c0_16, %c0_17] : memref<8x512xbf16, #tpu.memory_space<vmem>>, vector<8x512xbf16>
      tpu.vector_store %arg6[%c0_16, %c0_17], %21 {strides = array<i32>} : memref<8x512xbf16, #tpu.memory_space<vmem>>, vector<8x512xbf16>,
    } else {
    }
    return
  }
  func.func @transform_0(%arg0: i32, %arg1: i32, %arg2: i32) -> (i32, i32) {
    %c0_i32 = arith.constant 0 : i32
    return %arg0, %arg2 : i32, i32
  }
  func.func @transform_1(%arg0: i32, %arg1: i32, %arg2: i32) -> (i32, i32) {
    %c0_i32 = arith.constant 0 : i32
    return %arg2, %arg1 : i32, i32
  }
  func.func @transform_2(%arg0: i32, %arg1: i32, %arg2: i32) -> (i32, i32) {
    %c0_i32 = arith.constant 0 : i32
    %c0_i32_0 = arith.constant 0 : i32
    return %arg0, %c0_i32 : i32, i32
  }
  func.func @transform_3(%arg0: i32, %arg1: i32, %arg2: i32) -> (i32, i32) {
    %c0_i32 = arith.constant 0 : i32
    return %arg0, %arg1 : i32, i32
  }
}

module attributes {stable_mosaic.version = 11 : i64} {
  func.func @_max4_kernel(%arg0: i32, %arg1: i32, %arg2: memref<16x256xbf16, #tpu.memory_space<vmem>>, %arg3: memref<16x256xbf16, #tpu.memory_space<vmem>>, %arg4: memref<16x256xbf16, #tpu.memory_space<vmem>>, %arg5: memref<16x256xbf16, #tpu.memory_space<vmem>>, %arg6: memref<16x256xbf16, #tpu.memory_space<vmem>>) attributes {dimension_semantics = [#tpu.dimension_semantics<arbitrary>, #tpu.dimension_semantics<arbitrary>], iteration_bounds = array<i64: 1, 1>, scalar_prefetch = 0 : i64, scratch_operands = 0 : i64, tpu.core_type = #tpu.core_type<tc>, window_params = [{transform_indices = @transform_0, window_bounds = array<i64: 16, 256>}, {transform_indices = @transform_1, window_bounds = array<i64: 16, 256>}, {transform_indices = @transform_2, window_bounds = array<i64: 16, 256>}, {transform_indices = @transform_3, window_bounds = array<i64: 16, 256>}, {transform_indices = @transform_4, window_bounds = array<i64: 16, 256>}]} {
    %c0 = arith.constant 0 : index
    %c0_0 = arith.constant 0 : index
    %0 = vector.load %arg2[%c0, %c0_0] : memref<16x256xbf16, #tpu.memory_space<vmem>>, vector<16x256xbf16>
    %c0_1 = arith.constant 0 : index
    %c0_2 = arith.constant 0 : index
    %1 = vector.load %arg3[%c0_1, %c0_2] : memref<16x256xbf16, #tpu.memory_space<vmem>>, vector<16x256xbf16>
    %2 = arith.maximumf %0, %1 : vector<16x256xbf16>
    %c0_3 = arith.constant 0 : index
    %c0_4 = arith.constant 0 : index
    %3 = vector.load %arg4[%c0_3, %c0_4] : memref<16x256xbf16, #tpu.memory_space<vmem>>, vector<16x256xbf16>
    %c0_5 = arith.constant 0 : index
    %c0_6 = arith.constant 0 : index
    %4 = vector.load %arg5[%c0_5, %c0_6] : memref<16x256xbf16, #tpu.memory_space<vmem>>, vector<16x256xbf16>
    %5 = arith.maximumf %3, %4 : vector<16x256xbf16>
    %6 = arith.maximumf %2, %5 : vector<16x256xbf16>
    %c0_7 = arith.constant 0 : index
    %c0_8 = arith.constant 0 : index
    %7 = vector.load %arg6[%c0_7, %c0_8] : memref<16x256xbf16, #tpu.memory_space<vmem>>, vector<16x256xbf16>
    tpu.vector_store %arg6[%c0_7, %c0_8], %6 {strides = array<i32>} : memref<16x256xbf16, #tpu.memory_space<vmem>>, vector<16x256xbf16>,
    return
  }
  func.func @transform_0(%arg0: i32, %arg1: i32) -> (i32, i32) {
    %c0_i32 = arith.constant 0 : i32
    return %arg0, %arg1 : i32, i32
  }
  func.func @transform_1(%arg0: i32, %arg1: i32) -> (i32, i32) {
    %c0_i32 = arith.constant 0 : i32
    return %arg0, %arg1 : i32, i32
  }
  func.func @transform_2(%arg0: i32, %arg1: i32) -> (i32, i32) {
    %c0_i32 = arith.constant 0 : i32
    return %arg0, %arg1 : i32, i32
  }
  func.func @transform_3(%arg0: i32, %arg1: i32) -> (i32, i32) {
    %c0_i32 = arith.constant 0 : i32
    return %arg0, %arg1 : i32, i32
  }
  func.func @transform_4(%arg0: i32, %arg1: i32) -> (i32, i32) {
    %c0_i32 = arith.constant 0 : i32
    return %arg0, %arg1 : i32, i32
  }
}

module attributes {stable_mosaic.version = 11 : i64} {
  func.func @_matmul_kernel(%arg0: i32, %arg1: i32, %arg2: i32, %arg3: memref<16x128xbf16, #tpu.memory_space<vmem>>, %arg4: memref<128x256xbf16, #tpu.memory_space<vmem>>, %arg5: memref<16x1xf32, #tpu.memory_space<vmem>>, %arg6: memref<16x256xbf16, #tpu.memory_space<vmem>>, %arg7: memref<16x256xf32, #tpu.memory_space<vmem>>) attributes {dimension_semantics = [#tpu.dimension_semantics<parallel>, #tpu.dimension_semantics<parallel>, #tpu.dimension_semantics<arbitrary>], iteration_bounds = array<i64: 1, 1, 1>, scalar_prefetch = 0 : i64, scratch_operands = 1 : i64, tpu.core_type = #tpu.core_type<tc>, window_params = [{transform_indices = @transform_0, window_bounds = array<i64: 16, 128>}, {transform_indices = @transform_1, window_bounds = array<i64: 128, 256>}, {transform_indices = @transform_2, window_bounds = array<i64: 16, 1>}, {transform_indices = @transform_3, window_bounds = array<i64: 16, 256>}]} {
    %c0_i32 = arith.constant 0 : i32
    %0 = arith.cmpi eq, %arg2, %c0_i32 : i32
    %1 = arith.extui %0 : i1 to i32
    %c0_i32_0 = arith.constant 0 : i32
    %2 = arith.cmpi ne, %1, %c0_i32_0 : i32
    scf.if %2 {
      %cst_10 = arith.constant 0.000000e+00 : f32
      %12 = vector.broadcast %cst_10 : f32 to vector<16x256xf32>
      %c0_11 = arith.constant 0 : index
      %c0_12 = arith.constant 0 : index
      %13 = vector.load %arg7[%c0_11, %c0_12] : memref<16x256xf32, #tpu.memory_space<vmem>>, vector<16x256xf32>
      tpu.vector_store %arg7[%c0_11, %c0_12], %12 {strides = array<i32>} : memref<16x256xf32, #tpu.memory_space<vmem>>, vector<16x256xf32>,
    } else {
    }
    %c0 = arith.constant 0 : index
    %c0_1 = arith.constant 0 : index
    %3 = vector.load %arg7[%c0, %c0_1] : memref<16x256xf32, #tpu.memory_space<vmem>>, vector<16x256xf32>
    %c0_2 = arith.constant 0 : index
    %c0_3 = arith.constant 0 : index
    %4 = vector.load %arg3[%c0_2, %c0_3] : memref<16x128xbf16, #tpu.memory_space<vmem>>, vector<16x128xbf16>
    %c0_4 = arith.constant 0 : index
    %c0_5 = arith.constant 0 : index
    %5 = vector.load %arg4[%c0_4, %c0_5] : memref<128x256xbf16, #tpu.memory_space<vmem>>, vector<128x256xbf16>
    %cst = arith.constant dense<0.000000e+00> : vector<16x256xf32>
    %6 = tpu.matmul %4, %5, %cst {dimension_numbers = #tpu.dot_dimension_numbers<[1], [0], [0], [1], [0, 0, 1, 1], [], []>} : vector<16x128xbf16>, vector<128x256xbf16>, vector<16x256xf32> -> vector<16x256xf32>
    %7 = arith.addf %3, %6 : vector<16x256xf32>
    %c0_6 = arith.constant 0 : index
    %c0_7 = arith.constant 0 : index
    %8 = vector.load %arg7[%c0_6, %c0_7] : memref<16x256xf32, #tpu.memory_space<vmem>>, vector<16x256xf32>
    tpu.vector_store %arg7[%c0_6, %c0_7], %7 {strides = array<i32>} : memref<16x256xf32, #tpu.memory_space<vmem>>, vector<16x256xf32>,
    %c0_i32_8 = arith.constant 0 : i32
    %9 = arith.cmpi eq, %arg2, %c0_i32_8 : i32
    %10 = arith.extui %9 : i1 to i32
    %c0_i32_9 = arith.constant 0 : i32
    %11 = arith.cmpi ne, %10, %c0_i32_9 : i32
    scf.if %11 {
      %c0_10 = arith.constant 0 : index
      %c0_11 = arith.constant 0 : index
      %12 = vector.load %arg7[%c0_10, %c0_11] : memref<16x256xf32, #tpu.memory_space<vmem>>, vector<16x256xf32>
      %c0_12 = arith.constant 0 : index
      %c0_13 = arith.constant 0 : index
      %13 = vector.load %arg5[%c0_12, %c0_13] : memref<16x1xf32, #tpu.memory_space<vmem>>, vector<16x1xf32>
      %14 = vector.broadcast %13 : vector<16x1xf32> to vector<16x256xf32>
      %15 = arith.addf %12, %14 : vector<16x256xf32>
      %cst_14 = arith.constant 0.000000e+00 : f32
      %16 = vector.broadcast %cst_14 : f32 to vector<16x256xf32>
      %17 = arith.cmpf ogt, %15, %16 : vector<16x256xf32>
      %cst_15 = arith.constant 1.000000e-01 : f32
      %18 = vector.broadcast %cst_15 : f32 to vector<16x256xf32>
      %19 = arith.mulf %18, %15 : vector<16x256xf32>
      %20 = arith.select %17, %15, %19 : vector<16x256xi1>, vector<16x256xf32>
      %21 = arith.truncf %20 : vector<16x256xf32> to vector<16x256xbf16>
      %c0_16 = arith.constant 0 : index
      %c0_17 = arith.constant 0 : index
      %22 = vector.load %arg6[%c0_16, %c0_17] : memref<16x256xbf16, #tpu.memory_space<vmem>>, vector<16x256xbf16>
      tpu.vector_store %arg6[%c0_16, %c0_17], %21 {strides = array<i32>} : memref<16x256xbf16, #tpu.memory_space<vmem>>, vector<16x256xbf16>,
    } else {
    }
    return
  }
  func.func @transform_0(%arg0: i32, %arg1: i32, %arg2: i32) -> (i32, i32) {
    %c0_i32 = arith.constant 0 : i32
    return %arg0, %arg2 : i32, i32
  }
  func.func @transform_1(%arg0: i32, %arg1: i32, %arg2: i32) -> (i32, i32) {
    %c0_i32 = arith.constant 0 : i32
    return %arg2, %arg1 : i32, i32
  }
  func.func @transform_2(%arg0: i32, %arg1: i32, %arg2: i32) -> (i32, i32) {
    %c0_i32 = arith.constant 0 : i32
    %c0_i32_0 = arith.constant 0 : i32
    return %arg0, %c0_i32 : i32, i32
  }
  func.func @transform_3(%arg0: i32, %arg1: i32, %arg2: i32) -> (i32, i32) {
    %c0_i32 = arith.constant 0 : i32
    return %arg0, %arg1 : i32, i32
  }
}

module attributes {stable_mosaic.version = 11 : i64} {
  func.func @_max4_kernel(%arg0: i32, %arg1: i32, %arg2: memref<16x128xbf16, #tpu.memory_space<vmem>>, %arg3: memref<16x128xbf16, #tpu.memory_space<vmem>>, %arg4: memref<16x128xbf16, #tpu.memory_space<vmem>>, %arg5: memref<16x128xbf16, #tpu.memory_space<vmem>>, %arg6: memref<16x128xbf16, #tpu.memory_space<vmem>>) attributes {dimension_semantics = [#tpu.dimension_semantics<arbitrary>, #tpu.dimension_semantics<arbitrary>], iteration_bounds = array<i64: 1, 1>, scalar_prefetch = 0 : i64, scratch_operands = 0 : i64, tpu.core_type = #tpu.core_type<tc>, window_params = [{transform_indices = @transform_0, window_bounds = array<i64: 16, 128>}, {transform_indices = @transform_1, window_bounds = array<i64: 16, 128>}, {transform_indices = @transform_2, window_bounds = array<i64: 16, 128>}, {transform_indices = @transform_3, window_bounds = array<i64: 16, 128>}, {transform_indices = @transform_4, window_bounds = array<i64: 16, 128>}]} {
    %c0 = arith.constant 0 : index
    %c0_0 = arith.constant 0 : index
    %0 = vector.load %arg2[%c0, %c0_0] : memref<16x128xbf16, #tpu.memory_space<vmem>>, vector<16x128xbf16>
    %c0_1 = arith.constant 0 : index
    %c0_2 = arith.constant 0 : index
    %1 = vector.load %arg3[%c0_1, %c0_2] : memref<16x128xbf16, #tpu.memory_space<vmem>>, vector<16x128xbf16>
    %2 = arith.maximumf %0, %1 : vector<16x128xbf16>
    %c0_3 = arith.constant 0 : index
    %c0_4 = arith.constant 0 : index
    %3 = vector.load %arg4[%c0_3, %c0_4] : memref<16x128xbf16, #tpu.memory_space<vmem>>, vector<16x128xbf16>
    %c0_5 = arith.constant 0 : index
    %c0_6 = arith.constant 0 : index
    %4 = vector.load %arg5[%c0_5, %c0_6] : memref<16x128xbf16, #tpu.memory_space<vmem>>, vector<16x128xbf16>
    %5 = arith.maximumf %3, %4 : vector<16x128xbf16>
    %6 = arith.maximumf %2, %5 : vector<16x128xbf16>
    %c0_7 = arith.constant 0 : index
    %c0_8 = arith.constant 0 : index
    %7 = vector.load %arg6[%c0_7, %c0_8] : memref<16x128xbf16, #tpu.memory_space<vmem>>, vector<16x128xbf16>
    tpu.vector_store %arg6[%c0_7, %c0_8], %6 {strides = array<i32>} : memref<16x128xbf16, #tpu.memory_space<vmem>>, vector<16x128xbf16>,
    return
  }
  func.func @transform_0(%arg0: i32, %arg1: i32) -> (i32, i32) {
    %c0_i32 = arith.constant 0 : i32
    return %arg0, %arg1 : i32, i32
  }
  func.func @transform_1(%arg0: i32, %arg1: i32) -> (i32, i32) {
    %c0_i32 = arith.constant 0 : i32
    return %arg0, %arg1 : i32, i32
  }
  func.func @transform_2(%arg0: i32, %arg1: i32) -> (i32, i32) {
    %c0_i32 = arith.constant 0 : i32
    return %arg0, %arg1 : i32, i32
  }
  func.func @transform_3(%arg0: i32, %arg1: i32) -> (i32, i32) {
    %c0_i32 = arith.constant 0 : i32
    return %arg0, %arg1 : i32, i32
  }
  func.func @transform_4(%arg0: i32, %arg1: i32) -> (i32, i32) {
    %c0_i32 = arith.constant 0 : i32
    return %arg0, %arg1 : i32, i32
  }
}

module attributes {stable_mosaic.version = 11 : i64} {
  func.func @_matmul_kernel(%arg0: i32, %arg1: i32, %arg2: i32, %arg3: memref<8x128xbf16, #tpu.memory_space<vmem>>, %arg4: memref<128x128xbf16, #tpu.memory_space<vmem>>, %arg5: memref<8x1xf32, #tpu.memory_space<vmem>>, %arg6: memref<8x128xbf16, #tpu.memory_space<vmem>>, %arg7: memref<8x128xf32, #tpu.memory_space<vmem>>) attributes {dimension_semantics = [#tpu.dimension_semantics<parallel>, #tpu.dimension_semantics<parallel>, #tpu.dimension_semantics<arbitrary>], iteration_bounds = array<i64: 1, 1, 1>, scalar_prefetch = 0 : i64, scratch_operands = 1 : i64, tpu.core_type = #tpu.core_type<tc>, window_params = [{transform_indices = @transform_0, window_bounds = array<i64: 8, 128>}, {transform_indices = @transform_1, window_bounds = array<i64: 128, 128>}, {transform_indices = @transform_2, window_bounds = array<i64: 8, 1>}, {transform_indices = @transform_3, window_bounds = array<i64: 8, 128>}]} {
    %c0_i32 = arith.constant 0 : i32
    %0 = arith.cmpi eq, %arg2, %c0_i32 : i32
    %1 = arith.extui %0 : i1 to i32
    %c0_i32_0 = arith.constant 0 : i32
    %2 = arith.cmpi ne, %1, %c0_i32_0 : i32
    scf.if %2 {
      %cst_10 = arith.constant 0.000000e+00 : f32
      %12 = vector.broadcast %cst_10 : f32 to vector<8x128xf32>
      %c0_11 = arith.constant 0 : index
      %c0_12 = arith.constant 0 : index
      %13 = vector.load %arg7[%c0_11, %c0_12] : memref<8x128xf32, #tpu.memory_space<vmem>>, vector<8x128xf32>
      tpu.vector_store %arg7[%c0_11, %c0_12], %12 {strides = array<i32>} : memref<8x128xf32, #tpu.memory_space<vmem>>, vector<8x128xf32>,
    } else {
    }
    %c0 = arith.constant 0 : index
    %c0_1 = arith.constant 0 : index
    %3 = vector.load %arg7[%c0, %c0_1] : memref<8x128xf32, #tpu.memory_space<vmem>>, vector<8x128xf32>
    %c0_2 = arith.constant 0 : index
    %c0_3 = arith.constant 0 : index
    %4 = vector.load %arg3[%c0_2, %c0_3] : memref<8x128xbf16, #tpu.memory_space<vmem>>, vector<8x128xbf16>
    %c0_4 = arith.constant 0 : index
    %c0_5 = arith.constant 0 : index
    %5 = vector.load %arg4[%c0_4, %c0_5] : memref<128x128xbf16, #tpu.memory_space<vmem>>, vector<128x128xbf16>
    %cst = arith.constant dense<0.000000e+00> : vector<8x128xf32>
    %6 = tpu.matmul %4, %5, %cst {dimension_numbers = #tpu.dot_dimension_numbers<[1], [0], [0], [1], [0, 0, 1, 1], [], []>} : vector<8x128xbf16>, vector<128x128xbf16>, vector<8x128xf32> -> vector<8x128xf32>
    %7 = arith.addf %3, %6 : vector<8x128xf32>
    %c0_6 = arith.constant 0 : index
    %c0_7 = arith.constant 0 : index
    %8 = vector.load %arg7[%c0_6, %c0_7] : memref<8x128xf32, #tpu.memory_space<vmem>>, vector<8x128xf32>
    tpu.vector_store %arg7[%c0_6, %c0_7], %7 {strides = array<i32>} : memref<8x128xf32, #tpu.memory_space<vmem>>, vector<8x128xf32>,
    %c0_i32_8 = arith.constant 0 : i32
    %9 = arith.cmpi eq, %arg2, %c0_i32_8 : i32
    %10 = arith.extui %9 : i1 to i32
    %c0_i32_9 = arith.constant 0 : i32
    %11 = arith.cmpi ne, %10, %c0_i32_9 : i32
    scf.if %11 {
      %c0_10 = arith.constant 0 : index
      %c0_11 = arith.constant 0 : index
      %12 = vector.load %arg7[%c0_10, %c0_11] : memref<8x128xf32, #tpu.memory_space<vmem>>, vector<8x128xf32>
      %c0_12 = arith.constant 0 : index
      %c0_13 = arith.constant 0 : index
      %13 = vector.load %arg5[%c0_12, %c0_13] : memref<8x1xf32, #tpu.memory_space<vmem>>, vector<8x1xf32>
      %14 = vector.broadcast %13 : vector<8x1xf32> to vector<8x128xf32>
      %15 = arith.addf %12, %14 : vector<8x128xf32>
      %cst_14 = arith.constant 0.000000e+00 : f32
      %16 = vector.broadcast %cst_14 : f32 to vector<8x128xf32>
      %17 = arith.cmpf ogt, %15, %16 : vector<8x128xf32>
      %cst_15 = arith.constant 1.000000e-01 : f32
      %18 = vector.broadcast %cst_15 : f32 to vector<8x128xf32>
      %19 = arith.mulf %18, %15 : vector<8x128xf32>
      %20 = arith.select %17, %15, %19 : vector<8x128xi1>, vector<8x128xf32>
      %21 = arith.truncf %20 : vector<8x128xf32> to vector<8x128xbf16>
      %c0_16 = arith.constant 0 : index
      %c0_17 = arith.constant 0 : index
      %22 = vector.load %arg6[%c0_16, %c0_17] : memref<8x128xbf16, #tpu.memory_space<vmem>>, vector<8x128xbf16>
      tpu.vector_store %arg6[%c0_16, %c0_17], %21 {strides = array<i32>} : memref<8x128xbf16, #tpu.memory_space<vmem>>, vector<8x128xbf16>,
    } else {
    }
    return
  }
  func.func @transform_0(%arg0: i32, %arg1: i32, %arg2: i32) -> (i32, i32) {
    %c0_i32 = arith.constant 0 : i32
    return %arg0, %arg2 : i32, i32
  }
  func.func @transform_1(%arg0: i32, %arg1: i32, %arg2: i32) -> (i32, i32) {
    %c0_i32 = arith.constant 0 : i32
    return %arg2, %arg1 : i32, i32
  }
  func.func @transform_2(%arg0: i32, %arg1: i32, %arg2: i32) -> (i32, i32) {
    %c0_i32 = arith.constant 0 : i32
    %c0_i32_0 = arith.constant 0 : i32
    return %arg0, %c0_i32 : i32, i32
  }
  func.func @transform_3(%arg0: i32, %arg1: i32, %arg2: i32) -> (i32, i32) {
    %c0_i32 = arith.constant 0 : i32
    return %arg0, %arg1 : i32, i32
  }
}

module attributes {stable_mosaic.version = 11 : i64} {
  func.func @_matmul_kernel(%arg0: i32, %arg1: i32, %arg2: i32, %arg3: memref<16x128xbf16, #tpu.memory_space<vmem>>, %arg4: memref<128x128xbf16, #tpu.memory_space<vmem>>, %arg5: memref<16x1xf32, #tpu.memory_space<vmem>>, %arg6: memref<16x128xbf16, #tpu.memory_space<vmem>>, %arg7: memref<16x128xf32, #tpu.memory_space<vmem>>) attributes {dimension_semantics = [#tpu.dimension_semantics<parallel>, #tpu.dimension_semantics<parallel>, #tpu.dimension_semantics<arbitrary>], iteration_bounds = array<i64: 1, 1, 1>, scalar_prefetch = 0 : i64, scratch_operands = 1 : i64, tpu.core_type = #tpu.core_type<tc>, window_params = [{transform_indices = @transform_0, window_bounds = array<i64: 16, 128>}, {transform_indices = @transform_1, window_bounds = array<i64: 128, 128>}, {transform_indices = @transform_2, window_bounds = array<i64: 16, 1>}, {transform_indices = @transform_3, window_bounds = array<i64: 16, 128>}]} {
    %c0_i32 = arith.constant 0 : i32
    %0 = arith.cmpi eq, %arg2, %c0_i32 : i32
    %1 = arith.extui %0 : i1 to i32
    %c0_i32_0 = arith.constant 0 : i32
    %2 = arith.cmpi ne, %1, %c0_i32_0 : i32
    scf.if %2 {
      %cst_10 = arith.constant 0.000000e+00 : f32
      %12 = vector.broadcast %cst_10 : f32 to vector<16x128xf32>
      %c0_11 = arith.constant 0 : index
      %c0_12 = arith.constant 0 : index
      %13 = vector.load %arg7[%c0_11, %c0_12] : memref<16x128xf32, #tpu.memory_space<vmem>>, vector<16x128xf32>
      tpu.vector_store %arg7[%c0_11, %c0_12], %12 {strides = array<i32>} : memref<16x128xf32, #tpu.memory_space<vmem>>, vector<16x128xf32>,
    } else {
    }
    %c0 = arith.constant 0 : index
    %c0_1 = arith.constant 0 : index
    %3 = vector.load %arg7[%c0, %c0_1] : memref<16x128xf32, #tpu.memory_space<vmem>>, vector<16x128xf32>
    %c0_2 = arith.constant 0 : index
    %c0_3 = arith.constant 0 : index
    %4 = vector.load %arg3[%c0_2, %c0_3] : memref<16x128xbf16, #tpu.memory_space<vmem>>, vector<16x128xbf16>
    %c0_4 = arith.constant 0 : index
    %c0_5 = arith.constant 0 : index
    %5 = vector.load %arg4[%c0_4, %c0_5] : memref<128x128xbf16, #tpu.memory_space<vmem>>, vector<128x128xbf16>
    %cst = arith.constant dense<0.000000e+00> : vector<16x128xf32>
    %6 = tpu.matmul %4, %5, %cst {dimension_numbers = #tpu.dot_dimension_numbers<[1], [0], [0], [1], [0, 0, 1, 1], [], []>} : vector<16x128xbf16>, vector<128x128xbf16>, vector<16x128xf32> -> vector<16x128xf32>
    %7 = arith.addf %3, %6 : vector<16x128xf32>
    %c0_6 = arith.constant 0 : index
    %c0_7 = arith.constant 0 : index
    %8 = vector.load %arg7[%c0_6, %c0_7] : memref<16x128xf32, #tpu.memory_space<vmem>>, vector<16x128xf32>
    tpu.vector_store %arg7[%c0_6, %c0_7], %7 {strides = array<i32>} : memref<16x128xf32, #tpu.memory_space<vmem>>, vector<16x128xf32>,
    %c0_i32_8 = arith.constant 0 : i32
    %9 = arith.cmpi eq, %arg2, %c0_i32_8 : i32
    %10 = arith.extui %9 : i1 to i32
    %c0_i32_9 = arith.constant 0 : i32
    %11 = arith.cmpi ne, %10, %c0_i32_9 : i32
    scf.if %11 {
      %c0_10 = arith.constant 0 : index
      %c0_11 = arith.constant 0 : index
      %12 = vector.load %arg7[%c0_10, %c0_11] : memref<16x128xf32, #tpu.memory_space<vmem>>, vector<16x128xf32>
      %c0_12 = arith.constant 0 : index
      %c0_13 = arith.constant 0 : index
      %13 = vector.load %arg5[%c0_12, %c0_13] : memref<16x1xf32, #tpu.memory_space<vmem>>, vector<16x1xf32>
      %14 = vector.broadcast %13 : vector<16x1xf32> to vector<16x128xf32>
      %15 = arith.addf %12, %14 : vector<16x128xf32>
      %cst_14 = arith.constant 0.000000e+00 : f32
      %16 = vector.broadcast %cst_14 : f32 to vector<16x128xf32>
      %17 = arith.cmpf ogt, %15, %16 : vector<16x128xf32>
      %cst_15 = arith.constant 1.000000e-01 : f32
      %18 = vector.broadcast %cst_15 : f32 to vector<16x128xf32>
      %19 = arith.mulf %18, %15 : vector<16x128xf32>
      %20 = arith.select %17, %15, %19 : vector<16x128xi1>, vector<16x128xf32>
      %21 = arith.truncf %20 : vector<16x128xf32> to vector<16x128xbf16>
      %c0_16 = arith.constant 0 : index
      %c0_17 = arith.constant 0 : index
      %22 = vector.load %arg6[%c0_16, %c0_17] : memref<16x128xbf16, #tpu.memory_space<vmem>>, vector<16x128xbf16>
      tpu.vector_store %arg6[%c0_16, %c0_17], %21 {strides = array<i32>} : memref<16x128xbf16, #tpu.memory_space<vmem>>, vector<16x128xbf16>,
    } else {
    }
    return
  }
  func.func @transform_0(%arg0: i32, %arg1: i32, %arg2: i32) -> (i32, i32) {
    %c0_i32 = arith.constant 0 : i32
    return %arg0, %arg2 : i32, i32
  }
  func.func @transform_1(%arg0: i32, %arg1: i32, %arg2: i32) -> (i32, i32) {
    %c0_i32 = arith.constant 0 : i32
    return %arg2, %arg1 : i32, i32
  }
  func.func @transform_2(%arg0: i32, %arg1: i32, %arg2: i32) -> (i32, i32) {
    %c0_i32 = arith.constant 0 : i32
    %c0_i32_0 = arith.constant 0 : i32
    return %arg0, %c0_i32 : i32, i32
  }
  func.func @transform_3(%arg0: i32, %arg1: i32, %arg2: i32) -> (i32, i32) {
    %c0_i32 = arith.constant 0 : i32
    return %arg0, %arg1 : i32, i32
  }
}

module attributes {stable_mosaic.version = 11 : i64} {
  func.func @_matmul_kernel(%arg0: i32, %arg1: i32, %arg2: i32, %arg3: memref<32x256xbf16, #tpu.memory_space<vmem>>, %arg4: memref<256x128xbf16, #tpu.memory_space<vmem>>, %arg5: memref<32x1xf32, #tpu.memory_space<vmem>>, %arg6: memref<32x128xbf16, #tpu.memory_space<vmem>>, %arg7: memref<32x128xf32, #tpu.memory_space<vmem>>) attributes {dimension_semantics = [#tpu.dimension_semantics<parallel>, #tpu.dimension_semantics<parallel>, #tpu.dimension_semantics<arbitrary>], iteration_bounds = array<i64: 1, 1, 1>, scalar_prefetch = 0 : i64, scratch_operands = 1 : i64, tpu.core_type = #tpu.core_type<tc>, window_params = [{transform_indices = @transform_0, window_bounds = array<i64: 32, 256>}, {transform_indices = @transform_1, window_bounds = array<i64: 256, 128>}, {transform_indices = @transform_2, window_bounds = array<i64: 32, 1>}, {transform_indices = @transform_3, window_bounds = array<i64: 32, 128>}]} {
    %c0_i32 = arith.constant 0 : i32
    %0 = arith.cmpi eq, %arg2, %c0_i32 : i32
    %1 = arith.extui %0 : i1 to i32
    %c0_i32_0 = arith.constant 0 : i32
    %2 = arith.cmpi ne, %1, %c0_i32_0 : i32
    scf.if %2 {
      %cst_10 = arith.constant 0.000000e+00 : f32
      %12 = vector.broadcast %cst_10 : f32 to vector<32x128xf32>
      %c0_11 = arith.constant 0 : index
      %c0_12 = arith.constant 0 : index
      %13 = vector.load %arg7[%c0_11, %c0_12] : memref<32x128xf32, #tpu.memory_space<vmem>>, vector<32x128xf32>
      tpu.vector_store %arg7[%c0_11, %c0_12], %12 {strides = array<i32>} : memref<32x128xf32, #tpu.memory_space<vmem>>, vector<32x128xf32>,
    } else {
    }
    %c0 = arith.constant 0 : index
    %c0_1 = arith.constant 0 : index
    %3 = vector.load %arg7[%c0, %c0_1] : memref<32x128xf32, #tpu.memory_space<vmem>>, vector<32x128xf32>
    %c0_2 = arith.constant 0 : index
    %c0_3 = arith.constant 0 : index
    %4 = vector.load %arg3[%c0_2, %c0_3] : memref<32x256xbf16, #tpu.memory_space<vmem>>, vector<32x256xbf16>
    %c0_4 = arith.constant 0 : index
    %c0_5 = arith.constant 0 : index
    %5 = vector.load %arg4[%c0_4, %c0_5] : memref<256x128xbf16, #tpu.memory_space<vmem>>, vector<256x128xbf16>
    %cst = arith.constant dense<0.000000e+00> : vector<32x128xf32>
    %6 = tpu.matmul %4, %5, %cst {dimension_numbers = #tpu.dot_dimension_numbers<[1], [0], [0], [1], [0, 0, 1, 1], [], []>} : vector<32x256xbf16>, vector<256x128xbf16>, vector<32x128xf32> -> vector<32x128xf32>
    %7 = arith.addf %3, %6 : vector<32x128xf32>
    %c0_6 = arith.constant 0 : index
    %c0_7 = arith.constant 0 : index
    %8 = vector.load %arg7[%c0_6, %c0_7] : memref<32x128xf32, #tpu.memory_space<vmem>>, vector<32x128xf32>
    tpu.vector_store %arg7[%c0_6, %c0_7], %7 {strides = array<i32>} : memref<32x128xf32, #tpu.memory_space<vmem>>, vector<32x128xf32>,
    %c0_i32_8 = arith.constant 0 : i32
    %9 = arith.cmpi eq, %arg2, %c0_i32_8 : i32
    %10 = arith.extui %9 : i1 to i32
    %c0_i32_9 = arith.constant 0 : i32
    %11 = arith.cmpi ne, %10, %c0_i32_9 : i32
    scf.if %11 {
      %c0_10 = arith.constant 0 : index
      %c0_11 = arith.constant 0 : index
      %12 = vector.load %arg7[%c0_10, %c0_11] : memref<32x128xf32, #tpu.memory_space<vmem>>, vector<32x128xf32>
      %c0_12 = arith.constant 0 : index
      %c0_13 = arith.constant 0 : index
      %13 = vector.load %arg5[%c0_12, %c0_13] : memref<32x1xf32, #tpu.memory_space<vmem>>, vector<32x1xf32>
      %14 = vector.broadcast %13 : vector<32x1xf32> to vector<32x128xf32>
      %15 = arith.addf %12, %14 : vector<32x128xf32>
      %cst_14 = arith.constant 0.000000e+00 : f32
      %16 = vector.broadcast %cst_14 : f32 to vector<32x128xf32>
      %17 = arith.cmpf ogt, %15, %16 : vector<32x128xf32>
      %cst_15 = arith.constant 1.000000e-01 : f32
      %18 = vector.broadcast %cst_15 : f32 to vector<32x128xf32>
      %19 = arith.mulf %18, %15 : vector<32x128xf32>
      %20 = arith.select %17, %15, %19 : vector<32x128xi1>, vector<32x128xf32>
      %21 = arith.truncf %20 : vector<32x128xf32> to vector<32x128xbf16>
      %c0_16 = arith.constant 0 : index
      %c0_17 = arith.constant 0 : index
      %22 = vector.load %arg6[%c0_16, %c0_17] : memref<32x128xbf16, #tpu.memory_space<vmem>>, vector<32x128xbf16>
      tpu.vector_store %arg6[%c0_16, %c0_17], %21 {strides = array<i32>} : memref<32x128xbf16, #tpu.memory_space<vmem>>, vector<32x128xbf16>,
    } else {
    }
    return
  }
  func.func @transform_0(%arg0: i32, %arg1: i32, %arg2: i32) -> (i32, i32) {
    %c0_i32 = arith.constant 0 : i32
    return %arg0, %arg2 : i32, i32
  }
  func.func @transform_1(%arg0: i32, %arg1: i32, %arg2: i32) -> (i32, i32) {
    %c0_i32 = arith.constant 0 : i32
    return %arg2, %arg1 : i32, i32
  }
  func.func @transform_2(%arg0: i32, %arg1: i32, %arg2: i32) -> (i32, i32) {
    %c0_i32 = arith.constant 0 : i32
    %c0_i32_0 = arith.constant 0 : i32
    return %arg0, %c0_i32 : i32, i32
  }
  func.func @transform_3(%arg0: i32, %arg1: i32, %arg2: i32) -> (i32, i32) {
    %c0_i32 = arith.constant 0 : i32
    return %arg0, %arg1 : i32, i32
  }
}

module attributes {stable_mosaic.version = 11 : i64} {
  func.func @_max4_kernel(%arg0: i32, %arg1: i32, %arg2: memref<32x128xbf16, #tpu.memory_space<vmem>>, %arg3: memref<32x128xbf16, #tpu.memory_space<vmem>>, %arg4: memref<32x128xbf16, #tpu.memory_space<vmem>>, %arg5: memref<32x128xbf16, #tpu.memory_space<vmem>>, %arg6: memref<32x128xbf16, #tpu.memory_space<vmem>>) attributes {dimension_semantics = [#tpu.dimension_semantics<arbitrary>, #tpu.dimension_semantics<arbitrary>], iteration_bounds = array<i64: 1, 1>, scalar_prefetch = 0 : i64, scratch_operands = 0 : i64, tpu.core_type = #tpu.core_type<tc>, window_params = [{transform_indices = @transform_0, window_bounds = array<i64: 32, 128>}, {transform_indices = @transform_1, window_bounds = array<i64: 32, 128>}, {transform_indices = @transform_2, window_bounds = array<i64: 32, 128>}, {transform_indices = @transform_3, window_bounds = array<i64: 32, 128>}, {transform_indices = @transform_4, window_bounds = array<i64: 32, 128>}]} {
    %c0 = arith.constant 0 : index
    %c0_0 = arith.constant 0 : index
    %0 = vector.load %arg2[%c0, %c0_0] : memref<32x128xbf16, #tpu.memory_space<vmem>>, vector<32x128xbf16>
    %c0_1 = arith.constant 0 : index
    %c0_2 = arith.constant 0 : index
    %1 = vector.load %arg3[%c0_1, %c0_2] : memref<32x128xbf16, #tpu.memory_space<vmem>>, vector<32x128xbf16>
    %2 = arith.maximumf %0, %1 : vector<32x128xbf16>
    %c0_3 = arith.constant 0 : index
    %c0_4 = arith.constant 0 : index
    %3 = vector.load %arg4[%c0_3, %c0_4] : memref<32x128xbf16, #tpu.memory_space<vmem>>, vector<32x128xbf16>
    %c0_5 = arith.constant 0 : index
    %c0_6 = arith.constant 0 : index
    %4 = vector.load %arg5[%c0_5, %c0_6] : memref<32x128xbf16, #tpu.memory_space<vmem>>, vector<32x128xbf16>
    %5 = arith.maximumf %3, %4 : vector<32x128xbf16>
    %6 = arith.maximumf %2, %5 : vector<32x128xbf16>
    %c0_7 = arith.constant 0 : index
    %c0_8 = arith.constant 0 : index
    %7 = vector.load %arg6[%c0_7, %c0_8] : memref<32x128xbf16, #tpu.memory_space<vmem>>, vector<32x128xbf16>
    tpu.vector_store %arg6[%c0_7, %c0_8], %6 {strides = array<i32>} : memref<32x128xbf16, #tpu.memory_space<vmem>>, vector<32x128xbf16>,
    return
  }
  func.func @transform_0(%arg0: i32, %arg1: i32) -> (i32, i32) {
    %c0_i32 = arith.constant 0 : i32
    return %arg0, %arg1 : i32, i32
  }
  func.func @transform_1(%arg0: i32, %arg1: i32) -> (i32, i32) {
    %c0_i32 = arith.constant 0 : i32
    return %arg0, %arg1 : i32, i32
  }
  func.func @transform_2(%arg0: i32, %arg1: i32) -> (i32, i32) {
    %c0_i32 = arith.constant 0 : i32
    return %arg0, %arg1 : i32, i32
  }
  func.func @transform_3(%arg0: i32, %arg1: i32) -> (i32, i32) {
    %c0_i32 = arith.constant 0 : i32
    return %arg0, %arg1 : i32, i32
  }
  func.func @transform_4(%arg0: i32, %arg1: i32) -> (i32, i32) {
    %c0_i32 = arith.constant 0 : i32
    return %arg0, %arg1 : i32, i32
  }
}

module attributes {stable_mosaic.version = 11 : i64} {
  func.func @_matmul_kernel(%arg0: i32, %arg1: i32, %arg2: i32, %arg3: memref<32x128xbf16, #tpu.memory_space<vmem>>, %arg4: memref<128x128xbf16, #tpu.memory_space<vmem>>, %arg5: memref<32x1xf32, #tpu.memory_space<vmem>>, %arg6: memref<32x128xbf16, #tpu.memory_space<vmem>>, %arg7: memref<32x128xf32, #tpu.memory_space<vmem>>) attributes {dimension_semantics = [#tpu.dimension_semantics<parallel>, #tpu.dimension_semantics<parallel>, #tpu.dimension_semantics<arbitrary>], iteration_bounds = array<i64: 1, 1, 1>, scalar_prefetch = 0 : i64, scratch_operands = 1 : i64, tpu.core_type = #tpu.core_type<tc>, window_params = [{transform_indices = @transform_0, window_bounds = array<i64: 32, 128>}, {transform_indices = @transform_1, window_bounds = array<i64: 128, 128>}, {transform_indices = @transform_2, window_bounds = array<i64: 32, 1>}, {transform_indices = @transform_3, window_bounds = array<i64: 32, 128>}]} {
    %c0_i32 = arith.constant 0 : i32
    %0 = arith.cmpi eq, %arg2, %c0_i32 : i32
    %1 = arith.extui %0 : i1 to i32
    %c0_i32_0 = arith.constant 0 : i32
    %2 = arith.cmpi ne, %1, %c0_i32_0 : i32
    scf.if %2 {
      %cst_10 = arith.constant 0.000000e+00 : f32
      %12 = vector.broadcast %cst_10 : f32 to vector<32x128xf32>
      %c0_11 = arith.constant 0 : index
      %c0_12 = arith.constant 0 : index
      %13 = vector.load %arg7[%c0_11, %c0_12] : memref<32x128xf32, #tpu.memory_space<vmem>>, vector<32x128xf32>
      tpu.vector_store %arg7[%c0_11, %c0_12], %12 {strides = array<i32>} : memref<32x128xf32, #tpu.memory_space<vmem>>, vector<32x128xf32>,
    } else {
    }
    %c0 = arith.constant 0 : index
    %c0_1 = arith.constant 0 : index
    %3 = vector.load %arg7[%c0, %c0_1] : memref<32x128xf32, #tpu.memory_space<vmem>>, vector<32x128xf32>
    %c0_2 = arith.constant 0 : index
    %c0_3 = arith.constant 0 : index
    %4 = vector.load %arg3[%c0_2, %c0_3] : memref<32x128xbf16, #tpu.memory_space<vmem>>, vector<32x128xbf16>
    %c0_4 = arith.constant 0 : index
    %c0_5 = arith.constant 0 : index
    %5 = vector.load %arg4[%c0_4, %c0_5] : memref<128x128xbf16, #tpu.memory_space<vmem>>, vector<128x128xbf16>
    %cst = arith.constant dense<0.000000e+00> : vector<32x128xf32>
    %6 = tpu.matmul %4, %5, %cst {dimension_numbers = #tpu.dot_dimension_numbers<[1], [0], [0], [1], [0, 0, 1, 1], [], []>} : vector<32x128xbf16>, vector<128x128xbf16>, vector<32x128xf32> -> vector<32x128xf32>
    %7 = arith.addf %3, %6 : vector<32x128xf32>
    %c0_6 = arith.constant 0 : index
    %c0_7 = arith.constant 0 : index
    %8 = vector.load %arg7[%c0_6, %c0_7] : memref<32x128xf32, #tpu.memory_space<vmem>>, vector<32x128xf32>
    tpu.vector_store %arg7[%c0_6, %c0_7], %7 {strides = array<i32>} : memref<32x128xf32, #tpu.memory_space<vmem>>, vector<32x128xf32>,
    %c0_i32_8 = arith.constant 0 : i32
    %9 = arith.cmpi eq, %arg2, %c0_i32_8 : i32
    %10 = arith.extui %9 : i1 to i32
    %c0_i32_9 = arith.constant 0 : i32
    %11 = arith.cmpi ne, %10, %c0_i32_9 : i32
    scf.if %11 {
      %c0_10 = arith.constant 0 : index
      %c0_11 = arith.constant 0 : index
      %12 = vector.load %arg7[%c0_10, %c0_11] : memref<32x128xf32, #tpu.memory_space<vmem>>, vector<32x128xf32>
      %c0_12 = arith.constant 0 : index
      %c0_13 = arith.constant 0 : index
      %13 = vector.load %arg5[%c0_12, %c0_13] : memref<32x1xf32, #tpu.memory_space<vmem>>, vector<32x1xf32>
      %14 = vector.broadcast %13 : vector<32x1xf32> to vector<32x128xf32>
      %15 = arith.addf %12, %14 : vector<32x128xf32>
      %cst_14 = arith.constant 0.000000e+00 : f32
      %16 = vector.broadcast %cst_14 : f32 to vector<32x128xf32>
      %17 = arith.cmpf ogt, %15, %16 : vector<32x128xf32>
      %cst_15 = arith.constant 1.000000e-01 : f32
      %18 = vector.broadcast %cst_15 : f32 to vector<32x128xf32>
      %19 = arith.mulf %18, %15 : vector<32x128xf32>
      %20 = arith.select %17, %15, %19 : vector<32x128xi1>, vector<32x128xf32>
      %21 = arith.truncf %20 : vector<32x128xf32> to vector<32x128xbf16>
      %c0_16 = arith.constant 0 : index
      %c0_17 = arith.constant 0 : index
      %22 = vector.load %arg6[%c0_16, %c0_17] : memref<32x128xbf16, #tpu.memory_space<vmem>>, vector<32x128xbf16>
      tpu.vector_store %arg6[%c0_16, %c0_17], %21 {strides = array<i32>} : memref<32x128xbf16, #tpu.memory_space<vmem>>, vector<32x128xbf16>,
    } else {
    }
    return
  }
  func.func @transform_0(%arg0: i32, %arg1: i32, %arg2: i32) -> (i32, i32) {
    %c0_i32 = arith.constant 0 : i32
    return %arg0, %arg2 : i32, i32
  }
  func.func @transform_1(%arg0: i32, %arg1: i32, %arg2: i32) -> (i32, i32) {
    %c0_i32 = arith.constant 0 : i32
    return %arg2, %arg1 : i32, i32
  }
  func.func @transform_2(%arg0: i32, %arg1: i32, %arg2: i32) -> (i32, i32) {
    %c0_i32 = arith.constant 0 : i32
    %c0_i32_0 = arith.constant 0 : i32
    return %arg0, %c0_i32 : i32, i32
  }
  func.func @transform_3(%arg0: i32, %arg1: i32, %arg2: i32) -> (i32, i32) {
    %c0_i32 = arith.constant 0 : i32
    return %arg0, %arg1 : i32, i32
  }
}

module attributes {stable_mosaic.version = 11 : i64} {
  func.func @_matmul_kernel(%arg0: i32, %arg1: i32, %arg2: i32, %arg3: memref<64x384xbf16, #tpu.memory_space<vmem>>, %arg4: memref<384x128xbf16, #tpu.memory_space<vmem>>, %arg5: memref<64x1xf32, #tpu.memory_space<vmem>>, %arg6: memref<64x128xbf16, #tpu.memory_space<vmem>>, %arg7: memref<64x128xf32, #tpu.memory_space<vmem>>) attributes {dimension_semantics = [#tpu.dimension_semantics<parallel>, #tpu.dimension_semantics<parallel>, #tpu.dimension_semantics<arbitrary>], iteration_bounds = array<i64: 1, 1, 1>, scalar_prefetch = 0 : i64, scratch_operands = 1 : i64, tpu.core_type = #tpu.core_type<tc>, window_params = [{transform_indices = @transform_0, window_bounds = array<i64: 64, 384>}, {transform_indices = @transform_1, window_bounds = array<i64: 384, 128>}, {transform_indices = @transform_2, window_bounds = array<i64: 64, 1>}, {transform_indices = @transform_3, window_bounds = array<i64: 64, 128>}]} {
    %c0_i32 = arith.constant 0 : i32
    %0 = arith.cmpi eq, %arg2, %c0_i32 : i32
    %1 = arith.extui %0 : i1 to i32
    %c0_i32_0 = arith.constant 0 : i32
    %2 = arith.cmpi ne, %1, %c0_i32_0 : i32
    scf.if %2 {
      %cst_10 = arith.constant 0.000000e+00 : f32
      %12 = vector.broadcast %cst_10 : f32 to vector<64x128xf32>
      %c0_11 = arith.constant 0 : index
      %c0_12 = arith.constant 0 : index
      %13 = vector.load %arg7[%c0_11, %c0_12] : memref<64x128xf32, #tpu.memory_space<vmem>>, vector<64x128xf32>
      tpu.vector_store %arg7[%c0_11, %c0_12], %12 {strides = array<i32>} : memref<64x128xf32, #tpu.memory_space<vmem>>, vector<64x128xf32>,
    } else {
    }
    %c0 = arith.constant 0 : index
    %c0_1 = arith.constant 0 : index
    %3 = vector.load %arg7[%c0, %c0_1] : memref<64x128xf32, #tpu.memory_space<vmem>>, vector<64x128xf32>
    %c0_2 = arith.constant 0 : index
    %c0_3 = arith.constant 0 : index
    %4 = vector.load %arg3[%c0_2, %c0_3] : memref<64x384xbf16, #tpu.memory_space<vmem>>, vector<64x384xbf16>
    %c0_4 = arith.constant 0 : index
    %c0_5 = arith.constant 0 : index
    %5 = vector.load %arg4[%c0_4, %c0_5] : memref<384x128xbf16, #tpu.memory_space<vmem>>, vector<384x128xbf16>
    %cst = arith.constant dense<0.000000e+00> : vector<64x128xf32>
    %6 = tpu.matmul %4, %5, %cst {dimension_numbers = #tpu.dot_dimension_numbers<[1], [0], [0], [1], [0, 0, 1, 1], [], []>} : vector<64x384xbf16>, vector<384x128xbf16>, vector<64x128xf32> -> vector<64x128xf32>
    %7 = arith.addf %3, %6 : vector<64x128xf32>
    %c0_6 = arith.constant 0 : index
    %c0_7 = arith.constant 0 : index
    %8 = vector.load %arg7[%c0_6, %c0_7] : memref<64x128xf32, #tpu.memory_space<vmem>>, vector<64x128xf32>
    tpu.vector_store %arg7[%c0_6, %c0_7], %7 {strides = array<i32>} : memref<64x128xf32, #tpu.memory_space<vmem>>, vector<64x128xf32>,
    %c0_i32_8 = arith.constant 0 : i32
    %9 = arith.cmpi eq, %arg2, %c0_i32_8 : i32
    %10 = arith.extui %9 : i1 to i32
    %c0_i32_9 = arith.constant 0 : i32
    %11 = arith.cmpi ne, %10, %c0_i32_9 : i32
    scf.if %11 {
      %c0_10 = arith.constant 0 : index
      %c0_11 = arith.constant 0 : index
      %12 = vector.load %arg7[%c0_10, %c0_11] : memref<64x128xf32, #tpu.memory_space<vmem>>, vector<64x128xf32>
      %c0_12 = arith.constant 0 : index
      %c0_13 = arith.constant 0 : index
      %13 = vector.load %arg5[%c0_12, %c0_13] : memref<64x1xf32, #tpu.memory_space<vmem>>, vector<64x1xf32>
      %14 = vector.broadcast %13 : vector<64x1xf32> to vector<64x128xf32>
      %15 = arith.addf %12, %14 : vector<64x128xf32>
      %cst_14 = arith.constant 0.000000e+00 : f32
      %16 = vector.broadcast %cst_14 : f32 to vector<64x128xf32>
      %17 = arith.cmpf ogt, %15, %16 : vector<64x128xf32>
      %cst_15 = arith.constant 1.000000e-01 : f32
      %18 = vector.broadcast %cst_15 : f32 to vector<64x128xf32>
      %19 = arith.mulf %18, %15 : vector<64x128xf32>
      %20 = arith.select %17, %15, %19 : vector<64x128xi1>, vector<64x128xf32>
      %21 = arith.truncf %20 : vector<64x128xf32> to vector<64x128xbf16>
      %c0_16 = arith.constant 0 : index
      %c0_17 = arith.constant 0 : index
      %22 = vector.load %arg6[%c0_16, %c0_17] : memref<64x128xbf16, #tpu.memory_space<vmem>>, vector<64x128xbf16>
      tpu.vector_store %arg6[%c0_16, %c0_17], %21 {strides = array<i32>} : memref<64x128xbf16, #tpu.memory_space<vmem>>, vector<64x128xbf16>,
    } else {
    }
    return
  }
  func.func @transform_0(%arg0: i32, %arg1: i32, %arg2: i32) -> (i32, i32) {
    %c0_i32 = arith.constant 0 : i32
    return %arg0, %arg2 : i32, i32
  }
  func.func @transform_1(%arg0: i32, %arg1: i32, %arg2: i32) -> (i32, i32) {
    %c0_i32 = arith.constant 0 : i32
    return %arg2, %arg1 : i32, i32
  }
  func.func @transform_2(%arg0: i32, %arg1: i32, %arg2: i32) -> (i32, i32) {
    %c0_i32 = arith.constant 0 : i32
    %c0_i32_0 = arith.constant 0 : i32
    return %arg0, %c0_i32 : i32, i32
  }
  func.func @transform_3(%arg0: i32, %arg1: i32, %arg2: i32) -> (i32, i32) {
    %c0_i32 = arith.constant 0 : i32
    return %arg0, %arg1 : i32, i32
  }
}

module attributes {stable_mosaic.version = 11 : i64} {
  func.func @_max4_kernel(%arg0: i32, %arg1: i32, %arg2: memref<64x128xbf16, #tpu.memory_space<vmem>>, %arg3: memref<64x128xbf16, #tpu.memory_space<vmem>>, %arg4: memref<64x128xbf16, #tpu.memory_space<vmem>>, %arg5: memref<64x128xbf16, #tpu.memory_space<vmem>>, %arg6: memref<64x128xbf16, #tpu.memory_space<vmem>>) attributes {dimension_semantics = [#tpu.dimension_semantics<arbitrary>, #tpu.dimension_semantics<arbitrary>], iteration_bounds = array<i64: 1, 1>, scalar_prefetch = 0 : i64, scratch_operands = 0 : i64, tpu.core_type = #tpu.core_type<tc>, window_params = [{transform_indices = @transform_0, window_bounds = array<i64: 64, 128>}, {transform_indices = @transform_1, window_bounds = array<i64: 64, 128>}, {transform_indices = @transform_2, window_bounds = array<i64: 64, 128>}, {transform_indices = @transform_3, window_bounds = array<i64: 64, 128>}, {transform_indices = @transform_4, window_bounds = array<i64: 64, 128>}]} {
    %c0 = arith.constant 0 : index
    %c0_0 = arith.constant 0 : index
    %0 = vector.load %arg2[%c0, %c0_0] : memref<64x128xbf16, #tpu.memory_space<vmem>>, vector<64x128xbf16>
    %c0_1 = arith.constant 0 : index
    %c0_2 = arith.constant 0 : index
    %1 = vector.load %arg3[%c0_1, %c0_2] : memref<64x128xbf16, #tpu.memory_space<vmem>>, vector<64x128xbf16>
    %2 = arith.maximumf %0, %1 : vector<64x128xbf16>
    %c0_3 = arith.constant 0 : index
    %c0_4 = arith.constant 0 : index
    %3 = vector.load %arg4[%c0_3, %c0_4] : memref<64x128xbf16, #tpu.memory_space<vmem>>, vector<64x128xbf16>
    %c0_5 = arith.constant 0 : index
    %c0_6 = arith.constant 0 : index
    %4 = vector.load %arg5[%c0_5, %c0_6] : memref<64x128xbf16, #tpu.memory_space<vmem>>, vector<64x128xbf16>
    %5 = arith.maximumf %3, %4 : vector<64x128xbf16>
    %6 = arith.maximumf %2, %5 : vector<64x128xbf16>
    %c0_7 = arith.constant 0 : index
    %c0_8 = arith.constant 0 : index
    %7 = vector.load %arg6[%c0_7, %c0_8] : memref<64x128xbf16, #tpu.memory_space<vmem>>, vector<64x128xbf16>
    tpu.vector_store %arg6[%c0_7, %c0_8], %6 {strides = array<i32>} : memref<64x128xbf16, #tpu.memory_space<vmem>>, vector<64x128xbf16>,
    return
  }
  func.func @transform_0(%arg0: i32, %arg1: i32) -> (i32, i32) {
    %c0_i32 = arith.constant 0 : i32
    return %arg0, %arg1 : i32, i32
  }
  func.func @transform_1(%arg0: i32, %arg1: i32) -> (i32, i32) {
    %c0_i32 = arith.constant 0 : i32
    return %arg0, %arg1 : i32, i32
  }
  func.func @transform_2(%arg0: i32, %arg1: i32) -> (i32, i32) {
    %c0_i32 = arith.constant 0 : i32
    return %arg0, %arg1 : i32, i32
  }
  func.func @transform_3(%arg0: i32, %arg1: i32) -> (i32, i32) {
    %c0_i32 = arith.constant 0 : i32
    return %arg0, %arg1 : i32, i32
  }
  func.func @transform_4(%arg0: i32, %arg1: i32) -> (i32, i32) {
    %c0_i32 = arith.constant 0 : i32
    return %arg0, %arg1 : i32, i32
  }
}

module attributes {stable_mosaic.version = 11 : i64} {
  func.func @_matmul_kernel(%arg0: i32, %arg1: i32, %arg2: i32, %arg3: memref<64x640xbf16, #tpu.memory_space<vmem>>, %arg4: memref<640x128xbf16, #tpu.memory_space<vmem>>, %arg5: memref<64x1xf32, #tpu.memory_space<vmem>>, %arg6: memref<64x128xbf16, #tpu.memory_space<vmem>>, %arg7: memref<64x128xf32, #tpu.memory_space<vmem>>) attributes {dimension_semantics = [#tpu.dimension_semantics<parallel>, #tpu.dimension_semantics<parallel>, #tpu.dimension_semantics<arbitrary>], iteration_bounds = array<i64: 1, 1, 1>, scalar_prefetch = 0 : i64, scratch_operands = 1 : i64, tpu.core_type = #tpu.core_type<tc>, window_params = [{transform_indices = @transform_0, window_bounds = array<i64: 64, 640>}, {transform_indices = @transform_1, window_bounds = array<i64: 640, 128>}, {transform_indices = @transform_2, window_bounds = array<i64: 64, 1>}, {transform_indices = @transform_3, window_bounds = array<i64: 64, 128>}]} {
    %c0_i32 = arith.constant 0 : i32
    %0 = arith.cmpi eq, %arg2, %c0_i32 : i32
    %1 = arith.extui %0 : i1 to i32
    %c0_i32_0 = arith.constant 0 : i32
    %2 = arith.cmpi ne, %1, %c0_i32_0 : i32
    scf.if %2 {
      %cst_10 = arith.constant 0.000000e+00 : f32
      %12 = vector.broadcast %cst_10 : f32 to vector<64x128xf32>
      %c0_11 = arith.constant 0 : index
      %c0_12 = arith.constant 0 : index
      %13 = vector.load %arg7[%c0_11, %c0_12] : memref<64x128xf32, #tpu.memory_space<vmem>>, vector<64x128xf32>
      tpu.vector_store %arg7[%c0_11, %c0_12], %12 {strides = array<i32>} : memref<64x128xf32, #tpu.memory_space<vmem>>, vector<64x128xf32>,
    } else {
    }
    %c0 = arith.constant 0 : index
    %c0_1 = arith.constant 0 : index
    %3 = vector.load %arg7[%c0, %c0_1] : memref<64x128xf32, #tpu.memory_space<vmem>>, vector<64x128xf32>
    %c0_2 = arith.constant 0 : index
    %c0_3 = arith.constant 0 : index
    %4 = vector.load %arg3[%c0_2, %c0_3] : memref<64x640xbf16, #tpu.memory_space<vmem>>, vector<64x640xbf16>
    %c0_4 = arith.constant 0 : index
    %c0_5 = arith.constant 0 : index
    %5 = vector.load %arg4[%c0_4, %c0_5] : memref<640x128xbf16, #tpu.memory_space<vmem>>, vector<640x128xbf16>
    %cst = arith.constant dense<0.000000e+00> : vector<64x128xf32>
    %6 = tpu.matmul %4, %5, %cst {dimension_numbers = #tpu.dot_dimension_numbers<[1], [0], [0], [1], [0, 0, 1, 1], [], []>} : vector<64x640xbf16>, vector<640x128xbf16>, vector<64x128xf32> -> vector<64x128xf32>
    %7 = arith.addf %3, %6 : vector<64x128xf32>
    %c0_6 = arith.constant 0 : index
    %c0_7 = arith.constant 0 : index
    %8 = vector.load %arg7[%c0_6, %c0_7] : memref<64x128xf32, #tpu.memory_space<vmem>>, vector<64x128xf32>
    tpu.vector_store %arg7[%c0_6, %c0_7], %7 {strides = array<i32>} : memref<64x128xf32, #tpu.memory_space<vmem>>, vector<64x128xf32>,
    %c0_i32_8 = arith.constant 0 : i32
    %9 = arith.cmpi eq, %arg2, %c0_i32_8 : i32
    %10 = arith.extui %9 : i1 to i32
    %c0_i32_9 = arith.constant 0 : i32
    %11 = arith.cmpi ne, %10, %c0_i32_9 : i32
    scf.if %11 {
      %c0_10 = arith.constant 0 : index
      %c0_11 = arith.constant 0 : index
      %12 = vector.load %arg7[%c0_10, %c0_11] : memref<64x128xf32, #tpu.memory_space<vmem>>, vector<64x128xf32>
      %c0_12 = arith.constant 0 : index
      %c0_13 = arith.constant 0 : index
      %13 = vector.load %arg5[%c0_12, %c0_13] : memref<64x1xf32, #tpu.memory_space<vmem>>, vector<64x1xf32>
      %14 = vector.broadcast %13 : vector<64x1xf32> to vector<64x128xf32>
      %15 = arith.addf %12, %14 : vector<64x128xf32>
      %cst_14 = arith.constant 0.000000e+00 : f32
      %16 = vector.broadcast %cst_14 : f32 to vector<64x128xf32>
      %17 = arith.cmpf ogt, %15, %16 : vector<64x128xf32>
      %cst_15 = arith.constant 1.000000e-01 : f32
      %18 = vector.broadcast %cst_15 : f32 to vector<64x128xf32>
      %19 = arith.mulf %18, %15 : vector<64x128xf32>
      %20 = arith.select %17, %15, %19 : vector<64x128xi1>, vector<64x128xf32>
      %21 = arith.truncf %20 : vector<64x128xf32> to vector<64x128xbf16>
      %c0_16 = arith.constant 0 : index
      %c0_17 = arith.constant 0 : index
      %22 = vector.load %arg6[%c0_16, %c0_17] : memref<64x128xbf16, #tpu.memory_space<vmem>>, vector<64x128xbf16>
      tpu.vector_store %arg6[%c0_16, %c0_17], %21 {strides = array<i32>} : memref<64x128xbf16, #tpu.memory_space<vmem>>, vector<64x128xbf16>,
    } else {
    }
    return
  }
  func.func @transform_0(%arg0: i32, %arg1: i32, %arg2: i32) -> (i32, i32) {
    %c0_i32 = arith.constant 0 : i32
    return %arg0, %arg2 : i32, i32
  }
  func.func @transform_1(%arg0: i32, %arg1: i32, %arg2: i32) -> (i32, i32) {
    %c0_i32 = arith.constant 0 : i32
    return %arg2, %arg1 : i32, i32
  }
  func.func @transform_2(%arg0: i32, %arg1: i32, %arg2: i32) -> (i32, i32) {
    %c0_i32 = arith.constant 0 : i32
    %c0_i32_0 = arith.constant 0 : i32
    return %arg0, %c0_i32 : i32, i32
  }
  func.func @transform_3(%arg0: i32, %arg1: i32, %arg2: i32) -> (i32, i32) {
    %c0_i32 = arith.constant 0 : i32
    return %arg0, %arg1 : i32, i32
  }
}

module attributes {stable_mosaic.version = 11 : i64} {
  func.func @_matmul_kernel(%arg0: i32, %arg1: i32, %arg2: i32, %arg3: memref<8x128xbf16, #tpu.memory_space<vmem>>, %arg4: memref<128x256xbf16, #tpu.memory_space<vmem>>, %arg5: memref<1x256xf32, #tpu.memory_space<vmem>>, %arg6: memref<8x256xbf16, #tpu.memory_space<vmem>>, %arg7: memref<8x256xf32, #tpu.memory_space<vmem>>) attributes {dimension_semantics = [#tpu.dimension_semantics<parallel>, #tpu.dimension_semantics<parallel>, #tpu.dimension_semantics<arbitrary>], iteration_bounds = array<i64: 1, 1, 1>, scalar_prefetch = 0 : i64, scratch_operands = 1 : i64, tpu.core_type = #tpu.core_type<tc>, window_params = [{transform_indices = @transform_0, window_bounds = array<i64: 8, 128>}, {transform_indices = @transform_1, window_bounds = array<i64: 128, 256>}, {transform_indices = @transform_2, window_bounds = array<i64: 1, 256>}, {transform_indices = @transform_3, window_bounds = array<i64: 8, 256>}]} {
    %c0_i32 = arith.constant 0 : i32
    %0 = arith.cmpi eq, %arg2, %c0_i32 : i32
    %1 = arith.extui %0 : i1 to i32
    %c0_i32_0 = arith.constant 0 : i32
    %2 = arith.cmpi ne, %1, %c0_i32_0 : i32
    scf.if %2 {
      %cst_10 = arith.constant 0.000000e+00 : f32
      %12 = vector.broadcast %cst_10 : f32 to vector<8x256xf32>
      %c0_11 = arith.constant 0 : index
      %c0_12 = arith.constant 0 : index
      %13 = vector.load %arg7[%c0_11, %c0_12] : memref<8x256xf32, #tpu.memory_space<vmem>>, vector<8x256xf32>
      tpu.vector_store %arg7[%c0_11, %c0_12], %12 {strides = array<i32>} : memref<8x256xf32, #tpu.memory_space<vmem>>, vector<8x256xf32>,
    } else {
    }
    %c0 = arith.constant 0 : index
    %c0_1 = arith.constant 0 : index
    %3 = vector.load %arg7[%c0, %c0_1] : memref<8x256xf32, #tpu.memory_space<vmem>>, vector<8x256xf32>
    %c0_2 = arith.constant 0 : index
    %c0_3 = arith.constant 0 : index
    %4 = vector.load %arg3[%c0_2, %c0_3] : memref<8x128xbf16, #tpu.memory_space<vmem>>, vector<8x128xbf16>
    %c0_4 = arith.constant 0 : index
    %c0_5 = arith.constant 0 : index
    %5 = vector.load %arg4[%c0_4, %c0_5] : memref<128x256xbf16, #tpu.memory_space<vmem>>, vector<128x256xbf16>
    %cst = arith.constant dense<0.000000e+00> : vector<8x256xf32>
    %6 = tpu.matmul %4, %5, %cst {dimension_numbers = #tpu.dot_dimension_numbers<[1], [0], [0], [1], [0, 0, 1, 1], [], []>} : vector<8x128xbf16>, vector<128x256xbf16>, vector<8x256xf32> -> vector<8x256xf32>
    %7 = arith.addf %3, %6 : vector<8x256xf32>
    %c0_6 = arith.constant 0 : index
    %c0_7 = arith.constant 0 : index
    %8 = vector.load %arg7[%c0_6, %c0_7] : memref<8x256xf32, #tpu.memory_space<vmem>>, vector<8x256xf32>
    tpu.vector_store %arg7[%c0_6, %c0_7], %7 {strides = array<i32>} : memref<8x256xf32, #tpu.memory_space<vmem>>, vector<8x256xf32>,
    %c0_i32_8 = arith.constant 0 : i32
    %9 = arith.cmpi eq, %arg2, %c0_i32_8 : i32
    %10 = arith.extui %9 : i1 to i32
    %c0_i32_9 = arith.constant 0 : i32
    %11 = arith.cmpi ne, %10, %c0_i32_9 : i32
    scf.if %11 {
      %c0_10 = arith.constant 0 : index
      %c0_11 = arith.constant 0 : index
      %12 = vector.load %arg7[%c0_10, %c0_11] : memref<8x256xf32, #tpu.memory_space<vmem>>, vector<8x256xf32>
      %c0_12 = arith.constant 0 : index
      %c0_13 = arith.constant 0 : index
      %13 = vector.load %arg5[%c0_12, %c0_13] : memref<1x256xf32, #tpu.memory_space<vmem>>, vector<1x256xf32>
      %14 = vector.broadcast %13 : vector<1x256xf32> to vector<8x256xf32>
      %15 = arith.addf %12, %14 : vector<8x256xf32>
      %cst_14 = arith.constant 0.000000e+00 : f32
      %16 = vector.broadcast %cst_14 : f32 to vector<8x256xf32>
      %17 = arith.cmpf ogt, %15, %16 : vector<8x256xf32>
      %cst_15 = arith.constant 1.000000e-01 : f32
      %18 = vector.broadcast %cst_15 : f32 to vector<8x256xf32>
      %19 = arith.mulf %18, %15 : vector<8x256xf32>
      %20 = arith.select %17, %15, %19 : vector<8x256xi1>, vector<8x256xf32>
      %21 = arith.truncf %20 : vector<8x256xf32> to vector<8x256xbf16>
      %c0_16 = arith.constant 0 : index
      %c0_17 = arith.constant 0 : index
      %22 = vector.load %arg6[%c0_16, %c0_17] : memref<8x256xbf16, #tpu.memory_space<vmem>>, vector<8x256xbf16>
      tpu.vector_store %arg6[%c0_16, %c0_17], %21 {strides = array<i32>} : memref<8x256xbf16, #tpu.memory_space<vmem>>, vector<8x256xbf16>,
    } else {
    }
    return
  }
  func.func @transform_0(%arg0: i32, %arg1: i32, %arg2: i32) -> (i32, i32) {
    %c0_i32 = arith.constant 0 : i32
    return %arg0, %arg2 : i32, i32
  }
  func.func @transform_1(%arg0: i32, %arg1: i32, %arg2: i32) -> (i32, i32) {
    %c0_i32 = arith.constant 0 : i32
    return %arg2, %arg1 : i32, i32
  }
  func.func @transform_2(%arg0: i32, %arg1: i32, %arg2: i32) -> (i32, i32) {
    %c0_i32 = arith.constant 0 : i32
    %c0_i32_0 = arith.constant 0 : i32
    return %c0_i32, %arg1 : i32, i32
  }
  func.func @transform_3(%arg0: i32, %arg1: i32, %arg2: i32) -> (i32, i32) {
    %c0_i32 = arith.constant 0 : i32
    return %arg0, %arg1 : i32, i32
  }
}

module attributes {stable_mosaic.version = 11 : i64} {
  func.func @_matmul_kernel(%arg0: i32, %arg1: i32, %arg2: i32, %arg3: memref<8x256xbf16, #tpu.memory_space<vmem>>, %arg4: memref<256x1024xbf16, #tpu.memory_space<vmem>>, %arg5: memref<1x1024xf32, #tpu.memory_space<vmem>>, %arg6: memref<8x1024xf32, #tpu.memory_space<vmem>>, %arg7: memref<8x1024xf32, #tpu.memory_space<vmem>>) attributes {dimension_semantics = [#tpu.dimension_semantics<parallel>, #tpu.dimension_semantics<parallel>, #tpu.dimension_semantics<arbitrary>], iteration_bounds = array<i64: 1, 2, 1>, scalar_prefetch = 0 : i64, scratch_operands = 1 : i64, tpu.core_type = #tpu.core_type<tc>, window_params = [{transform_indices = @transform_0, window_bounds = array<i64: 8, 256>}, {transform_indices = @transform_1, window_bounds = array<i64: 256, 1024>}, {transform_indices = @transform_2, window_bounds = array<i64: 1, 1024>}, {transform_indices = @transform_3, window_bounds = array<i64: 8, 1024>}]} {
    %c0_i32 = arith.constant 0 : i32
    %0 = arith.cmpi eq, %arg2, %c0_i32 : i32
    %1 = arith.extui %0 : i1 to i32
    %c0_i32_0 = arith.constant 0 : i32
    %2 = arith.cmpi ne, %1, %c0_i32_0 : i32
    scf.if %2 {
      %cst_10 = arith.constant 0.000000e+00 : f32
      %12 = vector.broadcast %cst_10 : f32 to vector<8x1024xf32>
      %c0_11 = arith.constant 0 : index
      %c0_12 = arith.constant 0 : index
      %13 = vector.load %arg7[%c0_11, %c0_12] : memref<8x1024xf32, #tpu.memory_space<vmem>>, vector<8x1024xf32>
      tpu.vector_store %arg7[%c0_11, %c0_12], %12 {strides = array<i32>} : memref<8x1024xf32, #tpu.memory_space<vmem>>, vector<8x1024xf32>,
    } else {
    }
    %c0 = arith.constant 0 : index
    %c0_1 = arith.constant 0 : index
    %3 = vector.load %arg7[%c0, %c0_1] : memref<8x1024xf32, #tpu.memory_space<vmem>>, vector<8x1024xf32>
    %c0_2 = arith.constant 0 : index
    %c0_3 = arith.constant 0 : index
    %4 = vector.load %arg3[%c0_2, %c0_3] : memref<8x256xbf16, #tpu.memory_space<vmem>>, vector<8x256xbf16>
    %c0_4 = arith.constant 0 : index
    %c0_5 = arith.constant 0 : index
    %5 = vector.load %arg4[%c0_4, %c0_5] : memref<256x1024xbf16, #tpu.memory_space<vmem>>, vector<256x1024xbf16>
    %cst = arith.constant dense<0.000000e+00> : vector<8x1024xf32>
    %6 = tpu.matmul %4, %5, %cst {dimension_numbers = #tpu.dot_dimension_numbers<[1], [0], [0], [1], [0, 0, 1, 1], [], []>} : vector<8x256xbf16>, vector<256x1024xbf16>, vector<8x1024xf32> -> vector<8x1024xf32>
    %7 = arith.addf %3, %6 : vector<8x1024xf32>
    %c0_6 = arith.constant 0 : index
    %c0_7 = arith.constant 0 : index
    %8 = vector.load %arg7[%c0_6, %c0_7] : memref<8x1024xf32, #tpu.memory_space<vmem>>, vector<8x1024xf32>
    tpu.vector_store %arg7[%c0_6, %c0_7], %7 {strides = array<i32>} : memref<8x1024xf32, #tpu.memory_space<vmem>>, vector<8x1024xf32>,
    %c0_i32_8 = arith.constant 0 : i32
    %9 = arith.cmpi eq, %arg2, %c0_i32_8 : i32
    %10 = arith.extui %9 : i1 to i32
    %c0_i32_9 = arith.constant 0 : i32
    %11 = arith.cmpi ne, %10, %c0_i32_9 : i32
    scf.if %11 {
      %c0_10 = arith.constant 0 : index
      %c0_11 = arith.constant 0 : index
      %12 = vector.load %arg7[%c0_10, %c0_11] : memref<8x1024xf32, #tpu.memory_space<vmem>>, vector<8x1024xf32>
      %c0_12 = arith.constant 0 : index
      %c0_13 = arith.constant 0 : index
      %13 = vector.load %arg5[%c0_12, %c0_13] : memref<1x1024xf32, #tpu.memory_space<vmem>>, vector<1x1024xf32>
      %14 = vector.broadcast %13 : vector<1x1024xf32> to vector<8x1024xf32>
      %15 = arith.addf %12, %14 : vector<8x1024xf32>
      %c0_14 = arith.constant 0 : index
      %c0_15 = arith.constant 0 : index
      %16 = vector.load %arg6[%c0_14, %c0_15] : memref<8x1024xf32, #tpu.memory_space<vmem>>, vector<8x1024xf32>
      tpu.vector_store %arg6[%c0_14, %c0_15], %15 {strides = array<i32>} : memref<8x1024xf32, #tpu.memory_space<vmem>>, vector<8x1024xf32>,
    } else {
    }
    return
  }
  func.func @transform_0(%arg0: i32, %arg1: i32, %arg2: i32) -> (i32, i32) {
    %c0_i32 = arith.constant 0 : i32
    return %arg0, %arg2 : i32, i32
  }
  func.func @transform_1(%arg0: i32, %arg1: i32, %arg2: i32) -> (i32, i32) {
    %c0_i32 = arith.constant 0 : i32
    return %arg2, %arg1 : i32, i32
  }
  func.func @transform_2(%arg0: i32, %arg1: i32, %arg2: i32) -> (i32, i32) {
    %c0_i32 = arith.constant 0 : i32
    %c0_i32_0 = arith.constant 0 : i32
    return %c0_i32, %arg1 : i32, i32
  }
  func.func @transform_3(%arg0: i32, %arg1: i32, %arg2: i32) -> (i32, i32) {
    %c0_i32 = arith.constant 0 : i32
    return %arg0, %arg1 : i32, i32
  }
}

</mosaic_0001>

<bundles_post_ra>
// kernel: fwd.30
= control target key start
LH: loop header
LB: loop body
LE: loop exit
PB: predicated region body
PF: predicated region fallthrough
CT: control target
= control target key end

     0   :  { %s1364_s12 = smov 0   ;;  %s1366_s13 = smov 0   ;;  %s1639_s0 = inlined_call_operand.vmem [shape: bf16[8,256], index: 0, kind: input, shape index: {}]   ;;  %s1640_s1 = inlined_call_operand.vmem [shape: bf16[256,1024], index: 1, kind: input, shape index: {}]   ;;  %s1641_s2 = inlined_call_operand.vmem [shape: f32[8,1], index: 2, kind: input, shape index: {}]   ;;  %s1642_s3 = inlined_call_operand.vmem [shape: bf16[8,1024], index: 3, kind: output, shape index: {}]  }
   0x1   :  { %s1368_s14 = smov 0   ;;  %s1370_s15 = smov 0  }
   0x2   :  { %s1372_s16 = smov 0  }
   0x3 LB: > { %s28_s17 = sadd.s32 1, %s1337_s15  ;;  %p76_p1 = scmp.ne.s32.totalorder %s1329_s13, %s1325_s12  ;;  %s1341_s16 = sphi %s1372_s16, %s13_s16   ;;  %s1337_s15 = sphi %s1370_s15, %s1646_s15   ;;  %s1333_s14 = sphi %s1368_s14, %s1645_s14   ;;  %s1329_s13 = sphi %s1366_s13, %s1644_s13   ;;  %s1325_s12 = sphi %s1364_s12, %s1643_s12  }
   0x4   : > { %p30_p0 = scmp.ge.s32.totalorder %s28_s17, 2  ;;  %p77_p2 = scmp.eq.s32.totalorder %s1341_s16, 0 }
   0x5   : > { %s69_s19 = sadd.s32 1, %s1329_s13  ;;  %p1082_p5 = scmp.ge.s32.totalorder %s1341_s16, 2 }
   0x6   : > { %s1648_s17 = smov (%p30_p0, %s28_s17), 0  ;;  %p78_p3 = por %p77_p2, %p76_p1 }
   0x7   : > { %s65_s18 = ssub.s32 %s1337_s15, %s1648_s17  ;;  %176 = sbr.rel (%p1082_p5) target bundleno = 50 (0x32), region = 24 }
   0x8   : > { %p67_p4 = scmp.eq.s32.totalorder %s65_s18, 0 }
   0xa   : > { %s1399_s20 = scalar_select %p67_p4, %s1329_s13, %s69_s19  }
   0xe   : > { %179 = sbr.rel (!%p78_p3) target bundleno = 50 (0x32), region = 28  ;;  %s181_s21 = sand.u32 (%p78_p3), 1, %s1329_s13  }
   0xf   : > { %s1160_s22 = sshll.u32 (%p78_p3), %s1337_s15, 4  ;;  %s1083_s23 = sshll.u32 (%p78_p3), %s181_s21, 9 }
  0x10   : > { %s1407_s26 = scalar_lea.vmem (%p78_p3), %s1640_s1, %s1160_s22  ;;  %s1412_s27 = scalar_lea.vmem (%p78_p3), [#allocation3], %s1083_s23 }
  0x11   : > { %v202_v0 = vld [vmem:[%s1407_s26] sm:$0xff] (%p78_p3)  ;;  %v204_v1 = vld [vmem:[%s1407_s26 + $0x8] sm:$0xff] (%p78_p3) }
  0x12   : > { %v206_v2 = vld [vmem:[%s1407_s26 + $0x20] sm:$0xff] (%p78_p3)  ;;  %203 = vst [vmem:[%s1412_s27] sm:$0xff] (%p78_p3), %v202_v0  ;;  %205 = vst [vmem:[%s1412_s27 + $0x8] sm:$0xff] (%p78_p3), %v204_v1  ;;  %v208_v3 = vld [vmem:[%s1407_s26 + $0x28] sm:$0xff] (%p78_p3) }
  0x13   : > { %207 = vst [vmem:[%s1412_s27 + $0x10] sm:$0xff] (%p78_p3), %v206_v2  ;;  %v210_v4 = vld [vmem:[%s1407_s26 + $0x40] sm:$0xff] (%p78_p3)  ;;  %v212_v5 = vld [vmem:[%s1407_s26 + $0x48] sm:$0xff] (%p78_p3)  ;;  %209 = vst [vmem:[%s1412_s27 + $0x18] sm:$0xff] (%p78_p3), %v208_v3 }
  0x14   : > { %211 = vst [vmem:[%s1412_s27 + $0x20] sm:$0xff] (%p78_p3), %v210_v4  ;;  %213 = vst [vmem:[%s1412_s27 + $0x28] sm:$0xff] (%p78_p3), %v212_v5  ;;  %v214_v6 = vld [vmem:[%s1407_s26 + $0x60] sm:$0xff] (%p78_p3)  ;;  %v216_v7 = vld [vmem:[%s1407_s26 + $0x68] sm:$0xff] (%p78_p3) }
  0x15   : > { %v218_v8 = vld [vmem:[%s1407_s26 + $0x80] sm:$0xff]  ;;  %215 = vst [vmem:[%s1412_s27 + $0x30] sm:$0xff] %v214_v6  ;;  %217 = vst [vmem:[%s1412_s27 + $0x38] sm:$0xff] %v216_v7  ;;  %v220_v9 = vld [vmem:[%s1407_s26 + $0x88] sm:$0xff] }
  0x16   : > { %219 = vst [vmem:[%s1412_s27 + $0x40] sm:$0xff] %v218_v8  ;;  %v222_v10 = vld [vmem:[%s1407_s26 + $0xa0] sm:$0xff]  ;;  %v224_v11 = vld [vmem:[%s1407_s26 + $0xa8] sm:$0xff]  ;;  %221 = vst [vmem:[%s1412_s27 + $0x48] sm:$0xff] %v220_v9 }
  0x17   : > { %223 = vst [vmem:[%s1412_s27 + $0x50] sm:$0xff] %v222_v10  ;;  %225 = vst [vmem:[%s1412_s27 + $0x58] sm:$0xff] %v224_v11  ;;  %v226_v12 = vld [vmem:[%s1407_s26 + $0xc0] sm:$0xff]  ;;  %v228_v13 = vld [vmem:[%s1407_s26 + $0xc8] sm:$0xff] }
  0x18   : > { %v230_v14 = vld [vmem:[%s1407_s26 + $0xe0] sm:$0xff]  ;;  %227 = vst [vmem:[%s1412_s27 + $0x60] sm:$0xff] %v226_v12  ;;  %229 = vst [vmem:[%s1412_s27 + $0x68] sm:$0xff] %v228_v13  ;;  %v232_v15 = vld [vmem:[%s1407_s26 + $0xe8] sm:$0xff] }
  0x19   : > { %231 = vst [vmem:[%s1412_s27 + $0x70] sm:$0xff] %v230_v14  ;;  %v234_v16 = vld [vmem:[%s1407_s26 + $0x100] sm:$0xff]  ;;  %v236_v17 = vld [vmem:[%s1407_s26 + $0x108] sm:$0xff]  ;;  %233 = vst [vmem:[%s1412_s27 + $0x78] sm:$0xff] %v232_v15 }
  0x1a   : > { %235 = vst [vmem:[%s1412_s27 + $0x80] sm:$0xff] %v234_v16  ;;  %237 = vst [vmem:[%s1412_s27 + $0x88] sm:$0xff] %v236_v17  ;;  %v238_v18 = vld [vmem:[%s1407_s26 + $0x120] sm:$0xff]  ;;  %v240_v19 = vld [vmem:[%s1407_s26 + $0x128] sm:$0xff] }
  0x1b   : > { %v242_v20 = vld [vmem:[%s1407_s26 + $0x140] sm:$0xff]  ;;  %239 = vst [vmem:[%s1412_s27 + $0x90] sm:$0xff] %v238_v18  ;;  %241 = vst [vmem:[%s1412_s27 + $0x98] sm:$0xff] %v240_v19  ;;  %v244_v21 = vld [vmem:[%s1407_s26 + $0x148] sm:$0xff] }
  0x1c   : > { %243 = vst [vmem:[%s1412_s27 + $0xa0] sm:$0xff] %v242_v20  ;;  %v246_v22 = vld [vmem:[%s1407_s26 + $0x160] sm:$0xff]  ;;  %v248_v23 = vld [vmem:[%s1407_s26 + $0x168] sm:$0xff]  ;;  %245 = vst [vmem:[%s1412_s27 + $0xa8] sm:$0xff] %v244_v21 }
  0x1d   : > { %247 = vst [vmem:[%s1412_s27 + $0xb0] sm:$0xff] %v246_v22  ;;  %249 = vst [vmem:[%s1412_s27 + $0xb8] sm:$0xff] %v248_v23  ;;  %v250_v24 = vld [vmem:[%s1407_s26 + $0x180] sm:$0xff]  ;;  %v252_v25 = vld [vmem:[%s1407_s26 + $0x188] sm:$0xff] }
  0x1e   : > { %v254_v26 = vld [vmem:[%s1407_s26 + $0x1a0] sm:$0xff]  ;;  %251 = vst [vmem:[%s1412_s27 + $0xc0] sm:$0xff] %v250_v24  ;;  %253 = vst [vmem:[%s1412_s27 + $0xc8] sm:$0xff] %v252_v25  ;;  %v256_v27 = vld [vmem:[%s1407_s26 + $0x1a8] sm:$0xff] }
  0x1f   : > { %255 = vst [vmem:[%s1412_s27 + $0xd0] sm:$0xff] %v254_v26  ;;  %v258_v28 = vld [vmem:[%s1407_s26 + $0x1c0] sm:$0xff]  ;;  %v260_v29 = vld [vmem:[%s1407_s26 + $0x1c8] sm:$0xff]  ;;  %257 = vst [vmem:[%s1412_s27 + $0xd8] sm:$0xff] %v256_v27 }
  0x20   : > { %259 = vst [vmem:[%s1412_s27 + $0xe0] sm:$0xff] %v258_v28  ;;  %261 = vst [vmem:[%s1412_s27 + $0xe8] sm:$0xff] %v260_v29  ;;  %v262_v30 = vld [vmem:[%s1407_s26 + $0x1e0] sm:$0xff]  ;;  %v264_v31 = vld [vmem:[%s1407_s26 + $0x1e8] sm:$0xff] }
  0x21   : > { %v266_v32 = vld [vmem:[%s1407_s26 + $0x200] sm:$0xff]  ;;  %263 = vst [vmem:[%s1412_s27 + $0xf0] sm:$0xff] %v262_v30  ;;  %265 = vst [vmem:[%s1412_s27 + $0xf8] sm:$0xff] %v264_v31  ;;  %v268_v33 = vld [vmem:[%s1407_s26 + $0x208] sm:$0xff] }
  0x22   : > { %267 = vst [vmem:[%s1412_s27 + $0x100] sm:$0xff] %v266_v32  ;;  %v270_v34 = vld [vmem:[%s1407_s26 + $0x220] sm:$0xff]  ;;  %v272_v35 = vld [vmem:[%s1407_s26 + $0x228] sm:$0xff]  ;;  %269 = vst [vmem:[%s1412_s27 + $0x108] sm:$0xff] %v268_v33 }
  0x23   : > { %271 = vst [vmem:[%s1412_s27 + $0x110] sm:$0xff] %v270_v34  ;;  %273 = vst [vmem:[%s1412_s27 + $0x118] sm:$0xff] %v272_v35  ;;  %v274_v36 = vld [vmem:[%s1407_s26 + $0x240] sm:$0xff]  ;;  %v276_v37 = vld [vmem:[%s1407_s26 + $0x248] sm:$0xff] }
  0x24   : > { %v278_v38 = vld [vmem:[%s1407_s26 + $0x260] sm:$0xff]  ;;  %275 = vst [vmem:[%s1412_s27 + $0x120] sm:$0xff] %v274_v36  ;;  %277 = vst [vmem:[%s1412_s27 + $0x128] sm:$0xff] %v276_v37  ;;  %v280_v39 = vld [vmem:[%s1407_s26 + $0x268] sm:$0xff] }
  0x25   : > { %279 = vst [vmem:[%s1412_s27 + $0x130] sm:$0xff] %v278_v38  ;;  %v282_v40 = vld [vmem:[%s1407_s26 + $0x280] sm:$0xff]  ;;  %v284_v41 = vld [vmem:[%s1407_s26 + $0x288] sm:$0xff]  ;;  %281 = vst [vmem:[%s1412_s27 + $0x138] sm:$0xff] %v280_v39 }
  0x26   : > { %283 = vst [vmem:[%s1412_s27 + $0x140] sm:$0xff] %v282_v40  ;;  %285 = vst [vmem:[%s1412_s27 + $0x148] sm:$0xff] %v284_v41  ;;  %v286_v42 = vld [vmem:[%s1407_s26 + $0x2a0] sm:$0xff]  ;;  %v288_v43 = vld [vmem:[%s1407_s26 + $0x2a8] sm:$0xff] }
  0x27   : > { %v290_v44 = vld [vmem:[%s1407_s26 + $0x2c0] sm:$0xff]  ;;  %287 = vst [vmem:[%s1412_s27 + $0x150] sm:$0xff] %v286_v42  ;;  %289 = vst [vmem:[%s1412_s27 + $0x158] sm:$0xff] %v288_v43  ;;  %v292_v45 = vld [vmem:[%s1407_s26 + $0x2c8] sm:$0xff] }
  0x28   : > { %291 = vst [vmem:[%s1412_s27 + $0x160] sm:$0xff] %v290_v44  ;;  %v294_v46 = vld [vmem:[%s1407_s26 + $0x2e0] sm:$0xff]  ;;  %v296_v47 = vld [vmem:[%s1407_s26 + $0x2e8] sm:$0xff]  ;;  %293 = vst [vmem:[%s1412_s27 + $0x168] sm:$0xff] %v292_v45 }
  0x29   : > { %295 = vst [vmem:[%s1412_s27 + $0x170] sm:$0xff] %v294_v46  ;;  %297 = vst [vmem:[%s1412_s27 + $0x178] sm:$0xff] %v296_v47  ;;  %v298_v48 = vld [vmem:[%s1407_s26 + $0x300] sm:$0xff]  ;;  %v300_v49 = vld [vmem:[%s1407_s26 + $0x308] sm:$0xff] }
  0x2a   : > { %v302_v50 = vld [vmem:[%s1407_s26 + $0x320] sm:$0xff]  ;;  %299 = vst [vmem:[%s1412_s27 + $0x180] sm:$0xff] %v298_v48  ;;  %301 = vst [vmem:[%s1412_s27 + $0x188] sm:$0xff] %v300_v49  ;;  %v304_v51 = vld [vmem:[%s1407_s26 + $0x328] sm:$0xff] }
  0x2b   : > { %303 = vst [vmem:[%s1412_s27 + $0x190] sm:$0xff] %v302_v50  ;;  %v306_v52 = vld [vmem:[%s1407_s26 + $0x340] sm:$0xff]  ;;  %v308_v53 = vld [vmem:[%s1407_s26 + $0x348] sm:$0xff]  ;;  %305 = vst [vmem:[%s1412_s27 + $0x198] sm:$0xff] %v304_v51 }
  0x2c   : > { %307 = vst [vmem:[%s1412_s27 + $0x1a0] sm:$0xff] %v306_v52  ;;  %309 = vst [vmem:[%s1412_s27 + $0x1a8] sm:$0xff] %v308_v53  ;;  %v310_v54 = vld [vmem:[%s1407_s26 + $0x360] sm:$0xff]  ;;  %v312_v55 = vld [vmem:[%s1407_s26 + $0x368] sm:$0xff] }
  0x2d   : > { %v314_v56 = vld [vmem:[%s1407_s26 + $0x380] sm:$0xff]  ;;  %311 = vst [vmem:[%s1412_s27 + $0x1b0] sm:$0xff] %v310_v54  ;;  %313 = vst [vmem:[%s1412_s27 + $0x1b8] sm:$0xff] %v312_v55  ;;  %v316_v57 = vld [vmem:[%s1407_s26 + $0x388] sm:$0xff] }
  0x2e   : > { %315 = vst [vmem:[%s1412_s27 + $0x1c0] sm:$0xff] %v314_v56  ;;  %v318_v58 = vld [vmem:[%s1407_s26 + $0x3a0] sm:$0xff]  ;;  %v320_v59 = vld [vmem:[%s1407_s26 + $0x3a8] sm:$0xff]  ;;  %317 = vst [vmem:[%s1412_s27 + $0x1c8] sm:$0xff] %v316_v57 }
  0x2f   : > { %319 = vst [vmem:[%s1412_s27 + $0x1d0] sm:$0xff] %v318_v58  ;;  %321 = vst [vmem:[%s1412_s27 + $0x1d8] sm:$0xff] %v320_v59  ;;  %v322_v60 = vld [vmem:[%s1407_s26 + $0x3c0] sm:$0xff]  ;;  %v324_v61 = vld [vmem:[%s1407_s26 + $0x3c8] sm:$0xff] }
  0x30   : > { %v326_v62 = vld [vmem:[%s1407_s26 + $0x3e0] sm:$0xff]  ;;  %323 = vst [vmem:[%s1412_s27 + $0x1e0] sm:$0xff] %v322_v60  ;;  %325 = vst [vmem:[%s1412_s27 + $0x1e8] sm:$0xff] %v324_v61  ;;  %v328_v63 = vld [vmem:[%s1407_s26 + $0x3e8] sm:$0xff] }
  0x31   : > { %327 = vst [vmem:[%s1412_s27 + $0x1f0] sm:$0xff] %v326_v62  ;;  %329 = vst [vmem:[%s1412_s27 + $0x1f8] sm:$0xff] %v328_v63 }
  0x32 PF: > { %p1086_p6 = scmp.ge.s32.totalorder %s1341_s16, 1  ;;  %p334_p7 = scmp.lt.s32.totalorder %s1341_s16, 3 }
  0x34   : > { %p335_p8 = pnand %p1086_p6, %p334_p7 }
  0x35   : > { %s341_s28 = sand.u32 (!%p335_p8), 1, %s1325_s12   ;;  %v1545_v0 = vld [vmem:[%s1639_s0] sm:$0xff] (!%p335_p8)  ;;  %v1343_v3 = vmov (!%p335_p8), 0   ;;  %s1088_s8 = sshll.u32 (!%p335_p8), %s1333_s14, 2 }
  0x36   : > { %338 = sbr.rel (%p335_p8) target bundleno = 342 (0x156), region = 51  ;;  %v908_v1 = vld [vmem:[%s1641_s2] sm:$0xff] (!%p335_p8)  ;;  %s1087_s6 = sshll.u32 (!%p335_p8), %s341_s28, 9  ;;  %v1091_v2 = vcombine.high (!%p335_p8), %v1545_v0, %v1545_v0  ;;  %1204 = vset.pattern.permute.xlu0 (!%p335_p8), %v1343_v3 }
  0x37   : > { %911 = vperm.xlu0 (!%p335_p8), %1204, %v908_v1   ;;  %s1552_s7 = scalar_lea.vmem (!%p335_p8), [#allocation3], %s1087_s6  ;;  %p400_p9 = scmp.lt.s32.totalorder (!%p335_p8), %s1088_s8, 7 }
  0x38   : > { %v1205_v4 = vld [vmem:[%s1552_s7 + $0x4] ss:$16 sps:$4 sm:$0xff] (!%p335_p8)   ;;  %843 = vmatprep.mubr.bf16.mxu0 (!%p335_p8), %v1091_v2  ;;  %884 = vmatprep.mubr.bf16.mxu1 (!%p335_p8), %v1091_v2  ;;  %v1207_v5 = vld [vmem:[%s1552_s7 + $0xc] ss:$16 sps:$4 sm:$0xff] (!%p335_p8)   ;;  %v1209_v6 = vld [vmem:[%s1552_s7] ss:$16 sps:$4 sm:$0xff] (!%p335_p8)  }
  0x39   : > { %811 = vmatprep.subr.bf16.mxu0 (!%p335_p8), %v1205_v4  ;;  %v1210_v7 = vld [vmem:[%s1552_s7 + $0x8] ss:$16 sps:$4 sm:$0xff] (!%p335_p8)   ;;  %852 = vmatprep.subr.bf16.mxu1 (!%p335_p8), %v1207_v5  ;;  %v1211_v8 = vld [vmem:[%s1552_s7 + $0x24] ss:$16 sps:$4 sm:$0xff] (!%p335_p8)   ;;  %v1213_v9 = vld [vmem:[%s1552_s7 + $0x2c] ss:$16 sps:$4 sm:$0xff] (!%p335_p8)   ;;  %v1090_v5 = vcombine.low (!%p335_p8), %v1545_v0, %v1545_v0 }
  0x3a   : > { %812 = vmatpush1.bf16.msra.mxu0 (!%p335_p8), %v1209_v6  ;;  %853 = vmatpush1.bf16.msra.mxu1 (!%p335_p8), %v1210_v7  ;;  %v1215_v10 = vld [vmem:[%s1552_s7 + $0x20] ss:$16 sps:$4 sm:$0xff] (!%p335_p8)   ;;  %v1216_v11 = vld [vmem:[%s1552_s7 + $0x28] ss:$16 sps:$4 sm:$0xff] (!%p335_p8)   ;;  %v1217_v12 = vld [vmem:[%s1552_s7 + $0x44] ss:$16 sps:$4 sm:$0xff] (!%p335_p8)  }
  0x3b   : > { %813 = vmatprep.subr.bf16.mxu0 (!%p335_p8), %v1211_v8  ;;  %854 = vmatprep.subr.bf16.mxu1 (!%p335_p8), %v1213_v9  ;;  %v1219_v13 = vld [vmem:[%s1552_s7 + $0x4c] ss:$16 sps:$4 sm:$0xff] (!%p335_p8)   ;;  %v1221_v14 = vld [vmem:[%s1552_s7 + $0x40] ss:$16 sps:$4 sm:$0xff] (!%p335_p8)   ;;  %v1222_v15 = vld [vmem:[%s1552_s7 + $0x48] ss:$16 sps:$4 sm:$0xff] (!%p335_p8)  }
  0x3c   : > { %v1223_v16 = vld [vmem:[%s1552_s7 + $0x64] ss:$16 sps:$4 sm:$0xff] (!%p335_p8)   ;;  %v1225_v17 = vld [vmem:[%s1552_s7 + $0x6c] ss:$16 sps:$4 sm:$0xff] (!%p335_p8)   ;;  %v1227_v18 = vld [vmem:[%s1552_s7 + $0x60] ss:$16 sps:$4 sm:$0xff] (!%p335_p8)  }
  0x3d   : > { %v1228_v19 = vld [vmem:[%s1552_s7 + $0x68] ss:$16 sps:$4 sm:$0xff]   ;;  %v1229_v20 = vld [vmem:[%s1552_s7 + $0x84] ss:$16 sps:$4 sm:$0xff]   ;;  %v1231_v21 = vld [vmem:[%s1552_s7 + $0x8c] ss:$16 sps:$4 sm:$0xff]  }
  0x3e   : > { %814 = vmatpush1.bf16.msra.mxu0 %v1215_v10  ;;  %855 = vmatpush1.bf16.msra.mxu1 %v1216_v11  ;;  %v1233_v22 = vld [vmem:[%s1552_s7 + $0x80] ss:$16 sps:$4 sm:$0xff]   ;;  %v1234_v23 = vld [vmem:[%s1552_s7 + $0x88] ss:$16 sps:$4 sm:$0xff]   ;;  %v1235_v24 = vld [vmem:[%s1552_s7 + $0xa4] ss:$16 sps:$4 sm:$0xff]  }
  0x3f   : > { %815 = vmatprep.subr.bf16.mxu0 %v1217_v12  ;;  %856 = vmatprep.subr.bf16.mxu1 %v1219_v13  ;;  %v1237_v25 = vld [vmem:[%s1552_s7 + $0xac] ss:$16 sps:$4 sm:$0xff]   ;;  %v1239_v26 = vld [vmem:[%s1552_s7 + $0xa0] ss:$16 sps:$4 sm:$0xff]   ;;  %v1240_v27 = vld [vmem:[%s1552_s7 + $0xa8] ss:$16 sps:$4 sm:$0xff]  }
  0x40   : > { %v1241_v28 = vld [vmem:[%s1552_s7 + $0xc4] ss:$16 sps:$4 sm:$0xff]   ;;  %v1243_v29 = vld [vmem:[%s1552_s7 + $0xcc] ss:$16 sps:$4 sm:$0xff]   ;;  %v1245_v30 = vld [vmem:[%s1552_s7 + $0xc0] ss:$16 sps:$4 sm:$0xff]  }
  0x41   : > { %v1246_v31 = vld [vmem:[%s1552_s7 + $0xc8] ss:$16 sps:$4 sm:$0xff]   ;;  %v1247_v32 = vld [vmem:[%s1552_s7 + $0xe4] ss:$16 sps:$4 sm:$0xff]   ;;  %v1249_v33 = vld [vmem:[%s1552_s7 + $0xec] ss:$16 sps:$4 sm:$0xff]  }
  0x42   : > { %816 = vmatpush1.bf16.msra.mxu0 %v1221_v14  ;;  %857 = vmatpush1.bf16.msra.mxu1 %v1222_v15  ;;  %v1251_v34 = vld [vmem:[%s1552_s7 + $0xe0] ss:$16 sps:$4 sm:$0xff]   ;;  %v1252_v35 = vld [vmem:[%s1552_s7 + $0xe8] ss:$16 sps:$4 sm:$0xff]   ;;  %v1253_v36 = vld [vmem:[%s1552_s7 + $0x104] ss:$16 sps:$4 sm:$0xff]  }
  0x43   : > { %817 = vmatprep.subr.bf16.mxu0 %v1223_v16  ;;  %858 = vmatprep.subr.bf16.mxu1 %v1225_v17  ;;  %v1255_v37 = vld [vmem:[%s1552_s7 + $0x10c] ss:$16 sps:$4 sm:$0xff]   ;;  %v1257_v38 = vld [vmem:[%s1552_s7 + $0x100] ss:$16 sps:$4 sm:$0xff]   ;;  %v1258_v39 = vld [vmem:[%s1552_s7 + $0x108] ss:$16 sps:$4 sm:$0xff]  }
  0x44   : > { %v1259_v40 = vld [vmem:[%s1552_s7 + $0x124] ss:$16 sps:$4 sm:$0xff]   ;;  %v1261_v41 = vld [vmem:[%s1552_s7 + $0x12c] ss:$16 sps:$4 sm:$0xff]   ;;  %v1263_v42 = vld [vmem:[%s1552_s7 + $0x120] ss:$16 sps:$4 sm:$0xff]  }
  0x45   : > { %v1264_v43 = vld [vmem:[%s1552_s7 + $0x128] ss:$16 sps:$4 sm:$0xff]   ;;  %v1265_v44 = vld [vmem:[%s1552_s7 + $0x144] ss:$16 sps:$4 sm:$0xff]   ;;  %v1267_v45 = vld [vmem:[%s1552_s7 + $0x14c] ss:$16 sps:$4 sm:$0xff]  }
  0x46   : > { %818 = vmatpush1.bf16.msra.mxu0 %v1227_v18  ;;  %859 = vmatpush1.bf16.msra.mxu1 %v1228_v19  ;;  %v1269_v46 = vld [vmem:[%s1552_s7 + $0x140] ss:$16 sps:$4 sm:$0xff]   ;;  %v1270_v47 = vld [vmem:[%s1552_s7 + $0x148] ss:$16 sps:$4 sm:$0xff]   ;;  %v1271_v48 = vld [vmem:[%s1552_s7 + $0x164] ss:$16 sps:$4 sm:$0xff]  }
  0x47   : > { %819 = vmatprep.subr.bf16.mxu0 %v1229_v20  ;;  %860 = vmatprep.subr.bf16.mxu1 %v1231_v21  ;;  %v1273_v49 = vld [vmem:[%s1552_s7 + $0x16c] ss:$16 sps:$4 sm:$0xff]   ;;  %v1275_v50 = vld [vmem:[%s1552_s7 + $0x160] ss:$16 sps:$4 sm:$0xff]   ;;  %v1276_v51 = vld [vmem:[%s1552_s7 + $0x168] ss:$16 sps:$4 sm:$0xff]  }
  0x48   : > { %v1277_v52 = vld [vmem:[%s1552_s7 + $0x184] ss:$16 sps:$4 sm:$0xff]   ;;  %v1279_v53 = vld [vmem:[%s1552_s7 + $0x18c] ss:$16 sps:$4 sm:$0xff]   ;;  %v1281_v54 = vld [vmem:[%s1552_s7 + $0x180] ss:$16 sps:$4 sm:$0xff]  }
  0x49   : > { %v1282_v55 = vld [vmem:[%s1552_s7 + $0x188] ss:$16 sps:$4 sm:$0xff]   ;;  %v1283_v56 = vld [vmem:[%s1552_s7 + $0x1a4] ss:$16 sps:$4 sm:$0xff]   ;;  %v1285_v57 = vld [vmem:[%s1552_s7 + $0x1ac] ss:$16 sps:$4 sm:$0xff]  }
  0x4a   : > { %820 = vmatpush1.bf16.msra.mxu0 %v1233_v22  ;;  %861 = vmatpush1.bf16.msra.mxu1 %v1234_v23  ;;  %v1287_v58 = vld [vmem:[%s1552_s7 + $0x1a0] ss:$16 sps:$4 sm:$0xff]   ;;  %v1288_v59 = vld [vmem:[%s1552_s7 + $0x1a8] ss:$16 sps:$4 sm:$0xff]   ;;  %v1289_v60 = vld [vmem:[%s1552_s7 + $0x1c4] ss:$16 sps:$4 sm:$0xff]  }
  0x4b   : > { %821 = vmatprep.subr.bf16.mxu0 %v1235_v24  ;;  %862 = vmatprep.subr.bf16.mxu1 %v1237_v25  ;;  %v1291_v61 = vld [vmem:[%s1552_s7 + $0x1cc] ss:$16 sps:$4 sm:$0xff]   ;;  %v1293_v62 = vld [vmem:[%s1552_s7 + $0x1c0] ss:$16 sps:$4 sm:$0xff]   ;;  %v1294_v63 = vld [vmem:[%s1552_s7 + $0x1c8] ss:$16 sps:$4 sm:$0xff]  }
  0x4c   : > { %v1295_v1 = vld [vmem:[%s1552_s7 + $0x1e4] ss:$16 sps:$4 sm:$0xff]   ;;  %v1297_v2 = vld [vmem:[%s1552_s7 + $0x1ec] ss:$16 sps:$4 sm:$0xff]   ;;  %v1299_v3 = vld [vmem:[%s1552_s7 + $0x1e0] ss:$16 sps:$4 sm:$0xff]  }
  0x4d   : > { %v1300_v4 = vld [vmem:[%s1552_s7 + $0x1e8] ss:$16 sps:$4 sm:$0xff]   ;;  %s1650_s8 = smov (!%p400_p9, %s1088_s8), 7 }
  0x4e   : > { %822 = vmatpush1.bf16.msra.mxu0 %v1239_v26  ;;  %863 = vmatpush1.bf16.msra.mxu1 %v1240_v27  ;;  %s1089_s9 = sshll.u32 %s1650_s8, 2 }
  0x4f   : > { %823 = vmatprep.subr.bf16.mxu0 %v1241_v28  ;;  %864 = vmatprep.subr.bf16.mxu1 %v1243_v29  ;;  %s405_s12 = scalar_lea.vmem %s1642_s3, %s1089_s9 }
  0x52   : > { %824 = vmatpush1.bf16.msra.mxu0 %v1245_v30  ;;  %865 = vmatpush1.bf16.msra.mxu1 %v1246_v31 }
  0x53   : > { %825 = vmatprep.subr.bf16.mxu0 %v1247_v32  ;;  %866 = vmatprep.subr.bf16.mxu1 %v1249_v33 }
  0x56   : > { %826 = vmatpush1.bf16.msra.mxu0 %v1251_v34  ;;  %867 = vmatpush1.bf16.msra.mxu1 %v1252_v35 }
  0x57   : > { %827 = vmatprep.subr.bf16.mxu0 %v1253_v36  ;;  %868 = vmatprep.subr.bf16.mxu1 %v1255_v37 }
  0x5a   : > { %828 = vmatpush1.bf16.msra.mxu0 %v1257_v38  ;;  %869 = vmatpush1.bf16.msra.mxu1 %v1258_v39 }
  0x5b   : > { %829 = vmatprep.subr.bf16.mxu0 %v1259_v40  ;;  %870 = vmatprep.subr.bf16.mxu1 %v1261_v41 }
  0x5e   : > { %830 = vmatpush1.bf16.msra.mxu0 %v1263_v42  ;;  %871 = vmatpush1.bf16.msra.mxu1 %v1264_v43 }
  0x5f   : > { %831 = vmatprep.subr.bf16.mxu0 %v1265_v44  ;;  %872 = vmatprep.subr.bf16.mxu1 %v1267_v45 }
  0x62   : > { %832 = vmatpush1.bf16.msra.mxu0 %v1269_v46  ;;  %873 = vmatpush1.bf16.msra.mxu1 %v1270_v47 }
  0x63   : > { %833 = vmatprep.subr.bf16.mxu0 %v1271_v48  ;;  %874 = vmatprep.subr.bf16.mxu1 %v1273_v49 }
  0x66   : > { %834 = vmatpush1.bf16.msra.mxu0 %v1275_v50  ;;  %875 = vmatpush1.bf16.msra.mxu1 %v1276_v51 }
  0x67   : > { %835 = vmatprep.subr.bf16.mxu0 %v1277_v52  ;;  %876 = vmatprep.subr.bf16.mxu1 %v1279_v53 }
  0x6a   : > { %836 = vmatpush1.bf16.msra.mxu0 %v1281_v54  ;;  %877 = vmatpush1.bf16.msra.mxu1 %v1282_v55 }
  0x6b   : > { %837 = vmatprep.subr.bf16.mxu0 %v1283_v56  ;;  %878 = vmatprep.subr.bf16.mxu1 %v1285_v57 }
  0x6e   : > { %838 = vmatpush1.bf16.msra.mxu0 %v1287_v58  ;;  %879 = vmatpush1.bf16.msra.mxu1 %v1288_v59 }
  0x6f   : > { %839 = vmatprep.subr.bf16.mxu0 %v1289_v60  ;;  %880 = vmatprep.subr.bf16.mxu1 %v1291_v61 }
  0x72   : > { %840 = vmatpush1.bf16.msra.mxu0 %v1293_v62  ;;  %881 = vmatpush1.bf16.msra.mxu1 %v1294_v63 }
  0x73   : > { %841 = vmatprep.subr.bf16.mxu0 %v1295_v1  ;;  %882 = vmatprep.subr.bf16.mxu1 %v1297_v2 }
  0x76   : > { %842 = vmatpush1.bf16.msra.mxu0 %v1299_v3  ;;  %883 = vmatpush1.bf16.msra.mxu1 %v1300_v4 }
  0x79   : > { %844 = vmatmul.mubr.bf16.vlgmr.msra.gmra.mrb[0].mxu0 %v1090_v5  ;;  %885 = vmatmul.mubr.bf16.vlgmr.msra.gmra.mrb[0].mxu1 %v1090_v5 }
  0xb6   : > { %v912_v6 = vpop.permute.xlu0 %911 }
 0x14c   : > { %v845_v7 = vpop.f32.mrb[0].mxu0  ;;  %v886_v8 = vpop.f32.mrb[0].mxu1 }
 0x14d   : > { %v914_v9 = vadd.f32 %v912_v6, %v845_v7  ;;  %v916_v10 = vadd.f32 %v912_v6, %v886_v8  ;;  %v847_v11 = vpop.f32.mrb[1].mxu0  ;;  %v888_v12 = vpop.f32.mrb[1].mxu1 }
 0x14e   : > { %v915_v13 = vadd.f32 %v912_v6, %v847_v11  ;;  %v917_v14 = vadd.f32 %v912_v6, %v888_v12  ;;  %v849_v15 = vpop.f32.mrb[2].mxu0  ;;  %v890_v16 = vpop.f32.mrb[2].mxu1 }
 0x14f   : > { %vm918_vm0 = vcmp.gt.f32.partialorder %v914_v9, 0.0  ;;  %v922_v0 = vmul.f32 0.1, %v914_v9  ;;  %vm920_vm1 = vcmp.gt.f32.partialorder %v916_v10, 0.0  ;;  %v924_v17 = vmul.f32 0.1, %v916_v10 }
 0x150   : > { %vm919_vm2 = vcmp.gt.f32.partialorder %v915_v13, 0.0  ;;  %v923_v18 = vmul.f32 0.1, %v915_v13  ;;  %vm921_vm3 = vcmp.gt.f32.partialorder %v917_v14, 0.0  ;;  %v925_v19 = vmul.f32 0.1, %v917_v14 }
 0x151   : > { %v926_v20 = vsel %vm918_vm0, %v914_v9, %v922_v0  ;;  %v928_v21 = vsel %vm920_vm1, %v916_v10, %v924_v17  ;;  %v850_v22 = vpop.f32.mrb[3].mxu0  ;;  %v891_v23 = vpop.f32.mrb[3].mxu1 }
 0x152   : > { %v927_v24 = vsel %vm919_vm2, %v915_v13, %v923_v18  ;;  %v929_v25 = vsel %vm921_vm3, %v917_v14, %v925_v19 }
 0x153   : > { %v1161_v26 = vpack.c.bf16 %v927_v24, %v926_v20  ;;  %v1162_v27 = vpack.c.bf16 %v929_v25, %v928_v21 }
 0x155   : > { %946 = vst [vmem:[%s405_s12] sm:$0xff] %v1161_v26  ;;  %947 = vst [vmem:[%s405_s12 + $0x8] sm:$0xff] %v1162_v27 }
 0x156 PF: > { %s13_s16 = sadd.s32 1, %s1341_s16   ;;  %s1643_s12 = smov %s1329_s13 }
 0x157   : > { %p10_p10 = scmp.ge.s32.totalorder %s13_s16, 4   ;;  %s1644_s13 = smov %s1399_s20 }
 0x158   : > { %s1645_s14 = smov %s1337_s15  ;;  %s1646_s15 = smov %s1648_s17 }
 0x159   :  { %12 = sbr.rel (!%p10_p10) target bundleno = 3 (0x3), region = 104 }

// kernel: fwd.31
= control target key start
LH: loop header
LB: loop body
LE: loop exit
PB: predicated region body
PF: predicated region fallthrough
CT: control target
= control target key end

     0   :  { %s92_s0 = inlined_call_operand.vmem [shape: bf16[16,256], index: 0, kind: input, shape index: {}]   ;;  %s93_s1 = inlined_call_operand.vmem [shape: bf16[16,256], index: 1, kind: input, shape index: {}]   ;;  %s94_s2 = inlined_call_operand.vmem [shape: bf16[16,256], index: 2, kind: input, shape index: {}]   ;;  %s95_s3 = inlined_call_operand.vmem [shape: bf16[16,256], index: 3, kind: input, shape index: {}]   ;;  %s96_s4 = inlined_call_operand.vmem [shape: bf16[16,256], index: 4, kind: output, shape index: {}]  }
   0x1   :  { %v17_v0 = vld [vmem:[%s92_s0] sm:$0xff]  ;;  %v18_v5 = vld [vmem:[%s92_s0 + $0x8] sm:$0xff] }
   0x2   :  { %v19_v1 = vld [vmem:[%s93_s1] sm:$0xff]  ;;  %v20_v6 = vld [vmem:[%s93_s1 + $0x8] sm:$0xff] }
   0x3   :  { %v23_v2 = vld [vmem:[%s94_s2] sm:$0xff]  ;;  %v21_v3 = vmax.bf16 %v19_v1, %v17_v0  ;;  %v22_v8 = vmax.bf16 %v20_v6, %v18_v5  ;;  %v24_v9 = vld [vmem:[%s94_s2 + $0x8] sm:$0xff] }
   0x4   :  { %v25_v4 = vld [vmem:[%s95_s3] sm:$0xff]  ;;  %v26_v10 = vld [vmem:[%s95_s3 + $0x8] sm:$0xff] }
   0x5   :  { %v27_v7 = vmax.bf16 %v25_v4, %v23_v2  ;;  %v28_v11 = vmax.bf16 %v26_v10, %v24_v9 }
   0x7   :  { %v29_v12 = vmax.bf16 %v27_v7, %v21_v3  ;;  %v30_v13 = vmax.bf16 %v28_v11, %v22_v8 }
   0x9   :  { %31 = vst [vmem:[%s96_s4] sm:$0xff] %v29_v12  ;;  %32 = vst [vmem:[%s96_s4 + $0x8] sm:$0xff] %v30_v13 }

// kernel: fwd.32
= control target key start
LH: loop header
LB: loop body
LE: loop exit
PB: predicated region body
PF: predicated region fallthrough
CT: control target
= control target key end

     0   :  { %v283_v1 = vmov 0   ;;  %s367_s1 = inlined_call_operand.vmem [shape: bf16[128,256], index: 1, kind: input, shape index: {}]   ;;  %s368_s2 = inlined_call_operand.vmem [shape: f32[16,1], index: 2, kind: input, shape index: {}]   ;;  %s369_s0 = inlined_call_operand.vmem [shape: bf16[16,128], index: 0, kind: input, shape index: {}]   ;;  %s370_s3 = inlined_call_operand.vmem [shape: bf16[16,256], index: 3, kind: output, shape index: {}]  }
   0x1   :  { %v258_v0 = vld [vmem:[%s367_s1 + $0x4] ss:$8 sps:$4 sm:$0xff]   ;;  %163 = vmatprep.mubr.bf16.mxu0 %v283_v1  ;;  %257 = vset.pattern.permute.xlu0 %v283_v1  ;;  %v260_v2 = vld [vmem:[%s367_s1] ss:$8 sps:$4 sm:$0xff]   ;;  %v261_v3 = vld [vmem:[%s367_s1 + $0x14] ss:$8 sps:$4 sm:$0xff]  }
   0x2   :  { %131 = vmatprep.subr.bf16.mxu0 %v258_v0  ;;  %v263_v4 = vld [vmem:[%s367_s1 + $0x10] ss:$8 sps:$4 sm:$0xff]   ;;  %v264_v5 = vld [vmem:[%s367_s1 + $0x24] ss:$8 sps:$4 sm:$0xff]   ;;  %v266_v6 = vld [vmem:[%s367_s1 + $0x20] ss:$8 sps:$4 sm:$0xff]  }
   0x3   :  { %132 = vmatpush1.bf16.msra.mxu0 %v260_v2  ;;  %v267_v7 = vld [vmem:[%s367_s1 + $0x34] ss:$8 sps:$4 sm:$0xff]   ;;  %v269_v8 = vld [vmem:[%s367_s1 + $0x30] ss:$8 sps:$4 sm:$0xff]   ;;  %v189_v9 = vld [vmem:[%s368_s2] sm:$0xff] }
   0x4   :  { %133 = vmatprep.subr.bf16.mxu0 %v261_v3  ;;  %v270_v10 = vld [vmem:[%s367_s1 + $0x44] ss:$8 sps:$4 sm:$0xff]   ;;  %193 = vperm.xlu0 %257, %v189_v9   ;;  %v272_v12 = vld [vmem:[%s367_s1 + $0x40] ss:$8 sps:$4 sm:$0xff]   ;;  %v273_v13 = vld [vmem:[%s367_s1 + $0x54] ss:$8 sps:$4 sm:$0xff]  }
   0x5   :  { %v190_v11 = vld [vmem:[%s368_s2 + $0x8] sm:$0xff]  ;;  %v275_v14 = vld [vmem:[%s367_s1 + $0x50] ss:$8 sps:$4 sm:$0xff]   ;;  %v279_v17 = vld [vmem:[%s367_s1 + $0x74] ss:$8 sps:$4 sm:$0xff]  }
   0x6   :  { %v276_v15 = vld [vmem:[%s367_s1 + $0x64] ss:$8 sps:$4 sm:$0xff]   ;;  %v278_v16 = vld [vmem:[%s367_s1 + $0x60] ss:$8 sps:$4 sm:$0xff]   ;;  %v281_v18 = vld [vmem:[%s367_s1 + $0x70] ss:$8 sps:$4 sm:$0xff]  }
   0x7   :  { %134 = vmatpush1.bf16.msra.mxu0 %v263_v4  ;;  %v282_v19 = vld [vmem:[%s369_s0] sm:$0xff]  }
   0x8   :  { %135 = vmatprep.subr.bf16.mxu0 %v264_v5  ;;  %198 = vperm.xlu0 %257, %v190_v11  }
   0xb   :  { %136 = vmatpush1.bf16.msra.mxu0 %v266_v6 }
   0xc   :  { %137 = vmatprep.subr.bf16.mxu0 %v267_v7 }
   0xf   :  { %138 = vmatpush1.bf16.msra.mxu0 %v269_v8 }
  0x10   :  { %139 = vmatprep.subr.bf16.mxu0 %v270_v10 }
  0x13   :  { %140 = vmatpush1.bf16.msra.mxu0 %v272_v12 }
  0x14   :  { %141 = vmatprep.subr.bf16.mxu0 %v273_v13 }
  0x17   :  { %142 = vmatpush1.bf16.msra.mxu0 %v275_v14 }
  0x18   :  { %143 = vmatprep.subr.bf16.mxu0 %v276_v15 }
  0x1b   :  { %144 = vmatpush1.bf16.msra.mxu0 %v278_v16 }
  0x1c   :  { %145 = vmatprep.subr.bf16.mxu0 %v279_v17 }
  0x1f   :  { %146 = vmatpush1.bf16.msra.mxu0 %v281_v18 }
  0x22   :  { %164 = vmatmul.mubr.bf16.vlgmr.msra.gmra.mrb[0].mxu0 %v282_v19 }
  0x83   :  { %v194_v20 = vpop.permute.xlu0 %193 }
  0x87   :  { %v199_v24 = vpop.permute.xlu0 %198 }
  0xf5   :  { %v165_v21 = vpop.f32.mrb[0].mxu0 }
  0xf6   :  { %v201_v22 = vadd.f32 %v194_v20, %v165_v21  ;;  %v167_v23 = vpop.f32.mrb[1].mxu0 }
  0xf7   :  { %v202_v25 = vadd.f32 %v194_v20, %v167_v23  ;;  %v169_v26 = vpop.f32.mrb[2].mxu0 }
  0xf8   :  { %vm205_vm0 = vcmp.gt.f32.partialorder %v201_v22, 0.0  ;;  %v209_v27 = vmul.f32 0.1, %v201_v22  ;;  %v203_v28 = vadd.f32 %v199_v24, %v169_v26  ;;  %v171_v29 = vpop.f32.mrb[3].mxu0 }
  0xf9   :  { %vm206_vm1 = vcmp.gt.f32.partialorder %v202_v25, 0.0  ;;  %v210_v30 = vmul.f32 0.1, %v202_v25  ;;  %v204_v31 = vadd.f32 %v199_v24, %v171_v29 }
  0xfa   :  { %v213_v32 = vsel %vm205_vm0, %v201_v22, %v209_v27  ;;  %vm207_vm2 = vcmp.gt.f32.partialorder %v203_v28, 0.0  ;;  %v211_v33 = vmul.f32 0.1, %v203_v28 }
  0xfb   :  { %v214_v34 = vsel %vm206_vm1, %v202_v25, %v210_v30  ;;  %vm208_vm3 = vcmp.gt.f32.partialorder %v204_v31, 0.0  ;;  %v212_v35 = vmul.f32 0.1, %v204_v31 }
  0xfc   :  { %v254_v36 = vpack.c.bf16 %v214_v34, %v213_v32  ;;  %v215_v37 = vsel %vm207_vm2, %v203_v28, %v211_v33 }
  0xfd   :  { %v216_v38 = vsel %vm208_vm3, %v204_v31, %v212_v35 }
  0xfe   :  { %229 = vst [vmem:[%s370_s3] sm:$0xff] %v254_v36  ;;  %v255_v39 = vpack.c.bf16 %v216_v38, %v215_v37 }
 0x100   :  { %230 = vst [vmem:[%s370_s3 + $0x8] sm:$0xff] %v255_v39 }

// kernel: fwd.33
= control target key start
LH: loop header
LB: loop body
LE: loop exit
PB: predicated region body
PF: predicated region fallthrough
CT: control target
= control target key end

     0   :  { %s95_s0 = inlined_call_operand.vmem [shape: bf16[16,128], index: 0, kind: input, shape index: {}]   ;;  %s96_s1 = inlined_call_operand.vmem [shape: bf16[16,128], index: 1, kind: input, shape index: {}]   ;;  %s97_s2 = inlined_call_operand.vmem [shape: bf16[16,128], index: 2, kind: input, shape index: {}]   ;;  %s98_s3 = inlined_call_operand.vmem [shape: bf16[16,128], index: 3, kind: input, shape index: {}]   ;;  %s99_s4 = inlined_call_operand.vmem [shape: bf16[16,128], index: 4, kind: output, shape index: {}]  }
   0x1   :  { %v17_v0 = vld [vmem:[%s95_s0] sm:$0xf]  ;;  %v18_v1 = vld [vmem:[%s95_s0 + $0x4] sm:$0xf] }
   0x2   :  { %v19_v2 = vld [vmem:[%s96_s1] sm:$0xf]  ;;  %v20_v3 = vld [vmem:[%s96_s1 + $0x4] sm:$0xf] }
   0x3   :  { %v21_v4 = vmax.bf16 %v19_v2, %v17_v0  ;;  %v23_v5 = vld [vmem:[%s97_s2] sm:$0xf]  ;;  %v24_v6 = vld [vmem:[%s97_s2 + $0x4] sm:$0xf]  ;;  %v22_v7 = vmax.bf16 %v20_v3, %v18_v1 }
   0x4   :  { %v25_v8 = vld [vmem:[%s98_s3] sm:$0xf]  ;;  %v26_v9 = vld [vmem:[%s98_s3 + $0x4] sm:$0xf] }
   0x5   :  { %v27_v10 = vmax.bf16 %v25_v8, %v23_v5  ;;  %v28_v11 = vmax.bf16 %v26_v9, %v24_v6 }
   0x7   :  { %v29_v12 = vmax.bf16 %v27_v10, %v21_v4  ;;  %v30_v13 = vmax.bf16 %v28_v11, %v22_v7 }
   0x9   :  { %v42_v14 = vcombine.low %v29_v12, %v30_v13 }
   0xb   :  { %41 = vst [vmem:[%s99_s4] sm:$0xff] %v42_v14  }

// kernel: fwd.34
= control target key start
LH: loop header
LB: loop body
LE: loop exit
PB: predicated region body
PF: predicated region fallthrough
CT: control target
= control target key end

     0   :  { %v197_v0 = vmov 0.0   ;;  %vm198_vm0 = vmmov 0   ;;  %v199_v2 = vmov 0   ;;  %s253_s1 = inlined_call_operand.vmem [shape: bf16[128,128], index: 1, kind: input, shape index: {}]   ;;  %s254_s2 = inlined_call_operand.vmem [shape: f32[8,1], index: 2, kind: input, shape index: {}]   ;;  %s255_s0 = inlined_call_operand.vmem [shape: bf16[8,128], index: 0, kind: input, shape index: {}]   ;;  %s256_s3 = inlined_call_operand.vmem [shape: bf16[8,128], index: 3, kind: output, shape index: {}]  }
   0x1   :  { %165 = vmatprep.subr.bf16.mxu0 %v197_v0  ;;  %v189_v1 = vld [vmem:[%s253_s1] sm:$0xff]   ;;  %181 = vmatprep.mubr.msk.bf16.mxu0 %vm198_vm0, %v197_v0  ;;  %v190_v3 = vld [vmem:[%s253_s1 + $0x8] sm:$0xff]   ;;  %v191_v4 = vld [vmem:[%s253_s1 + $0x10] sm:$0xff]  }
   0x2   :  { %188 = vset.pattern.permute.xlu0 %v199_v2  ;;  %166 = vmatpush3.bf16.msra.mxu0 %v189_v1  ;;  %v132_v5 = vld [vmem:[%s254_s2] sm:$0xff]  ;;  %v192_v6 = vld [vmem:[%s253_s1 + $0x18] sm:$0xff]   ;;  %v194_v8 = vld [vmem:[%s253_s1 + $0x28] sm:$0xff]  }
   0x3   :  { %167 = vmatprep.subr.bf16.mxu0 %v197_v0  ;;  %135 = vperm.xlu0 %188, %v132_v5   ;;  %v193_v7 = vld [vmem:[%s253_s1 + $0x20] sm:$0xff]   ;;  %v195_v9 = vld [vmem:[%s253_s1 + $0x30] sm:$0xff]   ;;  %v196_v10 = vld [vmem:[%s253_s1 + $0x38] sm:$0xff]  }
   0x4   :  { %v21_v11 = vld [vmem:[%s255_s0] sm:$0xf] }
   0x6   :  { %168 = vmatpush3.bf16.msra.mxu0 %v190_v3 }
   0x7   :  { %169 = vmatprep.subr.bf16.mxu0 %v197_v0 }
   0xa   :  { %170 = vmatpush3.bf16.msra.mxu0 %v191_v4 }
   0xb   :  { %171 = vmatprep.subr.bf16.mxu0 %v197_v0 }
   0xe   :  { %172 = vmatpush3.bf16.msra.mxu0 %v192_v6 }
   0xf   :  { %173 = vmatprep.subr.bf16.mxu0 %v197_v0 }
  0x12   :  { %174 = vmatpush3.bf16.msra.mxu0 %v193_v7 }
  0x13   :  { %175 = vmatprep.subr.bf16.mxu0 %v197_v0 }
  0x16   :  { %176 = vmatpush3.bf16.msra.mxu0 %v194_v8 }
  0x17   :  { %177 = vmatprep.subr.bf16.mxu0 %v197_v0 }
  0x1a   :  { %178 = vmatpush3.bf16.msra.mxu0 %v195_v9 }
  0x1b   :  { %179 = vmatprep.subr.bf16.mxu0 %v197_v0 }
  0x1e   :  { %180 = vmatpush3.bf16.msra.mxu0 %v196_v10 }
  0x21   :  { %182 = vmatmul.mubr.bf16.vlgmr.msra.gmra.mrb[0].mxu0 %v21_v11 }
  0x82   :  { %v136_v12 = vpop.permute.xlu0 %135 }
  0xf4   :  { %v120_v13 = vpop.f32.mrb[0].mxu0 }
  0xf5   :  { %v138_v14 = vadd.f32 %v136_v12, %v120_v13  ;;  %v183_v15 = vpop.f32.mrb[1].mxu0 }
  0xf6   :  { %v123_v16 = vpop.f32.mrb[2].mxu0 }
  0xf7   :  { %vm139_vm1 = vcmp.gt.f32.partialorder %v138_v14, 0.0  ;;  %v140_v17 = vmul.f32 0.1, %v138_v14  ;;  %v184_v18 = vpop.f32.mrb[3].mxu0 }
  0xf9   :  { %v141_v19 = vsel %vm139_vm1, %v138_v14, %v140_v17 }
  0xfa   :  { %v142_v20 = vpack.c.bf16 %v141_v19, %v141_v19 }
  0xfc   :  { %143 = vst [vmem:[%s256_s3] sm:$0xf] %v142_v20 }

// kernel: fwd.35
= control target key start
LH: loop header
LB: loop body
LE: loop exit
PB: predicated region body
PF: predicated region fallthrough
CT: control target
= control target key end

     0   :  { %v239_v0 = vmov 0.0   ;;  %vm240_vm0 = vmmov 0   ;;  %v241_v2 = vmov 0   ;;  %s298_s1 = inlined_call_operand.vmem [shape: bf16[128,128], index: 1, kind: input, shape index: {}]   ;;  %s299_s2 = inlined_call_operand.vmem [shape: f32[16,1], index: 2, kind: input, shape index: {}]   ;;  %s300_s0 = inlined_call_operand.vmem [shape: bf16[16,128], index: 0, kind: input, shape index: {}]   ;;  %s301_s3 = inlined_call_operand.vmem [shape: bf16[16,128], index: 3, kind: output, shape index: {}]  }
   0x1   :  { %206 = vmatprep.subr.bf16.mxu0 %v239_v0  ;;  %v230_v1 = vld [vmem:[%s298_s1] sm:$0xff]   ;;  %222 = vmatprep.mubr.msk.bf16.mxu0 %vm240_vm0, %v239_v0  ;;  %v231_v3 = vld [vmem:[%s298_s1 + $0x8] sm:$0xff]   ;;  %v232_v4 = vld [vmem:[%s298_s1 + $0x10] sm:$0xff]  }
   0x2   :  { %229 = vset.pattern.permute.xlu0 %v241_v2  ;;  %207 = vmatpush3.bf16.msra.mxu0 %v230_v1  ;;  %v145_v5 = vld [vmem:[%s299_s2] sm:$0xff]  ;;  %v233_v6 = vld [vmem:[%s298_s1 + $0x18] sm:$0xff]   ;;  %v146_v7 = vld [vmem:[%s299_s2 + $0x8] sm:$0xff] }
   0x3   :  { %208 = vmatprep.subr.bf16.mxu0 %v239_v0  ;;  %149 = vperm.xlu0 %229, %v145_v5   ;;  %v234_v8 = vld [vmem:[%s298_s1 + $0x20] sm:$0xff]   ;;  %v235_v9 = vld [vmem:[%s298_s1 + $0x28] sm:$0xff]   ;;  %v236_v10 = vld [vmem:[%s298_s1 + $0x30] sm:$0xff]  }
   0x4   :  { %v237_v11 = vld [vmem:[%s298_s1 + $0x38] sm:$0xff]   ;;  %v238_v12 = vld [vmem:[%s300_s0] sm:$0xff]  }
   0x6   :  { %209 = vmatpush3.bf16.msra.mxu0 %v231_v3 }
   0x7   :  { %210 = vmatprep.subr.bf16.mxu0 %v239_v0  ;;  %154 = vperm.xlu0 %229, %v146_v7  }
   0xa   :  { %211 = vmatpush3.bf16.msra.mxu0 %v232_v4 }
   0xb   :  { %212 = vmatprep.subr.bf16.mxu0 %v239_v0 }
   0xe   :  { %213 = vmatpush3.bf16.msra.mxu0 %v233_v6 }
   0xf   :  { %214 = vmatprep.subr.bf16.mxu0 %v239_v0 }
  0x12   :  { %215 = vmatpush3.bf16.msra.mxu0 %v234_v8 }
  0x13   :  { %216 = vmatprep.subr.bf16.mxu0 %v239_v0 }
  0x16   :  { %217 = vmatpush3.bf16.msra.mxu0 %v235_v9 }
  0x17   :  { %218 = vmatprep.subr.bf16.mxu0 %v239_v0 }
  0x1a   :  { %219 = vmatpush3.bf16.msra.mxu0 %v236_v10 }
  0x1b   :  { %220 = vmatprep.subr.bf16.mxu0 %v239_v0 }
  0x1e   :  { %221 = vmatpush3.bf16.msra.mxu0 %v237_v11 }
  0x21   :  { %223 = vmatmul.mubr.bf16.vlgmr.msra.gmra.mrb[0].mxu0 %v238_v12 }
  0x82   :  { %v150_v13 = vpop.permute.xlu0 %149 }
  0x86   :  { %v155_v17 = vpop.permute.xlu0 %154 }
  0xf4   :  { %v129_v14 = vpop.f32.mrb[0].mxu0 }
  0xf5   :  { %v157_v15 = vadd.f32 %v150_v13, %v129_v14  ;;  %v224_v16 = vpop.f32.mrb[1].mxu0 }
  0xf6   :  { %v132_v18 = vpop.f32.mrb[2].mxu0 }
  0xf7   :  { %v161_v19 = vmul.f32 0.1, %v157_v15  ;;  %v158_v20 = vadd.f32 %v155_v17, %v132_v18  ;;  %v225_v21 = vpop.f32.mrb[3].mxu0  ;;  %vm159_vm1 = vcmp.gt.f32.partialorder %v157_v15, 0.0 }
  0xf9   :  { %vm160_vm2 = vcmp.gt.f32.partialorder %v158_v20, 0.0  ;;  %v162_v22 = vmul.f32 0.1, %v158_v20  ;;  %v163_v23 = vsel %vm159_vm1, %v157_v15, %v161_v19 }
  0xfb   :  { %v164_v24 = vsel %vm160_vm2, %v158_v20, %v162_v22 }
  0xfc   :  { %v195_v25 = vpack.c.bf16 %v164_v24, %v163_v23 }
  0xfe   :  { %196 = vst [vmem:[%s301_s3] sm:$0xff] %v195_v25  }

// kernel: fwd.37
= control target key start
LH: loop header
LB: loop body
LE: loop exit
PB: predicated region body
PF: predicated region fallthrough
CT: control target
= control target key end

     0   :  { %v415_v1 = vmov 0   ;;  %s514_s1 = inlined_call_operand.vmem [shape: bf16[256,128], index: 1, kind: input, shape index: {}]   ;;  %s515_s0 = inlined_call_operand.vmem [shape: bf16[32,256], index: 0, kind: input, shape index: {}]   ;;  %s516_s2 = inlined_call_operand.vmem [shape: f32[32,1], index: 2, kind: input, shape index: {}]   ;;  %s517_s3 = inlined_call_operand.vmem [shape: bf16[32,128], index: 3, kind: output, shape index: {}]  }
   0x1   :  { %v393_v0 = vld [vmem:[%s514_s1 + $0x40] sm:$0xff]   ;;  %392 = vset.pattern.permute.xlu1 %v415_v1  ;;  %391 = vset.pattern.permute.xlu0 %v415_v1  ;;  %v395_v3 = vld [vmem:[%s514_s1 + $0x48] sm:$0xff]   ;;  %v397_v5 = vld [vmem:[%s514_s1 + $0x50] sm:$0xff]  }
   0x2   :  { %v394_v2 = vld [vmem:[%s514_s1] sm:$0xff]   ;;  %346 = vmatprep.subr.bf16.mxu0 %v393_v0  ;;  %374 = vmatprep.subr.bf16.mxu1 %v393_v0  ;;  %v396_v4 = vld [vmem:[%s514_s1 + $0x8] sm:$0xff]   ;;  %v398_v6 = vld [vmem:[%s514_s1 + $0x10] sm:$0xff]  }
   0x3   :  { %347 = vmatpush3.bf16.msra.mxu0 %v394_v2  ;;  %382 = vmatpush3.bf16.msra.mxu1 %v394_v2  ;;  %v399_v7 = vld [vmem:[%s514_s1 + $0x58] sm:$0xff]   ;;  %v401_v9 = vld [vmem:[%s514_s1 + $0x60] sm:$0xff]   ;;  %v403_v11 = vld [vmem:[%s514_s1 + $0x68] sm:$0xff]  }
   0x4   :  { %348 = vmatprep.subr.bf16.mxu0 %v395_v3  ;;  %375 = vmatprep.subr.bf16.mxu1 %v395_v3  ;;  %v400_v8 = vld [vmem:[%s514_s1 + $0x18] sm:$0xff]   ;;  %v402_v10 = vld [vmem:[%s514_s1 + $0x20] sm:$0xff]   ;;  %v404_v14 = vld [vmem:[%s514_s1 + $0x28] sm:$0xff]  }
   0x5   :  { %v411_v12 = vld [vmem:[%s515_s0 + $0x4] ss:$8 sps:$4 sm:$0xff]   ;;  %v414_v13 = vld [vmem:[%s515_s0 + $0x14] ss:$8 sps:$4 sm:$0xff]   ;;  %v409_v23 = vld [vmem:[%s515_s0] ss:$8 sps:$4 sm:$0xff]  }
   0x6   :  { %v245_v15 = vld [vmem:[%s516_s2 + $0x10] sm:$0xff]  ;;  %v243_v16 = vld [vmem:[%s516_s2] sm:$0xff]  ;;  %211 = vmatprep.mubr.bf16.mxu0 %v411_v12  ;;  %219 = vmatprep.mubr.bf16.mxu1 %v414_v13  ;;  %v246_v19 = vld [vmem:[%s516_s2 + $0x18] sm:$0xff] }
   0x7   :  { %349 = vmatpush3.bf16.msra.mxu0 %v396_v4  ;;  %383 = vmatpush3.bf16.msra.mxu1 %v396_v4  ;;  %v405_v17 = vld [vmem:[%s514_s1 + $0x70] sm:$0xff]   ;;  %v244_v20 = vld [vmem:[%s516_s2 + $0x8] sm:$0xff]  ;;  %v407_v21 = vld [vmem:[%s514_s1 + $0x78] sm:$0xff]  }
   0x8   :  { %350 = vmatprep.subr.bf16.mxu0 %v397_v5  ;;  %376 = vmatprep.subr.bf16.mxu1 %v397_v5  ;;  %v406_v18 = vld [vmem:[%s514_s1 + $0x30] sm:$0xff]   ;;  %v408_v22 = vld [vmem:[%s514_s1 + $0x38] sm:$0xff]  }
   0x9   :  { %259 = vperm.xlu1 %392, %v245_v15   ;;  %249 = vperm.xlu0 %391, %v243_v16   ;;  %v412_v24 = vld [vmem:[%s515_s0 + $0x10] ss:$8 sps:$4 sm:$0xff]  }
   0xb   :  { %351 = vmatpush3.bf16.msra.mxu0 %v398_v6  ;;  %384 = vmatpush3.bf16.msra.mxu1 %v398_v6 }
   0xc   :  { %352 = vmatprep.subr.bf16.mxu0 %v399_v7  ;;  %377 = vmatprep.subr.bf16.mxu1 %v399_v7 }
   0xd   :  { %264 = vperm.xlu1 %392, %v246_v19   ;;  %254 = vperm.xlu0 %391, %v244_v20  }
   0xf   :  { %353 = vmatpush3.bf16.msra.mxu0 %v400_v8  ;;  %385 = vmatpush3.bf16.msra.mxu1 %v400_v8 }
  0x10   :  { %354 = vmatprep.subr.bf16.mxu0 %v401_v9  ;;  %378 = vmatprep.subr.bf16.mxu1 %v401_v9 }
  0x13   :  { %355 = vmatpush3.bf16.msra.mxu0 %v402_v10  ;;  %386 = vmatpush3.bf16.msra.mxu1 %v402_v10 }
  0x14   :  { %356 = vmatprep.subr.bf16.mxu0 %v403_v11  ;;  %379 = vmatprep.subr.bf16.mxu1 %v403_v11 }
  0x17   :  { %357 = vmatpush3.bf16.msra.mxu0 %v404_v14  ;;  %387 = vmatpush3.bf16.msra.mxu1 %v404_v14 }
  0x18   :  { %358 = vmatprep.subr.bf16.mxu0 %v405_v17  ;;  %380 = vmatprep.subr.bf16.mxu1 %v405_v17 }
  0x1b   :  { %359 = vmatpush3.bf16.msra.mxu0 %v406_v18  ;;  %388 = vmatpush3.bf16.msra.mxu1 %v406_v18 }
  0x1c   :  { %360 = vmatprep.subr.bf16.mxu0 %v407_v21  ;;  %381 = vmatprep.subr.bf16.mxu1 %v407_v21 }
  0x1f   :  { %361 = vmatpush3.bf16.msra.mxu0 %v408_v22  ;;  %389 = vmatpush3.bf16.msra.mxu1 %v408_v22 }
  0x22   :  { %212 = vmatmul.mubr.bf16.vlgmr.msra.gmra.mrb[0].mxu0 %v409_v23  ;;  %220 = vmatmul.mubr.bf16.vlgmr.msra.gmra.mrb[0].mxu1 %v412_v24 }
  0x88   :  { %v260_v25 = vpop.permute.xlu1 %259  ;;  %v250_v26 = vpop.permute.xlu0 %249 }
  0x8c   :  { %v265_v41 = vpop.permute.xlu1 %264  ;;  %v255_v42 = vpop.permute.xlu0 %254 }
  0xf5   :  { %v362_v27 = vpop.f32.mrb[0].mxu0  ;;  %v368_v28 = vpop.f32.mrb[0].mxu1 }
  0xf6   :  { %v363_v29 = vpop.f32.mrb[1].mxu0  ;;  %v369_v30 = vpop.f32.mrb[1].mxu1 }
  0xf7   :  { %v364_v31 = vadd.f32 %v363_v29, %v362_v27  ;;  %v370_v32 = vadd.f32 %v369_v30, %v368_v28  ;;  %v365_v33 = vpop.f32.mrb[2].mxu0  ;;  %v371_v34 = vpop.f32.mrb[2].mxu1 }
  0xf8   :  { %v366_v35 = vpop.f32.mrb[3].mxu0  ;;  %v372_v36 = vpop.f32.mrb[3].mxu1 }
  0xf9   :  { %v267_v37 = vadd.f32 %v364_v31, %v250_v26  ;;  %v269_v38 = vadd.f32 %v370_v32, %v260_v25  ;;  %v367_v39 = vadd.f32 %v366_v35, %v365_v33  ;;  %v373_v40 = vadd.f32 %v372_v36, %v371_v34 }
  0xfb   :  { %v275_v43 = vmul.f32 0.1, %v267_v37  ;;  %v277_v44 = vmul.f32 0.1, %v269_v38  ;;  %v268_v45 = vadd.f32 %v367_v39, %v255_v42  ;;  %v270_v46 = vadd.f32 %v373_v40, %v265_v41 }
  0xfc   :  { %vm271_vm0 = vcmp.gt.f32.partialorder %v267_v37, 0.0  ;;  %vm273_vm1 = vcmp.gt.f32.partialorder %v269_v38, 0.0 }
  0xfd   :  { %vm272_vm2 = vcmp.gt.f32.partialorder %v268_v45, 0.0  ;;  %v276_v47 = vmul.f32 0.1, %v268_v45  ;;  %vm274_vm3 = vcmp.gt.f32.partialorder %v270_v46, 0.0  ;;  %v278_v48 = vmul.f32 0.1, %v270_v46 }
  0xfe   :  { %v279_v49 = vsel %vm271_vm0, %v267_v37, %v275_v43  ;;  %v281_v50 = vsel %vm273_vm1, %v269_v38, %v277_v44 }
  0xff   :  { %v280_v51 = vsel %vm272_vm2, %v268_v45, %v276_v47  ;;  %v282_v52 = vsel %vm274_vm3, %v270_v46, %v278_v48 }
 0x100   :  { %v338_v53 = vpack.c.bf16 %v280_v51, %v279_v49  ;;  %v343_v54 = vpack.c.bf16 %v282_v52, %v281_v50 }
 0x102   :  { %339 = vst [vmem:[%s517_s3] sm:$0xff] %v338_v53   ;;  %345 = vst [vmem:[%s517_s3 + $0x8] sm:$0xff] %v343_v54  }

// kernel: fwd.38
= control target key start
LH: loop header
LB: loop body
LE: loop exit
PB: predicated region body
PF: predicated region fallthrough
CT: control target
= control target key end

     0   :  { %s145_s0 = inlined_call_operand.vmem [shape: bf16[32,128], index: 0, kind: input, shape index: {}]   ;;  %s146_s1 = inlined_call_operand.vmem [shape: bf16[32,128], index: 1, kind: input, shape index: {}]   ;;  %s147_s2 = inlined_call_operand.vmem [shape: bf16[32,128], index: 2, kind: input, shape index: {}]   ;;  %s148_s3 = inlined_call_operand.vmem [shape: bf16[32,128], index: 3, kind: input, shape index: {}]   ;;  %s149_s4 = inlined_call_operand.vmem [shape: bf16[32,128], index: 4, kind: output, shape index: {}]  }
   0x1   :  { %v17_v0 = vld [vmem:[%s145_s0] sm:$0xf]  ;;  %v18_v1 = vld [vmem:[%s145_s0 + $0x4] sm:$0xf]  ;;  %v19_v10 = vld [vmem:[%s145_s0 + $0x8] sm:$0xf] }
   0x2   :  { %v21_v2 = vld [vmem:[%s146_s1] sm:$0xf]  ;;  %v22_v3 = vld [vmem:[%s146_s1 + $0x4] sm:$0xf]  ;;  %v20_v13 = vld [vmem:[%s145_s0 + $0xc] sm:$0xf] }
   0x3   :  { %v25_v4 = vmax.bf16 %v21_v2, %v17_v0  ;;  %v29_v5 = vld [vmem:[%s147_s2] sm:$0xf]  ;;  %v30_v6 = vld [vmem:[%s147_s2 + $0x4] sm:$0xf]  ;;  %v26_v7 = vmax.bf16 %v22_v3, %v18_v1  ;;  %v23_v14 = vld [vmem:[%s146_s1 + $0x8] sm:$0xf] }
   0x4   :  { %v33_v8 = vld [vmem:[%s148_s3] sm:$0xf]  ;;  %v34_v9 = vld [vmem:[%s148_s3 + $0x4] sm:$0xf]  ;;  %v24_v15 = vld [vmem:[%s146_s1 + $0xc] sm:$0xf]  ;;  %v27_v16 = vmax.bf16 %v23_v14, %v19_v10 }
   0x5   :  { %v37_v11 = vmax.bf16 %v33_v8, %v29_v5  ;;  %v38_v12 = vmax.bf16 %v34_v9, %v30_v6  ;;  %v28_v17 = vmax.bf16 %v24_v15, %v20_v13  ;;  %v31_v18 = vld [vmem:[%s147_s2 + $0x8] sm:$0xf]  ;;  %v32_v19 = vld [vmem:[%s147_s2 + $0xc] sm:$0xf] }
   0x6   :  { %v35_v20 = vld [vmem:[%s148_s3 + $0x8] sm:$0xf]  ;;  %v36_v23 = vld [vmem:[%s148_s3 + $0xc] sm:$0xf] }
   0x7   :  { %v41_v21 = vmax.bf16 %v37_v11, %v25_v4  ;;  %v42_v22 = vmax.bf16 %v38_v12, %v26_v7  ;;  %v39_v24 = vmax.bf16 %v35_v20, %v31_v18  ;;  %v40_v25 = vmax.bf16 %v36_v23, %v32_v19 }
   0x9   :  { %v63_v26 = vcombine.low %v41_v21, %v42_v22  ;;  %v43_v27 = vmax.bf16 %v39_v24, %v27_v16  ;;  %v44_v28 = vmax.bf16 %v40_v25, %v28_v17 }
   0xb   :  { %57 = vst [vmem:[%s149_s4] sm:$0xff] %v63_v26   ;;  %v64_v29 = vcombine.low %v43_v27, %v44_v28 }
   0xd   :  { %65 = vst [vmem:[%s149_s4 + $0x8] sm:$0xff] %v64_v29  }

// kernel: fwd.47
= control target key start
LH: loop header
LB: loop body
LE: loop exit
PB: predicated region body
PF: predicated region fallthrough
CT: control target
= control target key end

     0   :  { %v307_v1 = vmov 0   ;;  %s376_s1 = inlined_call_operand.vmem [shape: bf16[128,128], index: 1, kind: input, shape index: {}]   ;;  %s377_s0 = inlined_call_operand.vmem [shape: bf16[32,128], index: 0, kind: input, shape index: {}]   ;;  %s378_s2 = inlined_call_operand.vmem [shape: f32[32,1], index: 2, kind: input, shape index: {}]   ;;  %s379_s3 = inlined_call_operand.vmem [shape: bf16[32,128], index: 3, kind: output, shape index: {}]  }
   0x1   :  { %v297_v0 = vld [vmem:[%s376_s1] sm:$0xff]   ;;  %296 = vset.pattern.permute.xlu1 %v307_v1  ;;  %295 = vset.pattern.permute.xlu0 %v307_v1  ;;  %v298_v2 = vld [vmem:[%s376_s1 + $0x8] sm:$0xff]   ;;  %v299_v3 = vld [vmem:[%s376_s1 + $0x10] sm:$0xff]  }
   0x2   :  { %274 = vmatprep.subr.bf16.mxu0 %v297_v0  ;;  %v300_v4 = vld [vmem:[%s376_s1 + $0x18] sm:$0xff]   ;;  %v305_v5 = vld [vmem:[%s377_s0] sm:$0xff]   ;;  %v173_v6 = vld [vmem:[%s378_s2 + $0x10] sm:$0xff] }
   0x3   :  { %275 = vmatpush3.bf16.msra.mxu0 %v297_v0  ;;  %290 = vmatprep.mubr.bf16.mxu0 %v305_v5  ;;  %v171_v7 = vld [vmem:[%s378_s2] sm:$0xff]  ;;  %v174_v9 = vld [vmem:[%s378_s2 + $0x18] sm:$0xff]  ;;  %v172_v10 = vld [vmem:[%s378_s2 + $0x8] sm:$0xff] }
   0x4   :  { %276 = vmatprep.subr.bf16.mxu0 %v298_v2  ;;  %187 = vperm.xlu1 %296, %v173_v6   ;;  %v301_v8 = vld [vmem:[%s376_s1 + $0x20] sm:$0xff]   ;;  %v302_v11 = vld [vmem:[%s376_s1 + $0x28] sm:$0xff]   ;;  %v303_v12 = vld [vmem:[%s376_s1 + $0x30] sm:$0xff]  }
   0x5   :  { %177 = vperm.xlu0 %295, %v171_v7   ;;  %v304_v13 = vld [vmem:[%s376_s1 + $0x38] sm:$0xff]   ;;  %v306_v14 = vld [vmem:[%s377_s0 + $0x8] sm:$0xff]  }
   0x7   :  { %277 = vmatpush3.bf16.msra.mxu0 %v298_v2 }
   0x8   :  { %278 = vmatprep.subr.bf16.mxu0 %v299_v3  ;;  %192 = vperm.xlu1 %296, %v174_v9  }
   0x9   :  { %182 = vperm.xlu0 %295, %v172_v10  }
   0xb   :  { %279 = vmatpush3.bf16.msra.mxu0 %v299_v3 }
   0xc   :  { %280 = vmatprep.subr.bf16.mxu0 %v300_v4 }
   0xf   :  { %281 = vmatpush3.bf16.msra.mxu0 %v300_v4 }
  0x10   :  { %282 = vmatprep.subr.bf16.mxu0 %v301_v8 }
  0x13   :  { %283 = vmatpush3.bf16.msra.mxu0 %v301_v8 }
  0x14   :  { %284 = vmatprep.subr.bf16.mxu0 %v302_v11 }
  0x17   :  { %285 = vmatpush3.bf16.msra.mxu0 %v302_v11 }
  0x18   :  { %286 = vmatprep.subr.bf16.mxu0 %v303_v12 }
  0x1b   :  { %287 = vmatpush3.bf16.msra.mxu0 %v303_v12 }
  0x1c   :  { %288 = vmatprep.subr.bf16.mxu0 %v304_v13 }
  0x1f   :  { %289 = vmatpush3.bf16.msra.mxu0 %v304_v13 }
  0x22   :  { %291 = vmatmul.mubr.bf16.vlgmr.msra.gmra.mrb[0].mxu0 %v306_v14 }
  0x83   :  { %v188_v15 = vpop.permute.xlu1 %187 }
  0x84   :  { %v178_v16 = vpop.permute.xlu0 %177 }
  0x87   :  { %v193_v20 = vpop.permute.xlu1 %192 }
  0x88   :  { %v183_v23 = vpop.permute.xlu0 %182 }
  0xf5   :  { %v292_v17 = vpop.f32.mrb[0].mxu0 }
  0xf6   :  { %v197_v18 = vadd.f32 %v292_v17, %v188_v15  ;;  %v141_v19 = vpop.f32.mrb[1].mxu0 }
  0xf7   :  { %v195_v21 = vadd.f32 %v178_v16, %v141_v19  ;;  %v293_v22 = vpop.f32.mrb[2].mxu0 }
  0xf8   :  { %v205_v24 = vmul.f32 0.1, %v197_v18  ;;  %v198_v25 = vadd.f32 %v293_v22, %v193_v20  ;;  %v144_v26 = vpop.f32.mrb[3].mxu0  ;;  %vm201_vm0 = vcmp.gt.f32.partialorder %v197_v18, 0.0 }
  0xf9   :  { %v203_v27 = vmul.f32 0.1, %v195_v21  ;;  %v196_v28 = vadd.f32 %v183_v23, %v144_v26  ;;  %vm199_vm1 = vcmp.gt.f32.partialorder %v195_v21, 0.0 }
  0xfa   :  { %vm202_vm2 = vcmp.gt.f32.partialorder %v198_v25, 0.0  ;;  %v206_v29 = vmul.f32 0.1, %v198_v25  ;;  %v209_v31 = vsel %vm201_vm0, %v197_v18, %v205_v24 }
  0xfb   :  { %vm200_vm3 = vcmp.gt.f32.partialorder %v196_v28, 0.0  ;;  %v204_v30 = vmul.f32 0.1, %v196_v28  ;;  %v207_v33 = vsel %vm199_vm1, %v195_v21, %v203_v27 }
  0xfc   :  { %v210_v32 = vsel %vm202_vm2, %v198_v25, %v206_v29 }
  0xfd   :  { %v261_v34 = vpack.c.bf16 %v210_v32, %v209_v31  ;;  %v208_v35 = vsel %vm200_vm3, %v196_v28, %v204_v30 }
  0xfe   :  { %v256_v36 = vpack.c.bf16 %v208_v35, %v207_v33 }
  0xff   :  { %263 = vst [vmem:[%s379_s3 + $0x8] sm:$0xff] %v261_v34  }
 0x100   :  { %257 = vst [vmem:[%s379_s3] sm:$0xff] %v256_v36  }

// kernel: fwd.48
= control target key start
LH: loop header
LB: loop body
LE: loop exit
PB: predicated region body
PF: predicated region fallthrough
CT: control target
= control target key end

     0   :  { %v782_v1 = vmov 0   ;;  %s947_s1 = inlined_call_operand.vmem [shape: bf16[384,128], index: 1, kind: input, shape index: {}]   ;;  %s948_s0 = inlined_call_operand.vmem [shape: bf16[64,384], index: 0, kind: input, shape index: {}]   ;;  %s949_s2 = inlined_call_operand.vmem [shape: f32[64,1], index: 2, kind: input, shape index: {}]   ;;  %s950_s3 = inlined_call_operand.vmem [shape: bf16[64,128], index: 3, kind: output, shape index: {}]  }
   0x1   :  { %v742_v0 = vld [vmem:[%s947_s1 + $0x40] sm:$0xff]   ;;  %740 = vset.pattern.permute.xlu0 %v782_v1  ;;  %741 = vset.pattern.permute.xlu1 %v782_v1  ;;  %v745_v4 = vld [vmem:[%s947_s1 + $0x48] sm:$0xff]   ;;  %v748_v7 = vld [vmem:[%s947_s1 + $0x50] sm:$0xff]  }
   0x2   :  { %v743_v2 = vld [vmem:[%s947_s1] sm:$0xff]   ;;  %663 = vmatprep.subr.bf16.mxu0 %v742_v0  ;;  %v746_v5 = vld [vmem:[%s947_s1 + $0x8] sm:$0xff]   ;;  %v749_v8 = vld [vmem:[%s947_s1 + $0x10] sm:$0xff]  }
   0x3   :  { %v744_v3 = vld [vmem:[%s947_s1 + $0x80] sm:$0xff]   ;;  %664 = vmatpush3.bf16.msra.mxu0 %v743_v2  ;;  %v747_v6 = vld [vmem:[%s947_s1 + $0x88] sm:$0xff]   ;;  %v750_v9 = vld [vmem:[%s947_s1 + $0x90] sm:$0xff]  }
   0x4   :  { %715 = vmatprep.subr.bf16.mxu1 %v744_v3  ;;  %665 = vmatprep.subr.bf16.mxu0 %v745_v4  ;;  %v751_v10 = vld [vmem:[%s947_s1 + $0x58] sm:$0xff]   ;;  %v754_v13 = vld [vmem:[%s947_s1 + $0x60] sm:$0xff]   ;;  %v757_v16 = vld [vmem:[%s947_s1 + $0x68] sm:$0xff]  }
   0x5   :  { %716 = vmatpush3.bf16.msra.mxu1 %v744_v3  ;;  %v752_v11 = vld [vmem:[%s947_s1 + $0x18] sm:$0xff]   ;;  %v756_v14 = vld [vmem:[%s947_s1 + $0xa0] sm:$0xff]   ;;  %v759_v17 = vld [vmem:[%s947_s1 + $0xa8] sm:$0xff]  }
   0x6   :  { %717 = vmatprep.subr.bf16.mxu1 %v747_v6  ;;  %v753_v12 = vld [vmem:[%s947_s1 + $0x98] sm:$0xff]   ;;  %v755_v15 = vld [vmem:[%s947_s1 + $0x20] sm:$0xff]   ;;  %v758_v18 = vld [vmem:[%s947_s1 + $0x28] sm:$0xff]  }
   0x7   :  { %666 = vmatpush3.bf16.msra.mxu0 %v746_v5  ;;  %v760_v19 = vld [vmem:[%s947_s1 + $0x70] sm:$0xff]   ;;  %v763_v22 = vld [vmem:[%s947_s1 + $0x78] sm:$0xff]   ;;  %v766_v27 = vld [vmem:[%s948_s0] ss:$12 sps:$4 sm:$0xff]  }
   0x8   :  { %667 = vmatprep.subr.bf16.mxu0 %v748_v7  ;;  %v761_v20 = vld [vmem:[%s947_s1 + $0x30] sm:$0xff]   ;;  %v765_v23 = vld [vmem:[%s947_s1 + $0xb8] sm:$0xff]   ;;  %v770_v29 = vld [vmem:[%s948_s0 + $0x20] ss:$12 sps:$4 sm:$0xff]  }
   0x9   :  { %718 = vmatpush3.bf16.msra.mxu1 %v747_v6  ;;  %v762_v21 = vld [vmem:[%s947_s1 + $0xb0] sm:$0xff]   ;;  %v764_v26 = vld [vmem:[%s947_s1 + $0x38] sm:$0xff]   ;;  %v464_v31 = vld [vmem:[%s949_s2] sm:$0xff] }
   0xa   :  { %719 = vmatprep.subr.bf16.mxu1 %v750_v9  ;;  %v768_v24 = vld [vmem:[%s948_s0 + $0x4] ss:$12 sps:$4 sm:$0xff]   ;;  %v769_v25 = vld [vmem:[%s948_s0 + $0x8] ss:$12 sps:$4 sm:$0xff]   ;;  %474 = vperm.xlu0 %740, %v464_v31   ;;  %v467_v34 = vld [vmem:[%s949_s2 + $0x18] sm:$0xff] }
   0xb   :  { %668 = vmatpush3.bf16.msra.mxu0 %v749_v8  ;;  %339 = vmatprep.mubr.bf16.mxu0 %v768_v24  ;;  %v771_v28 = vld [vmem:[%s948_s0 + $0x1c] ss:$12 sps:$4 sm:$0xff]   ;;  %v777_v30 = vld [vmem:[%s948_s0 + $0x38] ss:$12 sps:$4 sm:$0xff]   ;;  %v466_v32 = vld [vmem:[%s949_s2 + $0x10] sm:$0xff] }
   0xc   :  { %669 = vmatprep.subr.bf16.mxu0 %v751_v10  ;;  %731 = vmatprep.mubr.bf16.mxu1 %v769_v25  ;;  %v465_v33 = vld [vmem:[%s949_s2 + $0x8] sm:$0xff]  ;;  %v773_v35 = vld [vmem:[%s948_s0 + $0x18] ss:$12 sps:$4 sm:$0xff]   ;;  %v774_v36 = vld [vmem:[%s948_s0 + $0x34] ss:$12 sps:$4 sm:$0xff]  }
   0xd   :  { %720 = vmatpush3.bf16.msra.mxu1 %v750_v9  ;;  %484 = vperm.xlu1 %741, %v466_v32   ;;  %v468_v37 = vld [vmem:[%s949_s2 + $0x20] sm:$0xff]  ;;  %v778_v38 = vld [vmem:[%s948_s0 + $0x50] ss:$12 sps:$4 sm:$0xff]   ;;  %v469_v39 = vld [vmem:[%s949_s2 + $0x28] sm:$0xff] }
   0xe   :  { %721 = vmatprep.subr.bf16.mxu1 %v753_v12  ;;  %479 = vperm.xlu0 %740, %v465_v33   ;;  %v470_v40 = vld [vmem:[%s949_s2 + $0x30] sm:$0xff]  ;;  %v471_v41 = vld [vmem:[%s949_s2 + $0x38] sm:$0xff] }
   0xf   :  { %670 = vmatpush3.bf16.msra.mxu0 %v752_v11  ;;  %v776_v42 = vld [vmem:[%s948_s0 + $0x30] ss:$12 sps:$4 sm:$0xff]   ;;  %v779_v43 = vld [vmem:[%s948_s0 + $0x4c] ss:$12 sps:$4 sm:$0xff]   ;;  %v781_v44 = vld [vmem:[%s948_s0 + $0x48] ss:$12 sps:$4 sm:$0xff]  }
  0x10   :  { %671 = vmatprep.subr.bf16.mxu0 %v754_v13 }
  0x11   :  { %722 = vmatpush3.bf16.msra.mxu1 %v753_v12  ;;  %489 = vperm.xlu1 %741, %v467_v34  }
  0x12   :  { %723 = vmatprep.subr.bf16.mxu1 %v756_v14  ;;  %494 = vperm.xlu0 %740, %v468_v37  }
  0x13   :  { %672 = vmatpush3.bf16.msra.mxu0 %v755_v15 }
  0x14   :  { %673 = vmatprep.subr.bf16.mxu0 %v757_v16 }
  0x15   :  { %724 = vmatpush3.bf16.msra.mxu1 %v756_v14  ;;  %499 = vperm.xlu1 %741, %v469_v39  }
  0x16   :  { %725 = vmatprep.subr.bf16.mxu1 %v759_v17  ;;  %504 = vperm.xlu0 %740, %v470_v40  }
  0x17   :  { %674 = vmatpush3.bf16.msra.mxu0 %v758_v18 }
  0x18   :  { %675 = vmatprep.subr.bf16.mxu0 %v760_v19 }
  0x19   :  { %726 = vmatpush3.bf16.msra.mxu1 %v759_v17  ;;  %509 = vperm.xlu1 %741, %v471_v41  }
  0x1a   :  { %727 = vmatprep.subr.bf16.mxu1 %v762_v21 }
  0x1b   :  { %676 = vmatpush3.bf16.msra.mxu0 %v761_v20 }
  0x1c   :  { %677 = vmatprep.subr.bf16.mxu0 %v763_v22 }
  0x1d   :  { %728 = vmatpush3.bf16.msra.mxu1 %v762_v21 }
  0x1e   :  { %729 = vmatprep.subr.bf16.mxu1 %v765_v23 }
  0x1f   :  { %678 = vmatpush3.bf16.msra.mxu0 %v764_v26 }
  0x21   :  { %730 = vmatpush3.bf16.msra.mxu1 %v765_v23 }
  0x22   :  { %340 = vmatmul.mubr.bf16.vlgmr.msra.gmra.mrb[0].mxu0 %v766_v27 }
  0x23   :  { %347 = vmatprep.mubr.bf16.mxu0 %v771_v28 }
  0x24   :  { %732 = vmatmul.mubr.bf16.vlgmr.msra.gmra.mrb[0].mxu1 %v770_v29 }
  0x25   :  { %735 = vmatprep.mubr.bf16.mxu1 %v777_v30 }
  0x2a   :  { %348 = vmatmul.mubr.bf16.gmra.mrb[4].mxu0 %v773_v35 }
  0x2b   :  { %355 = vmatprep.mubr.bf16.mxu0 %v774_v36 }
  0x2c   :  { %736 = vmatmul.mubr.bf16.gmra.mrb[4].mxu1 %v778_v38 }
  0x32   :  { %356 = vmatmul.mubr.bf16.gmra.mrb[8].mxu0 %v776_v42 }
  0x33   :  { %363 = vmatprep.mubr.bf16.mxu0 %v779_v43 }
  0x3a   :  { %364 = vmatmul.mubr.bf16.gmra.mrb[12].mxu0 %v781_v44 }
  0x89   :  { %v475_v45 = vpop.permute.xlu0 %474 }
  0x8c   :  { %v485_v63 = vpop.permute.xlu1 %484 }
  0x8d   :  { %v480_v57 = vpop.permute.xlu0 %479 }
  0x90   :  { %v490_v16 = vpop.permute.xlu1 %489 }
  0x91   :  { %v495_v30 = vpop.permute.xlu0 %494 }
  0x94   :  { %v500_v33 = vpop.permute.xlu1 %499 }
  0xf5   :  { %v679_v46 = vpop.f32.mrb[0].mxu0 }
  0xf6   :  { %v680_v47 = vpop.f32.mrb[1].mxu0 }
  0xf7   :  { %v681_v48 = vadd.f32 %v680_v47, %v679_v46  ;;  %v682_v49 = vpop.f32.mrb[2].mxu0  ;;  %v733_v50 = vpop.f32.mrb[0].mxu1 }
  0xf8   :  { %v683_v51 = vpop.f32.mrb[3].mxu0  ;;  %v406_v52 = vpop.f32.mrb[1].mxu1 }
  0xf9   :  { %v684_v53 = vadd.f32 %v683_v51, %v682_v49  ;;  %v407_v54 = vadd.f32 %v681_v48, %v406_v52  ;;  %v734_v55 = vpop.f32.mrb[2].mxu1  ;;  %v505_v46 = vpop.permute.xlu0 %504 }
  0xfa   :  { %v409_v56 = vpop.f32.mrb[3].mxu1 }
  0xfb   :  { %v512_v58 = vadd.f32 %v475_v45, %v407_v54  ;;  %v410_v59 = vadd.f32 %v684_v53, %v409_v56 }
  0xfd   :  { %v528_v60 = vmul.f32 0.1, %v512_v58  ;;  %v513_v61 = vadd.f32 %v480_v57, %v410_v59  ;;  %v685_v62 = vpop.f32.mrb[4].mxu0  ;;  %vm520_vm0 = vcmp.gt.f32.partialorder %v512_v58, 0.0 }
  0xfe   :  { %v686_v0 = vpop.f32.mrb[5].mxu0 }
  0xff   :  { %vm521_vm1 = vcmp.gt.f32.partialorder %v513_v61, 0.0  ;;  %v529_v1 = vmul.f32 0.1, %v513_v61  ;;  %v687_v2 = vadd.f32 %v686_v0, %v685_v62  ;;  %v688_v3 = vpop.f32.mrb[6].mxu0  ;;  %v737_v4 = vpop.f32.mrb[4].mxu1  ;;  %v536_v7 = vsel %vm520_vm0, %v512_v58, %v528_v60 }
 0x100   :  { %v689_v5 = vpop.f32.mrb[7].mxu0  ;;  %v422_v6 = vpop.f32.mrb[5].mxu1 }
 0x101   :  { %v537_v8 = vsel %vm521_vm1, %v513_v61, %v529_v1  ;;  %v415_v9 = vadd.f32 %v733_v50, %v687_v2  ;;  %v690_v10 = vadd.f32 %v689_v5, %v688_v3  ;;  %v738_v11 = vpop.f32.mrb[6].mxu1  ;;  %v510_v50 = vpop.permute.xlu1 %509 }
 0x102   :  { %v643_v12 = vpack.c.bf16 %v537_v8, %v536_v7  ;;  %v425_v13 = vpop.f32.mrb[7].mxu1 }
 0x103   :  { %v514_v14 = vadd.f32 %v485_v63, %v415_v9  ;;  %v418_v15 = vadd.f32 %v734_v55, %v690_v10 }
 0x104   :  { %644 = vst [vmem:[%s950_s3] sm:$0xff] %v643_v12  }
 0x105   :  { %v530_v17 = vmul.f32 0.1, %v514_v14  ;;  %v515_v18 = vadd.f32 %v490_v16, %v418_v15  ;;  %v691_v19 = vpop.f32.mrb[8].mxu0  ;;  %vm522_vm2 = vcmp.gt.f32.partialorder %v514_v14, 0.0 }
 0x106   :  { %v692_v20 = vpop.f32.mrb[9].mxu0 }
 0x107   :  { %vm523_vm3 = vcmp.gt.f32.partialorder %v515_v18, 0.0  ;;  %v531_v21 = vmul.f32 0.1, %v515_v18  ;;  %v693_v22 = vadd.f32 %v692_v20, %v691_v19  ;;  %v694_v23 = vpop.f32.mrb[10].mxu0  ;;  %v538_v25 = vsel %vm522_vm2, %v514_v14, %v530_v17 }
 0x108   :  { %v695_v24 = vpop.f32.mrb[11].mxu0 }
 0x109   :  { %v539_v26 = vsel %vm523_vm3, %v515_v18, %v531_v21  ;;  %v696_v27 = vadd.f32 %v695_v24, %v694_v23  ;;  %v423_v28 = vadd.f32 %v693_v22, %v422_v6 }
 0x10a   :  { %v648_v29 = vpack.c.bf16 %v539_v26, %v538_v25 }
 0x10b   :  { %v516_v31 = vadd.f32 %v495_v30, %v423_v28  ;;  %v426_v32 = vadd.f32 %v696_v27, %v425_v13 }
 0x10c   :  { %660 = vst [vmem:[%s950_s3 + $0x8] sm:$0xff] %v648_v29  }
 0x10d   :  { %v532_v34 = vmul.f32 0.1, %v516_v31  ;;  %v517_v35 = vadd.f32 %v500_v33, %v426_v32  ;;  %v697_v36 = vpop.f32.mrb[12].mxu0  ;;  %vm524_vm4 = vcmp.gt.f32.partialorder %v516_v31, 0.0 }
 0x10e   :  { %v698_v37 = vpop.f32.mrb[13].mxu0 }
 0x10f   :  { %vm525_vm5 = vcmp.gt.f32.partialorder %v517_v35, 0.0  ;;  %v533_v38 = vmul.f32 0.1, %v517_v35  ;;  %v699_v39 = vadd.f32 %v698_v37, %v697_v36  ;;  %v700_v40 = vpop.f32.mrb[14].mxu0  ;;  %v540_v42 = vsel %vm524_vm4, %v516_v31, %v532_v34 }
 0x110   :  { %v701_v41 = vpop.f32.mrb[15].mxu0 }
 0x111   :  { %v541_v43 = vsel %vm525_vm5, %v517_v35, %v533_v38  ;;  %v431_v44 = vadd.f32 %v737_v4, %v699_v39  ;;  %v702_v45 = vadd.f32 %v701_v41, %v700_v40 }
 0x112   :  { %v653_v47 = vpack.c.bf16 %v541_v43, %v540_v42 }
 0x113   :  { %v518_v48 = vadd.f32 %v505_v46, %v431_v44  ;;  %v434_v49 = vadd.f32 %v738_v11, %v702_v45 }
 0x114   :  { %661 = vst [vmem:[%s950_s3 + $0x10] sm:$0xff] %v653_v47  }
 0x115   :  { %v534_v51 = vmul.f32 0.1, %v518_v48  ;;  %v519_v52 = vadd.f32 %v510_v50, %v434_v49  ;;  %vm526_vm6 = vcmp.gt.f32.partialorder %v518_v48, 0.0 }
 0x117   :  { %vm527_vm7 = vcmp.gt.f32.partialorder %v519_v52, 0.0  ;;  %v535_v53 = vmul.f32 0.1, %v519_v52  ;;  %v542_v54 = vsel %vm526_vm6, %v518_v48, %v534_v51 }
 0x119   :  { %v543_v55 = vsel %vm527_vm7, %v519_v52, %v535_v53 }
 0x11a   :  { %v658_v56 = vpack.c.bf16 %v543_v55, %v542_v54 }
 0x11c   :  { %662 = vst [vmem:[%s950_s3 + $0x18] sm:$0xff] %v658_v56  }

// kernel: fwd.49
= control target key start
LH: loop header
LB: loop body
LE: loop exit
PB: predicated region body
PF: predicated region fallthrough
CT: control target
= control target key end

     0   :  { %s245_s0 = inlined_call_operand.vmem [shape: bf16[64,128], index: 0, kind: input, shape index: {}]   ;;  %s246_s1 = inlined_call_operand.vmem [shape: bf16[64,128], index: 1, kind: input, shape index: {}]   ;;  %s247_s2 = inlined_call_operand.vmem [shape: bf16[64,128], index: 2, kind: input, shape index: {}]   ;;  %s248_s3 = inlined_call_operand.vmem [shape: bf16[64,128], index: 3, kind: input, shape index: {}]   ;;  %s249_s4 = inlined_call_operand.vmem [shape: bf16[64,128], index: 4, kind: output, shape index: {}]  }
   0x1   :  { %v17_v0 = vld [vmem:[%s245_s0] sm:$0xf]  ;;  %v18_v1 = vld [vmem:[%s245_s0 + $0x4] sm:$0xf]  ;;  %v19_v10 = vld [vmem:[%s245_s0 + $0x8] sm:$0xf] }
   0x2   :  { %v25_v2 = vld [vmem:[%s246_s1] sm:$0xf]  ;;  %v26_v3 = vld [vmem:[%s246_s1 + $0x4] sm:$0xf]  ;;  %v20_v13 = vld [vmem:[%s245_s0 + $0xc] sm:$0xf] }
   0x3   :  { %v33_v4 = vmax.bf16 %v25_v2, %v17_v0  ;;  %v41_v5 = vld [vmem:[%s247_s2] sm:$0xf]  ;;  %v42_v6 = vld [vmem:[%s247_s2 + $0x4] sm:$0xf]  ;;  %v34_v7 = vmax.bf16 %v26_v3, %v18_v1  ;;  %v27_v14 = vld [vmem:[%s246_s1 + $0x8] sm:$0xf] }
   0x4   :  { %v49_v8 = vld [vmem:[%s248_s3] sm:$0xf]  ;;  %v50_v9 = vld [vmem:[%s248_s3 + $0x4] sm:$0xf]  ;;  %v28_v15 = vld [vmem:[%s246_s1 + $0xc] sm:$0xf]  ;;  %v35_v16 = vmax.bf16 %v27_v14, %v19_v10 }
   0x5   :  { %v57_v11 = vmax.bf16 %v49_v8, %v41_v5  ;;  %v58_v12 = vmax.bf16 %v50_v9, %v42_v6  ;;  %v36_v17 = vmax.bf16 %v28_v15, %v20_v13  ;;  %v43_v18 = vld [vmem:[%s247_s2 + $0x8] sm:$0xf]  ;;  %v44_v19 = vld [vmem:[%s247_s2 + $0xc] sm:$0xf]  ;;  %v21_v25 = vld [vmem:[%s245_s0 + $0x10] sm:$0xf] }
   0x6   :  { %v51_v20 = vld [vmem:[%s248_s3 + $0x8] sm:$0xf]  ;;  %v52_v23 = vld [vmem:[%s248_s3 + $0xc] sm:$0xf]  ;;  %v22_v26 = vld [vmem:[%s245_s0 + $0x14] sm:$0xf] }
   0x7   :  { %v65_v21 = vmax.bf16 %v57_v11, %v33_v4  ;;  %v66_v22 = vmax.bf16 %v58_v12, %v34_v7  ;;  %v59_v24 = vmax.bf16 %v51_v20, %v43_v18  ;;  %v60_v27 = vmax.bf16 %v52_v23, %v44_v19  ;;  %v29_v28 = vld [vmem:[%s246_s1 + $0x10] sm:$0xf]  ;;  %v30_v29 = vld [vmem:[%s246_s1 + $0x14] sm:$0xf]  ;;  %v23_v41 = vld [vmem:[%s245_s0 + $0x18] sm:$0xf] }
   0x8   :  { %v45_v30 = vld [vmem:[%s247_s2 + $0x10] sm:$0xf]  ;;  %v37_v33 = vmax.bf16 %v29_v28, %v21_v25  ;;  %v38_v34 = vmax.bf16 %v30_v29, %v22_v26  ;;  %v46_v35 = vld [vmem:[%s247_s2 + $0x14] sm:$0xf]  ;;  %v24_v42 = vld [vmem:[%s245_s0 + $0x1c] sm:$0xf] }
   0x9   :  { %v105_v31 = vcombine.low %v65_v21, %v66_v22  ;;  %v67_v32 = vmax.bf16 %v59_v24, %v35_v16  ;;  %v53_v36 = vld [vmem:[%s248_s3 + $0x10] sm:$0xf]  ;;  %v54_v37 = vld [vmem:[%s248_s3 + $0x14] sm:$0xf]  ;;  %v68_v38 = vmax.bf16 %v60_v27, %v36_v17  ;;  %v31_v43 = vld [vmem:[%s246_s1 + $0x18] sm:$0xf] }
   0xa   :  { %v61_v39 = vmax.bf16 %v53_v36, %v45_v30  ;;  %v62_v40 = vmax.bf16 %v54_v37, %v46_v35  ;;  %v32_v44 = vld [vmem:[%s246_s1 + $0x1c] sm:$0xf]  ;;  %v39_v45 = vmax.bf16 %v31_v43, %v23_v41  ;;  %v47_v46 = vld [vmem:[%s247_s2 + $0x18] sm:$0xf] }
   0xb   :  { %89 = vst [vmem:[%s249_s4] sm:$0xff] %v105_v31   ;;  %v48_v47 = vld [vmem:[%s247_s2 + $0x1c] sm:$0xf]  ;;  %v106_v48 = vcombine.low %v67_v32, %v68_v38  ;;  %v40_v51 = vmax.bf16 %v32_v44, %v24_v42  ;;  %v55_v52 = vld [vmem:[%s248_s3 + $0x18] sm:$0xf] }
   0xc   :  { %v69_v49 = vmax.bf16 %v61_v39, %v37_v33  ;;  %v70_v50 = vmax.bf16 %v62_v40, %v38_v34  ;;  %v56_v53 = vld [vmem:[%s248_s3 + $0x1c] sm:$0xf]  ;;  %v63_v54 = vmax.bf16 %v55_v52, %v47_v46 }
   0xd   :  { %v64_v55 = vmax.bf16 %v56_v53, %v48_v47  ;;  %107 = vst [vmem:[%s249_s4 + $0x8] sm:$0xff] %v106_v48  }
   0xe   :  { %v108_v56 = vcombine.low %v69_v49, %v70_v50  ;;  %v71_v57 = vmax.bf16 %v63_v54, %v39_v45 }
   0xf   :  { %v72_v58 = vmax.bf16 %v64_v55, %v40_v51 }
  0x10   :  { %109 = vst [vmem:[%s249_s4 + $0x10] sm:$0xff] %v108_v56  }
  0x11   :  { %v110_v59 = vcombine.low %v71_v57, %v72_v58 }
  0x13   :  { %111 = vst [vmem:[%s249_s4 + $0x18] sm:$0xff] %v110_v59  }

// kernel: fwd.54
= control target key start
LH: loop header
LB: loop body
LE: loop exit
PB: predicated region body
PF: predicated region fallthrough
CT: control target
= control target key end

     0   :  { %v1131_v1 = vmov 0   ;;  %s1375_s1 = inlined_call_operand.vmem [shape: bf16[640,128], index: 1, kind: input, shape index: {}]   ;;  %s1376_s0 = inlined_call_operand.vmem [shape: bf16[64,640], index: 0, kind: input, shape index: {}]   ;;  %s1377_s2 = inlined_call_operand.vmem [shape: f32[64,1], index: 2, kind: input, shape index: {}]   ;;  %s1378_s3 = inlined_call_operand.vmem [shape: bf16[64,128], index: 3, kind: output, shape index: {}]  }
   0x1   :  { %v1063_v0 = vld [vmem:[%s1375_s1 + $0x40] sm:$0xff]   ;;  %1062 = vset.pattern.permute.xlu1 %v1131_v1  ;;  %1061 = vset.pattern.permute.xlu0 %v1131_v1  ;;  %v1067_v5 = vld [vmem:[%s1375_s1 + $0x48] sm:$0xff]   ;;  %v1071_v9 = vld [vmem:[%s1375_s1 + $0x50] sm:$0xff]  }
   0x2   :  { %v1064_v2 = vld [vmem:[%s1375_s1 + $0xc0] sm:$0xff]   ;;  %928 = vmatprep.subr.bf16.mxu0 %v1063_v0  ;;  %v1068_v6 = vld [vmem:[%s1375_s1 + $0xc8] sm:$0xff]   ;;  %v1072_v10 = vld [vmem:[%s1375_s1 + $0xd0] sm:$0xff]  }
   0x3   :  { %v1065_v3 = vld [vmem:[%s1375_s1] sm:$0xff]   ;;  %968 = vmatprep.subr.bf16.mxu1 %v1064_v2  ;;  %v1069_v7 = vld [vmem:[%s1375_s1 + $0x8] sm:$0xff]   ;;  %v1073_v11 = vld [vmem:[%s1375_s1 + $0x10] sm:$0xff]  }
   0x4   :  { %v1066_v4 = vld [vmem:[%s1375_s1 + $0x80] sm:$0xff]   ;;  %929 = vmatpush3.bf16.msra.mxu0 %v1065_v3  ;;  %v1070_v8 = vld [vmem:[%s1375_s1 + $0x88] sm:$0xff]   ;;  %v1074_v12 = vld [vmem:[%s1375_s1 + $0x90] sm:$0xff]  }
   0x5   :  { %969 = vmatpush3.bf16.msra.mxu1 %v1066_v4  ;;  %930 = vmatprep.subr.bf16.mxu0 %v1067_v5  ;;  %v1075_v13 = vld [vmem:[%s1375_s1 + $0x58] sm:$0xff]   ;;  %v1079_v17 = vld [vmem:[%s1375_s1 + $0x60] sm:$0xff]   ;;  %v1083_v21 = vld [vmem:[%s1375_s1 + $0x68] sm:$0xff]  }
   0x6   :  { %970 = vmatprep.subr.bf16.mxu1 %v1068_v6  ;;  %v1076_v14 = vld [vmem:[%s1375_s1 + $0xd8] sm:$0xff]   ;;  %v1080_v18 = vld [vmem:[%s1375_s1 + $0xe0] sm:$0xff]   ;;  %v1084_v22 = vld [vmem:[%s1375_s1 + $0xe8] sm:$0xff]  }
   0x7   :  { %v1077_v15 = vld [vmem:[%s1375_s1 + $0x18] sm:$0xff]   ;;  %v1081_v19 = vld [vmem:[%s1375_s1 + $0x20] sm:$0xff]   ;;  %v1085_v23 = vld [vmem:[%s1375_s1 + $0x28] sm:$0xff]  }
   0x8   :  { %931 = vmatpush3.bf16.msra.mxu0 %v1069_v7  ;;  %v1078_v16 = vld [vmem:[%s1375_s1 + $0x98] sm:$0xff]   ;;  %v1082_v20 = vld [vmem:[%s1375_s1 + $0xa0] sm:$0xff]   ;;  %v1086_v24 = vld [vmem:[%s1375_s1 + $0xa8] sm:$0xff]  }
   0x9   :  { %971 = vmatpush3.bf16.msra.mxu1 %v1070_v8  ;;  %932 = vmatprep.subr.bf16.mxu0 %v1071_v9  ;;  %v1087_v25 = vld [vmem:[%s1375_s1 + $0x70] sm:$0xff]   ;;  %v1091_v29 = vld [vmem:[%s1375_s1 + $0x78] sm:$0xff]   ;;  %v1100_v36 = vld [vmem:[%s1376_s0 + $0xc] ss:$20 sps:$4 sm:$0xff]  }
   0xa   :  { %972 = vmatprep.subr.bf16.mxu1 %v1072_v10  ;;  %v1088_v26 = vld [vmem:[%s1375_s1 + $0xf0] sm:$0xff]   ;;  %v1092_v30 = vld [vmem:[%s1375_s1 + $0xf8] sm:$0xff]   ;;  %v1101_v37 = vld [vmem:[%s1375_s1 + $0x100] sm:$0xff]   ;;  %580 = vmatprep.mubr.bf16.mxu1 %v1100_v36 }
   0xb   :  { %v1089_v27 = vld [vmem:[%s1375_s1 + $0x30] sm:$0xff]   ;;  %v1093_v31 = vld [vmem:[%s1375_s1 + $0x38] sm:$0xff]   ;;  %v1102_v38 = vld [vmem:[%s1375_s1 + $0x108] sm:$0xff]  }
   0xc   :  { %933 = vmatpush3.bf16.msra.mxu0 %v1073_v11  ;;  %v1090_v28 = vld [vmem:[%s1375_s1 + $0xb0] sm:$0xff]   ;;  %v1094_v32 = vld [vmem:[%s1375_s1 + $0xb8] sm:$0xff]   ;;  %v1103_v39 = vld [vmem:[%s1376_s0 + $0x2c] ss:$20 sps:$4 sm:$0xff]  }
   0xd   :  { %973 = vmatpush3.bf16.msra.mxu1 %v1074_v12  ;;  %934 = vmatprep.subr.bf16.mxu0 %v1075_v13  ;;  %v1095_v33 = vld [vmem:[%s1376_s0] ss:$20 sps:$4 sm:$0xff]   ;;  %v1097_v34 = vld [vmem:[%s1376_s0 + $0x4] ss:$20 sps:$4 sm:$0xff]   ;;  %v1098_v35 = vld [vmem:[%s1376_s0 + $0x8] ss:$20 sps:$4 sm:$0xff]  }
   0xe   :  { %974 = vmatprep.subr.bf16.mxu1 %v1076_v14  ;;  %515 = vmatprep.mubr.bf16.mxu0 %v1097_v34  ;;  %v1105_v40 = vld [vmem:[%s1376_s0 + $0x34] ss:$20 sps:$4 sm:$0xff]   ;;  %v1108_v43 = vld [vmem:[%s1376_s0 + $0x30] ss:$20 sps:$4 sm:$0xff]   ;;  %v1110_v45 = vld [vmem:[%s1375_s1 + $0x118] sm:$0xff]  }
   0xf   :  { %v1107_v41 = vld [vmem:[%s1376_s0 + $0x28] ss:$20 sps:$4 sm:$0xff]   ;;  %v1109_v42 = vld [vmem:[%s1375_s1 + $0x110] sm:$0xff]   ;;  %v1117_v47 = vld [vmem:[%s1375_s1 + $0x120] sm:$0xff]  }
  0x10   :  { %935 = vmatpush3.bf16.msra.mxu0 %v1077_v15  ;;  %v1111_v44 = vld [vmem:[%s1376_s0 + $0x54] ss:$20 sps:$4 sm:$0xff]   ;;  %v1113_v46 = vld [vmem:[%s1376_s0 + $0x5c] ss:$20 sps:$4 sm:$0xff]   ;;  %v1116_v49 = vld [vmem:[%s1376_s0 + $0x58] ss:$20 sps:$4 sm:$0xff]  }
  0x11   :  { %975 = vmatpush3.bf16.msra.mxu1 %v1078_v16  ;;  %936 = vmatprep.subr.bf16.mxu0 %v1079_v17  ;;  %v1115_v48 = vld [vmem:[%s1376_s0 + $0x50] ss:$20 sps:$4 sm:$0xff]   ;;  %v1118_v52 = vld [vmem:[%s1375_s1 + $0x128] sm:$0xff]   ;;  %v1124_v57 = vld [vmem:[%s1376_s0 + $0x80] ss:$20 sps:$4 sm:$0xff]  }
  0x12   :  { %976 = vmatprep.subr.bf16.mxu1 %v1080_v18  ;;  %v1119_v50 = vld [vmem:[%s1376_s0 + $0x7c] ss:$20 sps:$4 sm:$0xff]   ;;  %v1121_v51 = vld [vmem:[%s1376_s0 + $0x84] ss:$20 sps:$4 sm:$0xff]   ;;  %v1128_v59 = vld [vmem:[%s1376_s0 + $0x60] ss:$20 sps:$4 sm:$0xff]  }
  0x13   :  { %v707_v53 = vld [vmem:[%s1377_s2 + $0x10] sm:$0xff]  ;;  %v705_v55 = vld [vmem:[%s1377_s2] sm:$0xff]  ;;  %v1123_v56 = vld [vmem:[%s1376_s0 + $0x78] ss:$20 sps:$4 sm:$0xff]  }
  0x14   :  { %937 = vmatpush3.bf16.msra.mxu0 %v1081_v19  ;;  %v1125_v54 = vld [vmem:[%s1375_s1 + $0x130] sm:$0xff]   ;;  %725 = vperm.xlu1 %1062, %v707_v53   ;;  %v1126_v60 = vld [vmem:[%s1375_s1 + $0x138] sm:$0xff]   ;;  %v706_v62 = vld [vmem:[%s1377_s2 + $0x8] sm:$0xff] }
  0x15   :  { %977 = vmatpush3.bf16.msra.mxu1 %v1082_v20  ;;  %938 = vmatprep.subr.bf16.mxu0 %v1083_v21  ;;  %v1127_v58 = vld [vmem:[%s1376_s0 + $0x10] ss:$20 sps:$4 sm:$0xff]   ;;  %v708_v61 = vld [vmem:[%s1377_s2 + $0x18] sm:$0xff]  ;;  %v710_v0 = vld [vmem:[%s1377_s2 + $0x28] sm:$0xff] }
  0x16   :  { %978 = vmatprep.subr.bf16.mxu1 %v1084_v22  ;;  %715 = vperm.xlu0 %1061, %v705_v55   ;;  %v1129_v63 = vld [vmem:[%s1376_s0 + $0x38] ss:$20 sps:$4 sm:$0xff]   ;;  %v1130_v1 = vld [vmem:[%s1376_s0 + $0x88] ss:$20 sps:$4 sm:$0xff]   ;;  %v709_v2 = vld [vmem:[%s1377_s2 + $0x20] sm:$0xff] }
  0x17   :  { %v712_v3 = vld [vmem:[%s1377_s2 + $0x38] sm:$0xff]  ;;  %v711_v4 = vld [vmem:[%s1377_s2 + $0x30] sm:$0xff] }
  0x18   :  { %939 = vmatpush3.bf16.msra.mxu0 %v1085_v23  ;;  %730 = vperm.xlu1 %1062, %v708_v61  }
  0x19   :  { %979 = vmatpush3.bf16.msra.mxu1 %v1086_v24  ;;  %940 = vmatprep.subr.bf16.mxu0 %v1087_v25 }
  0x1a   :  { %980 = vmatprep.subr.bf16.mxu1 %v1088_v26  ;;  %720 = vperm.xlu0 %1061, %v706_v62  }
  0x1c   :  { %941 = vmatpush3.bf16.msra.mxu0 %v1089_v27  ;;  %740 = vperm.xlu1 %1062, %v710_v0  }
  0x1d   :  { %981 = vmatpush3.bf16.msra.mxu1 %v1090_v28  ;;  %942 = vmatprep.subr.bf16.mxu0 %v1091_v29 }
  0x1e   :  { %982 = vmatprep.subr.bf16.mxu1 %v1092_v30  ;;  %735 = vperm.xlu0 %1061, %v709_v2  }
  0x20   :  { %943 = vmatpush3.bf16.msra.mxu0 %v1093_v31  ;;  %750 = vperm.xlu1 %1062, %v712_v3  }
  0x21   :  { %983 = vmatpush3.bf16.msra.mxu1 %v1094_v32  ;;  %1020 = vmatprep.subr.bf16.mxu0 %v1101_v37 }
  0x22   :  { %1044 = vmatprep.subr.bf16.mxu1 %v1101_v37  ;;  %745 = vperm.xlu0 %1061, %v711_v4  }
  0x23   :  { %516 = vmatmul.mubr.bf16.vlgmr.msra.gmra.mrb[0].mxu0 %v1095_v33 }
  0x24   :  { %581 = vmatmul.mubr.bf16.vlgmr.msra.gmra.mrb[0].mxu1 %v1098_v35  ;;  %1021 = vmatpush3.bf16.msra.mxu0 %v1101_v37 }
  0x25   :  { %1052 = vmatpush3.bf16.msra.mxu1 %v1101_v37  ;;  %1022 = vmatprep.subr.bf16.mxu0 %v1102_v38 }
  0x26   :  { %1045 = vmatprep.subr.bf16.mxu1 %v1102_v38  ;;  %523 = vmatprep.mubr.bf16.mxu0 %v1103_v39 }
  0x27   :  { %588 = vmatprep.mubr.bf16.mxu1 %v1105_v40 }
  0x28   :  { %1023 = vmatpush3.bf16.msra.mxu0 %v1102_v38 }
  0x29   :  { %1053 = vmatpush3.bf16.msra.mxu1 %v1102_v38  ;;  %1024 = vmatprep.subr.bf16.mxu0 %v1109_v42 }
  0x2a   :  { %1046 = vmatprep.subr.bf16.mxu1 %v1109_v42 }
  0x2b   :  { %524 = vmatmul.mubr.bf16.gmra.mrb[4].mxu0 %v1107_v41 }
  0x2c   :  { %589 = vmatmul.mubr.bf16.gmra.mrb[4].mxu1 %v1108_v43  ;;  %531 = vmatprep.mubr.bf16.mxu0 %v1111_v44 }
  0x2d   :  { %1025 = vmatpush3.bf16.msra.mxu0 %v1109_v42  ;;  %596 = vmatprep.mubr.bf16.mxu1 %v1113_v46 }
  0x2e   :  { %1054 = vmatpush3.bf16.msra.mxu1 %v1109_v42  ;;  %1026 = vmatprep.subr.bf16.mxu0 %v1110_v45 }
  0x2f   :  { %1047 = vmatprep.subr.bf16.mxu1 %v1110_v45 }
  0x31   :  { %1027 = vmatpush3.bf16.msra.mxu0 %v1110_v45 }
  0x32   :  { %1055 = vmatpush3.bf16.msra.mxu1 %v1110_v45  ;;  %1028 = vmatprep.subr.bf16.mxu0 %v1117_v47 }
  0x33   :  { %532 = vmatmul.mubr.bf16.gmra.mrb[8].mxu0 %v1115_v48  ;;  %1048 = vmatprep.subr.bf16.mxu1 %v1117_v47 }
  0x34   :  { %597 = vmatmul.mubr.bf16.gmra.mrb[8].mxu1 %v1116_v49  ;;  %539 = vmatprep.mubr.bf16.mxu0 %v1119_v50 }
  0x35   :  { %1029 = vmatpush3.bf16.msra.mxu0 %v1117_v47  ;;  %604 = vmatprep.mubr.bf16.mxu1 %v1121_v51 }
  0x36   :  { %1056 = vmatpush3.bf16.msra.mxu1 %v1117_v47  ;;  %1030 = vmatprep.subr.bf16.mxu0 %v1118_v52 }
  0x37   :  { %1049 = vmatprep.subr.bf16.mxu1 %v1118_v52 }
  0x39   :  { %1031 = vmatpush3.bf16.msra.mxu0 %v1118_v52 }
  0x3a   :  { %1057 = vmatpush3.bf16.msra.mxu1 %v1118_v52  ;;  %1032 = vmatprep.subr.bf16.mxu0 %v1125_v54 }
  0x3b   :  { %540 = vmatmul.mubr.bf16.gmra.mrb[12].mxu0 %v1123_v56  ;;  %1050 = vmatprep.subr.bf16.mxu1 %v1125_v54 }
  0x3c   :  { %605 = vmatmul.mubr.bf16.gmra.mrb[12].mxu1 %v1124_v57  ;;  %1036 = vmatprep.mubr.bf16.mxu0 %v1127_v58 }
  0x3d   :  { %1033 = vmatpush3.bf16.msra.mxu0 %v1125_v54  ;;  %1040 = vmatprep.mubr.bf16.mxu1 %v1128_v59 }
  0x3e   :  { %1058 = vmatpush3.bf16.msra.mxu1 %v1125_v54  ;;  %1034 = vmatprep.subr.bf16.mxu0 %v1126_v60 }
  0x3f   :  { %1051 = vmatprep.subr.bf16.mxu1 %v1126_v60 }
  0x41   :  { %1035 = vmatpush3.bf16.msra.mxu0 %v1126_v60 }
  0x42   :  { %1059 = vmatpush3.bf16.msra.mxu1 %v1126_v60 }
  0x44   :  { %1037 = vmatmul.mubr.bf16.vlgmr.msra.gmra.mrb[16].mxu0 %v1129_v63 }
  0x45   :  { %1041 = vmatmul.mubr.bf16.vlgmr.msra.gmra.mrb[16].mxu1 %v1130_v1 }
  0x93   :  { %v726_v33 = vpop.permute.xlu1 %725 }
  0x95   :  { %v716_v20 = vpop.permute.xlu0 %715 }
  0x97   :  { %v731_v49 = vpop.permute.xlu1 %730 }
  0x99   :  { %v1358_v36 = vpop.permute.xlu0 %720 }
  0x9b   :  { %v741_v2 = vpop.permute.xlu1 %740 }
  0x9d   :  { %v736_v51 = vpop.permute.xlu0 %735 }
  0xa1   :  { %v746_v3 = vpop.permute.xlu0 %745 }
  0xf6   :  { %v944_v5 = vpop.f32.mrb[0].mxu0 }
  0xf7   :  { %v984_v6 = vpop.f32.mrb[0].mxu1  ;;  %v945_v7 = vpop.f32.mrb[1].mxu0 }
  0xf8   :  { %v946_v8 = vadd.f32 %v945_v7, %v944_v5  ;;  %v985_v9 = vpop.f32.mrb[1].mxu1  ;;  %v947_v10 = vpop.f32.mrb[2].mxu0 }
  0xf9   :  { %v986_v11 = vadd.f32 %v985_v9, %v984_v6  ;;  %v987_v12 = vpop.f32.mrb[2].mxu1  ;;  %v948_v13 = vpop.f32.mrb[3].mxu0 }
  0xfa   :  { %v949_v14 = vadd.f32 %v948_v13, %v947_v10  ;;  %v988_v15 = vpop.f32.mrb[3].mxu1 }
  0xfb   :  { %v989_v16 = vadd.f32 %v988_v15, %v987_v12  ;;  %v583_v17 = vadd.f32 %v986_v11, %v946_v8 }
  0xfd   :  { %v1356_v18 = vadd.f32 %v989_v16, %v949_v14 }
  0xfe   :  { %v950_v19 = vpop.f32.mrb[4].mxu0 }
  0xff   :  { %v990_v21 = vpop.f32.mrb[4].mxu1  ;;  %v951_v22 = vpop.f32.mrb[5].mxu0 }
 0x100   :  { %v952_v23 = vadd.f32 %v951_v22, %v950_v19  ;;  %v991_v24 = vpop.f32.mrb[5].mxu1  ;;  %v953_v25 = vpop.f32.mrb[6].mxu0 }
 0x101   :  { %v992_v26 = vadd.f32 %v991_v24, %v990_v21  ;;  %v993_v27 = vpop.f32.mrb[6].mxu1  ;;  %v954_v28 = vpop.f32.mrb[7].mxu0 }
 0x102   :  { %v955_v29 = vadd.f32 %v954_v28, %v953_v25  ;;  %v994_v30 = vpop.f32.mrb[7].mxu1  ;;  %v751_v28 = vpop.permute.xlu1 %750 }
 0x103   :  { %v995_v31 = vadd.f32 %v994_v30, %v993_v27  ;;  %v591_v32 = vadd.f32 %v992_v26, %v952_v23 }
 0x105   :  { %v594_v34 = vadd.f32 %v995_v31, %v955_v29 }
 0x106   :  { %v956_v35 = vpop.f32.mrb[8].mxu0 }
 0x107   :  { %v996_v37 = vpop.f32.mrb[8].mxu1  ;;  %v957_v38 = vpop.f32.mrb[9].mxu0 }
 0x108   :  { %v958_v39 = vadd.f32 %v957_v38, %v956_v35  ;;  %v997_v40 = vpop.f32.mrb[9].mxu1  ;;  %v959_v41 = vpop.f32.mrb[10].mxu0 }
 0x109   :  { %v998_v42 = vadd.f32 %v997_v40, %v996_v37  ;;  %v999_v43 = vpop.f32.mrb[10].mxu1  ;;  %v960_v44 = vpop.f32.mrb[11].mxu0 }
 0x10a   :  { %v961_v45 = vadd.f32 %v960_v44, %v959_v41  ;;  %v1000_v46 = vpop.f32.mrb[11].mxu1 }
 0x10b   :  { %v1001_v47 = vadd.f32 %v1000_v46, %v999_v43  ;;  %v599_v48 = vadd.f32 %v998_v42, %v958_v39 }
 0x10d   :  { %v602_v50 = vadd.f32 %v1001_v47, %v961_v45 }
 0x10e   :  { %v962_v52 = vpop.f32.mrb[12].mxu0 }
 0x10f   :  { %v1002_v53 = vpop.f32.mrb[12].mxu1  ;;  %v963_v54 = vpop.f32.mrb[13].mxu0 }
 0x110   :  { %v964_v55 = vadd.f32 %v963_v54, %v962_v52  ;;  %v1003_v56 = vpop.f32.mrb[13].mxu1  ;;  %v965_v57 = vpop.f32.mrb[14].mxu0 }
 0x111   :  { %v1004_v58 = vadd.f32 %v1003_v56, %v1002_v53  ;;  %v1005_v59 = vpop.f32.mrb[14].mxu1  ;;  %v966_v60 = vpop.f32.mrb[15].mxu0 }
 0x112   :  { %v967_v61 = vadd.f32 %v966_v60, %v965_v57  ;;  %v1006_v62 = vpop.f32.mrb[15].mxu1 }
 0x113   :  { %v1007_v63 = vadd.f32 %v1006_v62, %v1005_v59  ;;  %v607_v0 = vadd.f32 %v1004_v58, %v964_v55 }
 0x115   :  { %v610_v1 = vadd.f32 %v1007_v63, %v967_v61 }
 0x117   :  { %v1038_v4 = vpop.f32.mrb[16].mxu0 }
 0x118   :  { %v656_v5 = vadd.f32 %v1038_v4, %v591_v32  ;;  %v1042_v6 = vpop.f32.mrb[16].mxu1  ;;  %v647_v7 = vpop.f32.mrb[17].mxu0 }
 0x119   :  { %v672_v8 = vadd.f32 %v1042_v6, %v607_v0  ;;  %v648_v9 = vadd.f32 %v647_v7, %v583_v17  ;;  %v663_v10 = vpop.f32.mrb[17].mxu1  ;;  %v1039_v11 = vpop.f32.mrb[18].mxu0 }
 0x11a   :  { %v755_v12 = vadd.f32 %v726_v33, %v656_v5  ;;  %v664_v13 = vadd.f32 %v663_v10, %v599_v48  ;;  %v659_v14 = vadd.f32 %v1039_v11, %v594_v34  ;;  %v1043_v15 = vpop.f32.mrb[18].mxu1  ;;  %v650_v16 = vpop.f32.mrb[19].mxu0 }
 0x11b   :  { %v759_v19 = vadd.f32 %v746_v3, %v672_v8  ;;  %v753_v21 = vadd.f32 %v716_v20, %v648_v9  ;;  %v675_v22 = vadd.f32 %v1043_v15, %v610_v1  ;;  %v651_v23 = vadd.f32 %v650_v16, %v1356_v18  ;;  %v666_v24 = vpop.f32.mrb[19].mxu1 }
 0x11c   :  { %v771_v25 = vmul.f32 0.1, %v755_v12  ;;  %v756_v26 = vadd.f32 %v731_v49, %v659_v14  ;;  %vm763_vm0 = vcmp.gt.f32.partialorder %v755_v12, 0.0  ;;  %v757_v27 = vadd.f32 %v736_v51, %v664_v13 }
 0x11d   :  { %vm767_vm1 = vcmp.gt.f32.partialorder %v759_v19, 0.0  ;;  %v775_v17 = vmul.f32 0.1, %v759_v19  ;;  %v769_v29 = vmul.f32 0.1, %v753_v21  ;;  %v760_v31 = vadd.f32 %v751_v28, %v675_v22 }
 0x11e   :  { %vm764_vm2 = vcmp.gt.f32.partialorder %v756_v26, 0.0  ;;  %v772_v30 = vmul.f32 0.1, %v756_v26  ;;  %v779_v32 = vsel %vm763_vm0, %v755_v12, %v771_v25  ;;  %vm761_vm3 = vcmp.gt.f32.partialorder %v753_v21, 0.0 }
 0x11f   :  { %v754_v33 = vadd.f32 %v1358_v36, %v651_v23  ;;  %v667_v20 = vadd.f32 %v666_v24, %v602_v50  ;;  %v773_v34 = vmul.f32 0.1, %v757_v27  ;;  %vm768_vm4 = vcmp.gt.f32.partialorder %v760_v31, 0.0 }
 0x120   :  { %v780_v35 = vsel %vm764_vm2, %v756_v26, %v772_v30  ;;  %v776_v18 = vmul.f32 0.1, %v760_v31  ;;  %v783_v40 = vsel %vm767_vm1, %v759_v19, %v775_v17  ;;  %v777_v41 = vsel %vm761_vm3, %v753_v21, %v769_v29 }
 0x121   :  { %v913_v37 = vpack.c.bf16 %v780_v35, %v779_v32  ;;  %vm762_vm5 = vcmp.gt.f32.partialorder %v754_v33, 0.0  ;;  %v770_v38 = vmul.f32 0.1, %v754_v33  ;;  %v758_v39 = vadd.f32 %v741_v2, %v667_v20 }
 0x122   :  { %vm765_vm6 = vcmp.gt.f32.partialorder %v757_v27, 0.0  ;;  %v784_v42 = vsel %vm768_vm4, %v760_v31, %v776_v18 }
 0x123   :  { %925 = vst [vmem:[%s1378_s3 + $0x8] sm:$0xff] %v913_v37   ;;  %v923_v43 = vpack.c.bf16 %v784_v42, %v783_v40  ;;  %v778_v36 = vsel %vm762_vm5, %v754_v33, %v770_v38  ;;  %vm766_vm7 = vcmp.gt.f32.partialorder %v758_v39, 0.0  ;;  %v774_v44 = vmul.f32 0.1, %v758_v39 }
 0x124   :  { %v908_v45 = vpack.c.bf16 %v778_v36, %v777_v41  ;;  %v781_v46 = vsel %vm765_vm6, %v757_v27, %v773_v34 }
 0x125   :  { %927 = vst [vmem:[%s1378_s3 + $0x18] sm:$0xff] %v923_v43   ;;  %v782_v47 = vsel %vm766_vm7, %v758_v39, %v774_v44 }
 0x126   :  { %909 = vst [vmem:[%s1378_s3] sm:$0xff] %v908_v45   ;;  %v918_v48 = vpack.c.bf16 %v782_v47, %v781_v46 }
 0x128   :  { %926 = vst [vmem:[%s1378_s3 + $0x10] sm:$0xff] %v918_v48  }

// kernel: fwd.58
= control target key start
LH: loop header
LB: loop body
LE: loop exit
PB: predicated region body
PF: predicated region fallthrough
CT: control target
= control target key end

     0   :  { %v246_v1 = vmov 0   ;;  %v172_v18 = vlaneseq  ;;  %s324_s1 = inlined_call_operand.vmem [shape: bf16[128,256], index: 1, kind: input, shape index: {}]   ;;  %s325_s0 = inlined_call_operand.vmem [shape: bf16[8,128], index: 0, kind: input, shape index: {}]   ;;  %s326_s2 = inlined_call_operand.vmem [shape: f32[1,256], index: 2, kind: input, shape index: {}]   ;;  %s327_s3 = inlined_call_operand.vmem [shape: bf16[8,256], index: 3, kind: output, shape index: {}]  }
   0x1   :  { %v222_v0 = vld [vmem:[%s324_s1 + $0x4] ss:$8 sps:$4 sm:$0xff]   ;;  %152 = vmatprep.mubr.bf16.mxu0 %v246_v1  ;;  %v224_v2 = vld [vmem:[%s324_s1] ss:$8 sps:$4 sm:$0xff]   ;;  %v225_v3 = vld [vmem:[%s324_s1 + $0x14] ss:$8 sps:$4 sm:$0xff]  }
   0x2   :  { %120 = vmatprep.subr.bf16.mxu0 %v222_v0  ;;  %v227_v4 = vld [vmem:[%s324_s1 + $0x10] ss:$8 sps:$4 sm:$0xff]   ;;  %v228_v5 = vld [vmem:[%s324_s1 + $0x24] ss:$8 sps:$4 sm:$0xff]   ;;  %v230_v6 = vld [vmem:[%s324_s1 + $0x20] ss:$8 sps:$4 sm:$0xff]  }
   0x3   :  { %121 = vmatpush1.bf16.msra.mxu0 %v224_v2  ;;  %v231_v7 = vld [vmem:[%s324_s1 + $0x34] ss:$8 sps:$4 sm:$0xff]   ;;  %v233_v8 = vld [vmem:[%s324_s1 + $0x30] ss:$8 sps:$4 sm:$0xff]   ;;  %v234_v9 = vld [vmem:[%s324_s1 + $0x44] ss:$8 sps:$4 sm:$0xff]  }
   0x4   :  { %122 = vmatprep.subr.bf16.mxu0 %v225_v3  ;;  %v236_v10 = vld [vmem:[%s324_s1 + $0x40] ss:$8 sps:$4 sm:$0xff]   ;;  %v237_v11 = vld [vmem:[%s324_s1 + $0x54] ss:$8 sps:$4 sm:$0xff]   ;;  %v239_v12 = vld [vmem:[%s324_s1 + $0x50] ss:$8 sps:$4 sm:$0xff]  }
   0x5   :  { %v240_v13 = vld [vmem:[%s324_s1 + $0x64] ss:$8 sps:$4 sm:$0xff]   ;;  %v242_v14 = vld [vmem:[%s324_s1 + $0x60] ss:$8 sps:$4 sm:$0xff]   ;;  %v243_v15 = vld [vmem:[%s324_s1 + $0x74] ss:$8 sps:$4 sm:$0xff]  }
   0x6   :  { %v245_v16 = vld [vmem:[%s324_s1 + $0x70] ss:$8 sps:$4 sm:$0xff]   ;;  %v23_v17 = vld [vmem:[%s325_s0] sm:$0xf]  ;;  %v173_v19 = vshrl.u32 %v172_v18, 7 }
   0x7   :  { %123 = vmatpush1.bf16.msra.mxu0 %v227_v4  ;;  %v170_v21 = vld [vmem:[%s326_s2] sm:$0x3] }
   0x8   :  { %124 = vmatprep.subr.bf16.mxu0 %v228_v5  ;;  %v174_v20 = vsub.s32 0, %v173_v19  ;;  %v178_v22 = vsub.s32 1, %v173_v19 }
   0xa   :  { %v175_v23 = vrot.slane %v170_v21, %v174_v20  ;;  %v179_v24 = vrot.slane %v170_v21, %v178_v22 }
   0xb   :  { %125 = vmatpush1.bf16.msra.mxu0 %v230_v6 }
   0xc   :  { %126 = vmatprep.subr.bf16.mxu0 %v231_v7 }
   0xf   :  { %127 = vmatpush1.bf16.msra.mxu0 %v233_v8 }
  0x10   :  { %128 = vmatprep.subr.bf16.mxu0 %v234_v9 }
  0x13   :  { %129 = vmatpush1.bf16.msra.mxu0 %v236_v10 }
  0x14   :  { %130 = vmatprep.subr.bf16.mxu0 %v237_v11 }
  0x17   :  { %131 = vmatpush1.bf16.msra.mxu0 %v239_v12 }
  0x18   :  { %132 = vmatprep.subr.bf16.mxu0 %v240_v13 }
  0x1b   :  { %133 = vmatpush1.bf16.msra.mxu0 %v242_v14 }
  0x1c   :  { %134 = vmatprep.subr.bf16.mxu0 %v243_v15 }
  0x1f   :  { %135 = vmatpush1.bf16.msra.mxu0 %v245_v16 }
  0x22   :  { %153 = vmatmul.mubr.bf16.vlgmr.msra.gmra.mrb[0].mxu0 %v23_v17 }
  0xf5   :  { %v154_v25 = vpop.f32.mrb[0].mxu0 }
  0xf6   :  { %v182_v26 = vadd.f32 %v175_v23, %v154_v25  ;;  %v156_v27 = vpop.f32.mrb[1].mxu0 }
  0xf7   :  { %v183_v28 = vadd.f32 %v179_v24, %v156_v27  ;;  %v158_v29 = vpop.f32.mrb[2].mxu0 }
  0xf8   :  { %vm184_vm0 = vcmp.gt.f32.partialorder %v182_v26, 0.0  ;;  %v186_v30 = vmul.f32 0.1, %v182_v26  ;;  %v159_v31 = vpop.f32.mrb[3].mxu0 }
  0xf9   :  { %vm185_vm1 = vcmp.gt.f32.partialorder %v183_v28, 0.0  ;;  %v187_v32 = vmul.f32 0.1, %v183_v28 }
  0xfa   :  { %v188_v33 = vsel %vm184_vm0, %v182_v26, %v186_v30 }
  0xfb   :  { %v189_v34 = vsel %vm185_vm1, %v183_v28, %v187_v32 }
  0xfc   :  { %v220_v35 = vpack.c.bf16 %v189_v34, %v188_v33 }
  0xfe   :  { %198 = vst [vmem:[%s327_s3] sm:$0xff] %v220_v35 }

// kernel: squeeze.3
= control target key start
LH: loop header
LB: loop body
LE: loop exit
PB: predicated region body
PF: predicated region fallthrough
CT: control target
= control target key end

     0   :  { %s7_s6 = smov 3  ;;  %s22_s9 = smov 3  ;;  %vm4_vm0 = vcmask 56320   ;;  %vm925_vm1 = vcmask 998400   ;;  %vm939_vm2 = vcmask 1006592   ;;  %vm955_vm3 = vcmask 1014784   ;;  %s2456_s0 = inlined_call_operand.vmem [shape: f32[1470], index: 0, kind: input, shape index: {}]   ;;  %s2457_s1 = inlined_call_operand.vmem [shape: f32[30,7,7], index: 1, kind: output, shape index: {}]  }
   0x1   :  { %v1011_v0 = vld [vmem:[%s2456_s0 + $0xa] ss:$-7 sm:%s7_s6]   ;;  %s1393_s10 = smov 127   ;;  %v1015_v1 = vld [vmem:[%s2456_s0 + $0x2] ss:$7 sm:%s22_s9]   ;;  %s1394_s13 = smov 125  }
   0x2   :  { %9 = vrot.lane.b32.xlu0 %v1011_v0, %s1393_s10  ;;  %24 = vrot.lane.b32.xlu1 %v1015_v1, %s1394_s13  ;;  %v1013_v2 = vld [vmem:[%s2456_s0 + $0x6] sm:$0x1]   ;;  %v1017_v3 = vld [vmem:[%s2456_s0 + $0x5] sm:$0x1]   ;;  %s37_s18 = smov 3  ;;  %s45_s19 = smov 3 }
   0x3   :  { %s1395_s20 = smov 126   ;;  %s1396_s21 = smov 124   ;;  %v1019_v4 = vld [vmem:[%s2456_s0 + $0x8] ss:$-7 sm:%s37_s18]   ;;  %v1026_v8 = vld [vmem:[%s2456_s0 + $0x6] sm:$0x1]  }
   0x4   :  { %v1021_v5 = vld [vmem:[%s2456_s0 + $0xb] ss:$-7 sm:%s45_s19]   ;;  %s52_s26 = smov 3  ;;  %s60_s27 = smov 3  ;;  %v1030_v10 = vld [vmem:[%s2456_s0 + $0x5] sm:$0x1]  }
   0x5   :  { %s1397_s28 = smov 123   ;;  %s1398_s29 = smov 122   ;;  %v53_v6 = vld [vmem:[%s2456_s0] ss:$7 sm:%s52_s26]   ;;  %v1039_v15 = vld [vmem:[%s2456_s0 + $0x6] sm:$0x1]  }
   0x6   :  { %16 = vrot.lane.b32.xlu0 %v1013_v2, %s1395_s20  ;;  %31 = vrot.lane.b32.xlu1 %v1017_v3, %s1396_s21  ;;  %v1024_v7 = vld [vmem:[%s2456_s0 + $0x3] ss:$7 sm:%s60_s27]   ;;  %s75_s5 = smov 3  ;;  %s1399_s6 = smov 121   ;;  %vm969_vm4 = vcmask 1022976   ;;  %vm985_vm5 = vcmask 1031168  }
   0x7   :  { %s1400_s7 = smov 120   ;;  %v1028_v9 = vld [vmem:[%s2456_s0 + $0x2] ss:$7 sm:%s75_s5]   ;;  %s90_s12 = smov 3  ;;  %v1052_v22 = vld [vmem:[%s2456_s0 + $0x6] sm:$0x1]  }
   0x8   :  { %s1401_s13 = smov 119   ;;  %s1402_s14 = smov 118   ;;  %v1032_v11 = vld [vmem:[%s2456_s0 + $0x8] ss:$-7 sm:%s90_s12]   ;;  %v1065_v29 = vld [vmem:[%s2456_s0 + $0x6] sm:$0x1]  }
   0x9   :  { %s98_s19 = smov 3  ;;  %s105_s20 = smov 3  ;;  %v1043_v17 = vld [vmem:[%s2456_s0 + $0x5] sm:$0x1]   ;;  %v1078_v36 = vld [vmem:[%s2456_s0 + $0x6] sm:$0x1]  }
   0xa   :  { %39 = vrot.lane.b32.xlu0 %v1019_v4, %s1397_s28  ;;  %47 = vrot.lane.b32.xlu1 %v1021_v5, %s1398_s29  ;;  %s1403_s21 = smov 117   ;;  %s1404_s22 = smov 116   ;;  %v1034_v12 = vld [vmem:[%s2456_s0 + $0xb] ss:$-7 sm:%s98_s19]   ;;  %vm1001_vm6 = vcmask 1039360   ;;  %vm929_vm7 = vcmask 48128  }
   0xb   :  { %v106_v13 = vld [vmem:[%s2456_s0] ss:$7 sm:%s105_s20]   ;;  %s113_s27 = smov 3  ;;  %s1405_s28 = smov 115   ;;  %v1056_v24 = vld [vmem:[%s2456_s0 + $0x5] sm:$0x1]  }
   0xc   :  { %s1406_s29 = smov 114   ;;  %v1037_v14 = vld [vmem:[%s2456_s0 + $0x3] ss:$7 sm:%s113_s27]   ;;  %s128_s5 = smov 3  ;;  %v1069_v31 = vld [vmem:[%s2456_s0 + $0x5] sm:$0x1]  }
   0xd   :  { %v1041_v16 = vld [vmem:[%s2456_s0 + $0x2] ss:$7 sm:%s128_s5]   ;;  %s143_s12 = smov 3  ;;  %s1410_s15 = smov 110   ;;  %v1091_v43 = vld [vmem:[%s2456_s0 + $0x6] sm:$0x1]  }
   0xe   :  { %54 = vrot.lane.b32.xlu0 %v53_v6, %s1399_s6  ;;  %62 = vrot.lane.b32.xlu1 %v1024_v7, %s1400_s7  ;;  %s1407_s6 = smov 113   ;;  %s1408_s7 = smov 112   ;;  %v1045_v18 = vld [vmem:[%s2456_s0 + $0x8] ss:$-7 sm:%s143_s12]   ;;  %vm932_vm8 = vcmask 56368   ;;  %vm943_vm9 = vcmask 39936  }
   0xf   :  { %s158_s20 = smov 3  ;;  %s1412_s23 = smov 108   ;;  %v1082_v38 = vld [vmem:[%s2456_s0 + $0x5] sm:$0x1]   ;;  %v1104_v50 = vld [vmem:[%s2456_s0 + $0x6] sm:$0x1]  }
  0x10   :  { %v159_v20 = vld [vmem:[%s2456_s0] ss:$7 sm:%s158_s20]   ;;  %s1414_s30 = smov 106   ;;  %s1416_s8 = smov 104   ;;  %v1095_v45 = vld [vmem:[%s2456_s0 + $0x5] sm:$0x1]  }
  0x11   :  { %s1418_s16 = smov 102   ;;  %s1424_s9 = smov 96   ;;  %v1108_v52 = vld [vmem:[%s2456_s0 + $0x5] sm:$0x1]   ;;  %v1117_v57 = vld [vmem:[%s2456_s0 + $0x6] sm:$0x1]  }
  0x12   :  { %69 = vrot.lane.b32.xlu0 %v1026_v8, %s1401_s13  ;;  %77 = vrot.lane.b32.xlu1 %v1028_v9, %s1402_s14  ;;  %s151_s13 = smov 3  ;;  %s1409_s14 = smov 111   ;;  %v1121_v60 = vld [vmem:[%s2456_s0 + $0x5] sm:$0x1]   ;;  %v1125_v0 = vld [vmem:[%s2456_s0 + $0x4] sm:$0x1]  }
  0x13   :  { %v1047_v19 = vld [vmem:[%s2456_s0 + $0xb] ss:$-7 sm:%s151_s13]   ;;  %s204_s13 = smov 3  ;;  %s1426_s17 = smov 94   ;;  %v1130_v6 = vld [vmem:[%s2456_s0 + $0x6] sm:$0x1]  }
  0x14   :  { %v1060_v26 = vld [vmem:[%s2456_s0 + $0xb] ss:$-7 sm:%s204_s13]   ;;  %s1428_s24 = smov 92   ;;  %s1430_s2 = smov 90   ;;  %vm946_vm10 = vcmask 56360   ;;  %vm959_vm11 = vcmask 31744  }
  0x15   :  { %s1432_s10 = smov 88   ;;  %s1438_s3 = smov 82   ;;  %vm962_vm12 = vcmask 56352   ;;  %vm973_vm13 = vcmask 23552   ;;  %vm976_vm14 = vcmask 56344   ;;  %vm989_vm15 = vcmask 15360  }
  0x16   :  { %84 = vrot.lane.b32.xlu0 %v1030_v10, %s1403_s21  ;;  %92 = vrot.lane.b32.xlu1 %v1032_v11, %s1404_s22  ;;  %s166_s21 = smov 3  ;;  %s1411_s22 = smov 109   ;;  %v1134_v10 = vld [vmem:[%s2456_s0 + $0x5] sm:$0x1]  }
  0x17   :  { %v1050_v21 = vld [vmem:[%s2456_s0 + $0x3] ss:$7 sm:%s166_s21]   ;;  %s219_s21 = smov 3  ;;  %s1440_s11 = smov 80  }
  0x18   :  { %v1063_v28 = vld [vmem:[%s2456_s0 + $0x3] ss:$7 sm:%s219_s21]   ;;  %s1442_s18 = smov 78   ;;  %s1444_s25 = smov 76  }
  0x19   :  { %s1446_s4 = smov 74   ;;  %s1451_s26 = smov 69  }
  0x1a   :  { %100 = vrot.lane.b32.xlu0 %v1034_v12, %s1405_s28  ;;  %107 = vrot.lane.b32.xlu1 %v106_v13, %s1406_s29  ;;  %s181_s28 = smov 3  ;;  %s1413_s29 = smov 107  }
  0x1b   :  { %v1054_v23 = vld [vmem:[%s2456_s0 + $0x9] ss:$-7 sm:%s181_s28]   ;;  %s234_s28 = smov 3  ;;  %s475_s5 = smov 3 }
  0x1c   :  { %v1067_v30 = vld [vmem:[%s2456_s0 + $0x9] ss:$-7 sm:%s234_s28]   ;;  %s1454_s12 = smov 66   ;;  %v476_v2 = vld [vmem:[%s2456_s0] ss:$7 sm:%s475_s5]   ;;  %s498_s19 = smov 3 }
  0x1d   :  { %s1455_s20 = smov 65   ;;  %v1132_v8 = vld [vmem:[%s2456_s0 + $0x9] ss:$-7 sm:%s498_s19]   ;;  %s1458_s5 = smov 62  }
  0x1e   :  { %115 = vrot.lane.b32.xlu0 %v1037_v14, %s1407_s6  ;;  %122 = vrot.lane.b32.xlu1 %v1039_v15, %s1408_s7  ;;  %s196_s6 = smov 3  ;;  %s1415_s7 = smov 105   ;;  %v1138_v14 = vld [vmem:[%s2456_s0 + $0x4] sm:$0x1]  }
  0x1f   :  { %v1058_v25 = vld [vmem:[%s2456_s0 + $0x8] ss:$-7 sm:%s196_s6]   ;;  %s249_s6 = smov 3  ;;  %s1459_s13 = smov 61  }
  0x20   :  { %v1071_v32 = vld [vmem:[%s2456_s0 + $0x8] ss:$-7 sm:%s249_s6]   ;;  %s535_s21 = smov 3  ;;  %s1462_s27 = smov 58  }
  0x21   :  { %s1463_s6 = smov 57   ;;  %s587_s28 = smov 3 }
  0x22   :  { %130 = vrot.lane.b32.xlu0 %v1041_v16, %s1409_s14  ;;  %137 = vrot.lane.b32.xlu1 %v1043_v17, %s1410_s15  ;;  %s211_s14 = smov 3  ;;  %s1417_s15 = smov 103  }
  0x23   :  { %v212_v27 = vld [vmem:[%s2456_s0] ss:$7 sm:%s211_s14]   ;;  %s264_s14 = smov 3  ;;  %s693_s19 = smov 3 }
  0x24   :  { %v265_v34 = vld [vmem:[%s2456_s0] ss:$7 sm:%s264_s14]   ;;  %s565_s14 = smov 3 }
  0x26   :  { %145 = vrot.lane.b32.xlu0 %v1045_v18, %s1411_s22  ;;  %153 = vrot.lane.b32.xlu1 %v1047_v19, %s1412_s23  ;;  %s1419_s22 = smov 101   ;;  %s1420_s23 = smov 100   ;;  %v1141_v18 = vld [vmem:[%s2456_s0 + $0x3] ss:$7 sm:%s535_s21]  }
  0x27   :  { %s617_s21 = smov 3 }
  0x2a   :  { %160 = vrot.lane.b32.xlu0 %v159_v20, %s1413_s29  ;;  %168 = vrot.lane.b32.xlu1 %v1050_v21, %s1414_s30  ;;  %s1421_s29 = smov 99   ;;  %s1422_s30 = smov 98   ;;  %v1143_v20 = vld [vmem:[%s2456_s0 + $0x6] sm:$0x1]  }
  0x2e   :  { %175 = vrot.lane.b32.xlu0 %v1052_v22, %s1415_s7  ;;  %183 = vrot.lane.b32.xlu1 %v1054_v23, %s1416_s8  ;;  %s257_s7 = smov 3  ;;  %s1423_s8 = smov 97  }
  0x2f   :  { %v1073_v33 = vld [vmem:[%s2456_s0 + $0xb] ss:$-7 sm:%s257_s7]   ;;  %s310_s7 = smov 3 }
  0x30   :  { %v1086_v40 = vld [vmem:[%s2456_s0 + $0xb] ss:$-7 sm:%s310_s7]   ;;  %s1474_s7 = smov 46  }
  0x32   :  { %190 = vrot.lane.b32.xlu0 %v1056_v24, %s1417_s15  ;;  %198 = vrot.lane.b32.xlu1 %v1058_v25, %s1418_s16  ;;  %s272_s15 = smov 3  ;;  %s1425_s16 = smov 95   ;;  %v1147_v24 = vld [vmem:[%s2456_s0 + $0x5] sm:$0x1]  }
  0x33   :  { %v1076_v35 = vld [vmem:[%s2456_s0 + $0x3] ss:$7 sm:%s272_s15]   ;;  %s325_s15 = smov 3 }
  0x34   :  { %v1089_v42 = vld [vmem:[%s2456_s0 + $0x3] ss:$7 sm:%s325_s15]   ;;  %s1475_s15 = smov 45  }
  0x36   :  { %206 = vrot.lane.b32.xlu0 %v1060_v26, %s1419_s22  ;;  %213 = vrot.lane.b32.xlu1 %v212_v27, %s1420_s23  ;;  %s287_s22 = smov 3  ;;  %s1427_s23 = smov 93   ;;  %v1149_v26 = vld [vmem:[%s2456_s0 + $0x1] ss:$7 sm:%s565_s14]  }
  0x37   :  { %v1080_v37 = vld [vmem:[%s2456_s0 + $0x9] ss:$-7 sm:%s287_s22]   ;;  %s340_s22 = smov 3  ;;  %s1470_s14 = smov 50  }
  0x38   :  { %v1093_v44 = vld [vmem:[%s2456_s0 + $0x9] ss:$-7 sm:%s340_s22]   ;;  %s1471_s22 = smov 49  }
  0x3a   :  { %221 = vrot.lane.b32.xlu0 %v1063_v28, %s1421_s29  ;;  %228 = vrot.lane.b32.xlu1 %v1065_v29, %s1422_s30  ;;  %s302_s29 = smov 3  ;;  %s1429_s30 = smov 91   ;;  %v1151_v28 = vld [vmem:[%s2456_s0 + $0x4] sm:$0x1]  }
  0x3b   :  { %v1084_v39 = vld [vmem:[%s2456_s0 + $0x8] ss:$-7 sm:%s302_s29]   ;;  %s355_s29 = smov 3 }
  0x3c   :  { %v1097_v46 = vld [vmem:[%s2456_s0 + $0x8] ss:$-7 sm:%s355_s29]   ;;  %s1452_s29 = smov 68  }
  0x3e   :  { %236 = vrot.lane.b32.xlu0 %v1067_v30, %s1423_s8  ;;  %243 = vrot.lane.b32.xlu1 %v1069_v31, %s1424_s9  ;;  %s317_s8 = smov 3  ;;  %s1431_s9 = smov 89  }
  0x3f   :  { %v318_v41 = vld [vmem:[%s2456_s0] ss:$7 sm:%s317_s8]   ;;  %s370_s8 = smov 3 }
  0x40   :  { %v371_v48 = vld [vmem:[%s2456_s0] ss:$7 sm:%s370_s8]   ;;  %s483_s8 = smov 3 }
  0x41   :  { %v1128_v4 = vld [vmem:[%s2456_s0 + $0x3] ss:$7 sm:%s483_s8]   ;;  %s1479_s8 = smov 41  }
  0x42   :  { %251 = vrot.lane.b32.xlu0 %v1071_v32, %s1425_s16  ;;  %259 = vrot.lane.b32.xlu1 %v1073_v33, %s1426_s17  ;;  %s1433_s16 = smov 87   ;;  %s1434_s17 = smov 86   ;;  %v1154_v32 = vld [vmem:[%s2456_s0 + $0x3] ss:$7 sm:%s587_s28]  }
  0x43   :  { %s791_s28 = smov 3 }
  0x46   :  { %266 = vrot.lane.b32.xlu0 %v265_v34, %s1427_s23  ;;  %274 = vrot.lane.b32.xlu1 %v1076_v35, %s1428_s24  ;;  %s1435_s23 = smov 85   ;;  %s1436_s24 = smov 84   ;;  %v1156_v34 = vld [vmem:[%s2456_s0 + $0x6] sm:$0x1]  }
  0x4a   :  { %281 = vrot.lane.b32.xlu0 %v1078_v36, %s1429_s30  ;;  %289 = vrot.lane.b32.xlu1 %v1080_v37, %s1430_s2  ;;  %s363_s30 = smov 3  ;;  %s1437_s2 = smov 83  }
  0x4b   :  { %v1099_v47 = vld [vmem:[%s2456_s0 + $0xb] ss:$-7 sm:%s363_s30]   ;;  %s416_s30 = smov 3 }
  0x4c   :  { %v1112_v54 = vld [vmem:[%s2456_s0 + $0xb] ss:$-7 sm:%s416_s30]   ;;  %s513_s30 = smov 3 }
  0x4d   :  { %v1136_v12 = vld [vmem:[%s2456_s0 + $0x1] ss:$7 sm:%s513_s30]   ;;  %s708_s30 = smov 3 }
  0x4e   :  { %296 = vrot.lane.b32.xlu0 %v1082_v38, %s1431_s9  ;;  %304 = vrot.lane.b32.xlu1 %v1084_v39, %s1432_s10  ;;  %s378_s9 = smov 3  ;;  %s1439_s10 = smov 81   ;;  %v1160_v38 = vld [vmem:[%s2456_s0 + $0x5] sm:$0x1]  }
  0x4f   :  { %v1102_v49 = vld [vmem:[%s2456_s0 + $0x3] ss:$7 sm:%s378_s9]   ;;  %s431_s9 = smov 3 }
  0x50   :  { %v1115_v56 = vld [vmem:[%s2456_s0 + $0x3] ss:$7 sm:%s431_s9]   ;;  %s1453_s9 = smov 67  }
  0x52   :  { %312 = vrot.lane.b32.xlu0 %v1086_v40, %s1433_s16  ;;  %319 = vrot.lane.b32.xlu1 %v318_v41, %s1434_s17  ;;  %s393_s16 = smov 3  ;;  %s1441_s17 = smov 79   ;;  %v1162_v40 = vld [vmem:[%s2456_s0 + $0x1] ss:$7 sm:%s617_s21]  }
  0x53   :  { %v1106_v51 = vld [vmem:[%s2456_s0 + $0x9] ss:$-7 sm:%s393_s16]   ;;  %s446_s16 = smov 3  ;;  %s738_s21 = smov 3 }
  0x54   :  { %v1119_v58 = vld [vmem:[%s2456_s0 + $0x9] ss:$-7 sm:%s446_s16]   ;;  %s1460_s16 = smov 60  }
  0x56   :  { %327 = vrot.lane.b32.xlu0 %v1089_v42, %s1435_s23  ;;  %334 = vrot.lane.b32.xlu1 %v1091_v43, %s1436_s24  ;;  %s408_s23 = smov 3  ;;  %s1443_s24 = smov 77   ;;  %v1164_v42 = vld [vmem:[%s2456_s0 + $0x4] sm:$0x1]  }
  0x57   :  { %v1110_v53 = vld [vmem:[%s2456_s0 + $0x8] ss:$-7 sm:%s408_s23]   ;;  %s461_s23 = smov 3 }
  0x58   :  { %v1123_v62 = vld [vmem:[%s2456_s0 + $0x8] ss:$-7 sm:%s461_s23]   ;;  %s1456_s23 = smov 64  }
  0x5a   :  { %342 = vrot.lane.b32.xlu0 %v1093_v44, %s1437_s2  ;;  %349 = vrot.lane.b32.xlu1 %v1095_v45, %s1438_s3  ;;  %s423_s2 = smov 3  ;;  %s1445_s3 = smov 75  }
  0x5b   :  { %v424_v55 = vld [vmem:[%s2456_s0] ss:$7 sm:%s423_s2]   ;;  %s1457_s2 = smov 63  }
  0x5e   :  { %357 = vrot.lane.b32.xlu0 %v1097_v46, %s1439_s10  ;;  %365 = vrot.lane.b32.xlu1 %v1099_v47, %s1440_s11  ;;  %s1447_s10 = smov 73   ;;  %s1448_s11 = smov 72  }
  0x62   :  { %372 = vrot.lane.b32.xlu0 %v371_v48, %s1441_s17  ;;  %380 = vrot.lane.b32.xlu1 %v1102_v49, %s1442_s18  ;;  %s1449_s17 = smov 71   ;;  %s1450_s18 = smov 70   ;;  %v1170_v48 = vld [vmem:[%s2456_s0 + $0x6] sm:$0x1]  }
  0x66   :  { %387 = vrot.lane.b32.xlu0 %v1104_v50, %s1443_s24  ;;  %395 = vrot.lane.b32.xlu1 %v1106_v51, %s1444_s25  ;;  %s1461_s24 = smov 59   ;;  %s579_s25 = smov 3 }
  0x67   :  { %v580_v30 = vld [vmem:[%s2456_s0] ss:$7 sm:%s579_s25]   ;;  %s1472_s25 = smov 48  }
  0x6a   :  { %402 = vrot.lane.b32.xlu0 %v1108_v52, %s1445_s3  ;;  %410 = vrot.lane.b32.xlu1 %v1110_v53, %s1446_s4  ;;  %s550_s3 = smov 3  ;;  %s1473_s4 = smov 47   ;;  %v1174_v52 = vld [vmem:[%s2456_s0 + $0x5] sm:$0x1]  }
  0x6b   :  { %v1145_v22 = vld [vmem:[%s2456_s0 + $0x9] ss:$-7 sm:%s550_s3]   ;;  %s1468_s3 = smov 52  }
  0x6e   :  { %418 = vrot.lane.b32.xlu0 %v1112_v54, %s1447_s10  ;;  %425 = vrot.lane.b32.xlu1 %v424_v55, %s1448_s11  ;;  %s602_s10 = smov 3  ;;  %s1469_s11 = smov 51  }
  0x6f   :  { %v1158_v36 = vld [vmem:[%s2456_s0 + $0x9] ss:$-7 sm:%s602_s10]   ;;  %s1508_s10 = smov 18  }
  0x72   :  { %433 = vrot.lane.b32.xlu0 %v1115_v56, %s1449_s17  ;;  %440 = vrot.lane.b32.xlu1 %v1117_v57, %s1450_s18  ;;  %s1465_s17 = smov 55   ;;  %s1476_s18 = smov 44   ;;  %v1178_v56 = vld [vmem:[%s2456_s0 + $0x4] sm:$0x1]  }
  0x74   :  { %v10_v59 = vpop.permute.xlu0 %9   ;;  %v25_v61 = vpop.permute.xlu1 %24  }
  0x75   :  { %1012 = vst.msk [vmem:[%s2457_s1 + $0xd1] ss:$-147 sm:$0x3] %vm4_vm0, %v10_v59   ;;  %1016 = vst.msk [vmem:[%s2457_s1 + $0x2a] ss:$146 sm:$0x3] %vm4_vm0, %v25_v61  }
  0x76   :  { %448 = vrot.lane.b32.xlu0 %v1119_v58, %s1451_s26  ;;  %455 = vrot.lane.b32.xlu1 %v1121_v60, %s1452_s29  ;;  %s1467_s29 = smov 53   ;;  %s1477_s26 = smov 43   ;;  %v1182_v60 = vld [vmem:[%s2456_s0 + $0xa] ss:$-7 sm:%s693_s19]  }
  0x77   :  { %s1514_s19 = smov 12  }
  0x78   :  { %v17_v63 = vpop.permute.xlu0 %16   ;;  %v32_v1 = vpop.permute.xlu1 %31  }
  0x79   :  { %1014 = vst.msk [vmem:[%s2457_s1 + $0x7d] sm:$0x1] %vm4_vm0, %v17_v63   ;;  %1018 = vst.msk [vmem:[%s2457_s1 + $0x69] sm:$0x1] %vm4_vm0, %v32_v1  }
  0x7a   :  { %463 = vrot.lane.b32.xlu0 %v1123_v62, %s1453_s9  ;;  %470 = vrot.lane.b32.xlu1 %v1125_v0, %s1454_s12  ;;  %s527_s12 = smov 3  ;;  %s1464_s9 = smov 56   ;;  %v1184_v62 = vld [vmem:[%s2456_s0 + $0x6] sm:$0x1]  }
  0x7b   :  { %v528_v16 = vld [vmem:[%s2456_s0] ss:$7 sm:%s527_s12]   ;;  %s640_s12 = smov 3  ;;  %v1186_v0 = vld [vmem:[%s2456_s0 + $0x9] ss:$-7 sm:%s708_s30]   ;;  %s1496_s30 = smov 1  }
  0x7c   :  { %v40_v3 = vpop.permute.xlu0 %39   ;;  %v48_v5 = vpop.permute.xlu1 %47   ;;  %v1168_v46 = vld [vmem:[%s2456_s0 + $0x3] ss:$7 sm:%s640_s12]   ;;  %s723_s12 = smov 3 }
  0x7d   :  { %1020 = vst.msk [vmem:[%s2457_s1 + $0xa8] ss:$-147 sm:$0x3] %vm4_vm0, %v40_v3   ;;  %1022 = vst.msk [vmem:[%s2457_s1 + $0xe6] ss:$-146 sm:$0x3] %vm4_vm0, %v48_v5  }
  0x7e   :  { %477 = vrot.lane.b32.xlu0 %v476_v2, %s1455_s20  ;;  %485 = vrot.lane.b32.xlu1 %v1128_v4, %s1456_s23  ;;  %s1466_s20 = smov 54   ;;  %s655_s23 = smov 3  ;;  %v1188_v2 = vld [vmem:[%s2456_s0 + $0x5] sm:$0x1]  }
  0x7f   :  { %v1172_v50 = vld [vmem:[%s2456_s0 + $0x9] ss:$-7 sm:%s655_s23]   ;;  %s1482_s23 = smov 38   ;;  %v1190_v4 = vld [vmem:[%s2456_s0 + $0x1] ss:$7 sm:%s723_s12]   ;;  %s1498_s12 = smov 28  }
  0x80   :  { %v55_v7 = vpop.permute.xlu0 %54   ;;  %v63_v9 = vpop.permute.xlu1 %62  }
  0x81   :  { %1023 = vst.msk [vmem:[%s2457_s1 + $0x1] ss:$146 sm:$0x3] %vm4_vm0, %v55_v7   ;;  %1025 = vst.msk [vmem:[%s2457_s1 + $0x40] ss:$146 sm:$0x3] %vm4_vm0, %v63_v9  }
  0x82   :  { %492 = vrot.lane.b32.xlu0 %v1130_v6, %s1457_s2  ;;  %500 = vrot.lane.b32.xlu1 %v1132_v8, %s1458_s5  ;;  %s670_s5 = smov 3  ;;  %s1483_s2 = smov 37   ;;  %v1192_v6 = vld [vmem:[%s2456_s0 + $0x4] sm:$0x1]   ;;  %v1246_v8 = vld [vmem:[%s2456_s0 + $0x5] sm:$0x1]  }
  0x83   :  { %v1176_v54 = vld [vmem:[%s2456_s0 + $0x1] ss:$7 sm:%s670_s5]   ;;  %s1484_s5 = smov 36  }
  0x84   :  { %v70_v11 = vpop.permute.xlu0 %69   ;;  %v78_v13 = vpop.permute.xlu1 %77   ;;  %v1194_v7 = vld [vmem:[%s2456_s0 + $0x7] ss:$-7 sm:%s738_s21]   ;;  %s1510_s21 = smov 16  }
  0x85   :  { %1027 = vst.msk [vmem:[%s2457_s1 + $0x7e] sm:$0x1] %vm4_vm0, %v70_v11   ;;  %1029 = vst.msk [vmem:[%s2457_s1 + $0x2b] ss:$146 sm:$0x3] %vm4_vm0, %v78_v13  }
  0x86   :  { %507 = vrot.lane.b32.xlu0 %v1134_v10, %s1459_s13  ;;  %515 = vrot.lane.b32.xlu1 %v1136_v12, %s1460_s16  ;;  %s685_s16 = smov 3  ;;  %s1485_s13 = smov 35   ;;  %v1247_v13 = vld [vmem:[%s2456_s0 + $0x6] sm:$0x1]  }
  0x87   :  { %v1180_v58 = vld [vmem:[%s2456_s0 + $0x7] ss:$-7 sm:%s685_s16]   ;;  %s1486_s16 = smov 34  }
  0x88   :  { %v85_v15 = vpop.permute.xlu0 %84   ;;  %v93_v17 = vpop.permute.xlu1 %92  }
  0x89   :  { %1031 = vst.msk [vmem:[%s2457_s1 + $0x6a] sm:$0x1] %vm4_vm0, %v85_v15   ;;  %1033 = vst.msk [vmem:[%s2457_s1 + $0xa9] ss:$-147 sm:$0x3] %vm4_vm0, %v93_v17   ;;  %v940_v17 = vsel %vm939_vm2, %v1247_v13, %v1246_v8  ;;  %vm1005_vm2 = vcmask 7168  }
  0x8a   :  { %522 = vrot.lane.b32.xlu0 %v1138_v14, %s1461_s24  ;;  %529 = vrot.lane.b32.xlu1 %v528_v16, %s1462_s27  ;;  %s920_s24 = smov 3  ;;  %v1254_v15 = vld [vmem:[%s2456_s0 + $0x4] sm:$0x1]   ;;  %s1495_s27 = smov 2  }
  0x8b   :  { %v1242_v10 = vld [vmem:[%s2456_s0 + $0x9] ss:$-7 sm:%s920_s24]   ;;  %s746_s24 = smov 3 }
  0x8c   :  { %v101_v19 = vpop.permute.xlu0 %100   ;;  %v108_v21 = vpop.permute.xlu1 %107  }
  0x8d   :  { %1035 = vst.msk [vmem:[%s2457_s1 + $0xe8] ss:$-147 sm:$0x3] %vm4_vm0, %v101_v19   ;;  %1036 = vst.msk [vmem:[%s2457_s1 + $0x2] ss:$146 sm:$0x3] %vm4_vm0, %v108_v21  }
  0x8e   :  { %537 = vrot.lane.b32.xlu0 %v1141_v18, %s1463_s6  ;;  %544 = vrot.lane.b32.xlu1 %v1143_v20, %s1464_s9  ;;  %v1255_v21 = vld [vmem:[%s2456_s0 + $0x5] sm:$0x1]   ;;  %s1492_s9 = smov 5   ;;  %s761_s6 = smov 3 }
  0x90   :  { %v116_v23 = vpop.permute.xlu0 %115   ;;  %v123_v25 = vpop.permute.xlu1 %122  }
  0x91   :  { %1038 = vst.msk [vmem:[%s2457_s1 + $0x41] ss:$146 sm:$0x3] %vm4_vm0, %v116_v23   ;;  %1040 = vst.msk [vmem:[%s2457_s1 + $0x80] sm:$0x1] %vm4_vm0, %v123_v25  }
  0x92   :  { %552 = vrot.lane.b32.xlu0 %v1145_v22, %s1465_s17  ;;  %559 = vrot.lane.b32.xlu1 %v1147_v24, %s1466_s20  ;;  %s1481_s20 = smov 39   ;;  %s1489_s17 = smov 31   ;;  %v970_v24 = vsel %vm969_vm4, %v1255_v21, %v1254_v15  ;;  %v1240_v15 = vld [vmem:[%s2456_s0 + $0x6] sm:$0x1]  }
  0x94   :  { %v131_v27 = vpop.permute.xlu0 %130   ;;  %v138_v29 = vpop.permute.xlu1 %137  }
  0x95   :  { %1042 = vst.msk [vmem:[%s2457_s1 + $0x2c] ss:$146 sm:$0x3] %vm4_vm0, %v131_v27   ;;  %1044 = vst.msk [vmem:[%s2457_s1 + $0x6b] sm:$0x1] %vm4_vm0, %v138_v29  }
  0x96   :  { %567 = vrot.lane.b32.xlu0 %v1149_v26, %s1467_s29  ;;  %574 = vrot.lane.b32.xlu1 %v1151_v28, %s1468_s3  ;;  %s632_s3 = smov 3  ;;  %s1478_s29 = smov 42  }
  0x97   :  { %v1166_v44 = vld [vmem:[%s2456_s0 + $0x7] ss:$-7 sm:%s632_s3]   ;;  %s983_s3 = smov 3 }
  0x98   :  { %v146_v31 = vpop.permute.xlu0 %145   ;;  %v154_v33 = vpop.permute.xlu1 %153   ;;  %v1259_v26 = vld [vmem:[%s2456_s0 + $0x8] ss:$-7 sm:%s983_s3]   ;;  %s1501_s3 = smov 25  }
  0x99   :  { %1046 = vst.msk [vmem:[%s2457_s1 + $0xaa] ss:$-146 sm:$0x3] %vm4_vm0, %v146_v31   ;;  %1048 = vst.msk [vmem:[%s2457_s1 + $0xe9] ss:$-147 sm:$0x3] %vm4_vm0, %v154_v33  }
  0x9a   :  { %581 = vrot.lane.b32.xlu0 %v580_v30, %s1469_s11  ;;  %589 = vrot.lane.b32.xlu1 %v1154_v32, %s1470_s14  ;;  %s1480_s11 = smov 40   ;;  %s1503_s14 = smov 23  }
  0x9c   :  { %v161_v35 = vpop.permute.xlu0 %160   ;;  %v169_v37 = vpop.permute.xlu1 %168  }
  0x9d   :  { %1049 = vst.msk [vmem:[%s2457_s1 + $0x3] ss:$146 sm:$0x3] %vm4_vm0, %v161_v35   ;;  %1051 = vst.msk [vmem:[%s2457_s1 + $0x42] ss:$146 sm:$0x3] %vm4_vm0, %v169_v37  }
  0x9e   :  { %596 = vrot.lane.b32.xlu0 %v1156_v34, %s1471_s22  ;;  %604 = vrot.lane.b32.xlu1 %v1158_v36, %s1472_s25  ;;  %s923_s25 = smov 3  ;;  %v1196_v34 = vld [vmem:[%s2456_s0 + $0xa] ss:$-7 sm:%s746_s24]   ;;  %s829_s24 = smov 3 }
  0x9f   :  { %v1243_v11 = vld [vmem:[%s2456_s0 + $0xa] ss:$-7 sm:%s923_s25]   ;;  %v1198_v36 = vld [vmem:[%s2456_s0 + $0x6] sm:$0x1]   ;;  %s1505_s25 = smov 21  }
  0xa0   :  { %v176_v39 = vpop.permute.xlu0 %175   ;;  %v184_v41 = vpop.permute.xlu1 %183   ;;  %v926_v14 = vsel %vm925_vm1, %v1243_v11, %v1242_v10  ;;  %vm992_vm1 = vcmask 56336  }
  0xa1   :  { %1053 = vst.msk [vmem:[%s2457_s1 + $0x81] sm:$0x1] %vm4_vm0, %v176_v39   ;;  %1055 = vst.msk [vmem:[%s2457_s1 + $0xc0] ss:$-147 sm:$0x3] %vm4_vm0, %v184_v41  }
  0xa2   :  { %611 = vrot.lane.b32.xlu0 %v1160_v38, %s1473_s4  ;;  %619 = vrot.lane.b32.xlu1 %v1162_v40, %s1474_s7  ;;  %s1491_s4 = smov 6   ;;  %s996_s7 = smov 3  ;;  %v1200_v38 = vld [vmem:[%s2456_s0 + $0x9] ss:$-7 sm:%s761_s6]  }
  0xa3   :  { %v1262_v28 = vld [vmem:[%s2456_s0 + $0xa] ss:$-7 sm:%s996_s7]   ;;  %v1202_v40 = vld [vmem:[%s2456_s0 + $0x5] sm:$0x1]   ;;  %s1502_s6 = smov 24   ;;  %s1507_s7 = smov 19  }
  0xa4   :  { %v191_v43 = vpop.permute.xlu0 %190   ;;  %v199_v45 = vpop.permute.xlu1 %198  }
  0xa5   :  { %1057 = vst.msk [vmem:[%s2457_s1 + $0x6c] sm:$0x1] %vm4_vm0, %v191_v43   ;;  %1059 = vst.msk [vmem:[%s2457_s1 + $0xab] ss:$-146 sm:$0x3] %vm4_vm0, %v199_v45  }
  0xa6   :  { %626 = vrot.lane.b32.xlu0 %v1164_v42, %s1475_s15  ;;  %634 = vrot.lane.b32.xlu1 %v1166_v44, %s1476_s18  ;;  %s950_s15 = smov 3  ;;  %v1206_v44 = vld [vmem:[%s2456_s0 + $0x4] sm:$0x1]   ;;  %s1509_s18 = smov 17  }
  0xa7   :  { %v1250_v18 = vld [vmem:[%s2456_s0 + $0x1] ss:$7 sm:%s950_s15]   ;;  %s852_s15 = smov 3 }
  0xa8   :  { %v207_v47 = vpop.permute.xlu0 %206   ;;  %v214_v49 = vpop.permute.xlu1 %213  }
  0xa9   :  { %1061 = vst.msk [vmem:[%s2457_s1 + $0xea] ss:$-146 sm:$0x3] %vm4_vm0, %v207_v47   ;;  %1062 = vst.msk [vmem:[%s2457_s1 + $0x4] ss:$146 sm:$0x3] %vm4_vm0, %v214_v49  }
  0xaa   :  { %642 = vrot.lane.b32.xlu0 %v1168_v46, %s1477_s26  ;;  %649 = vrot.lane.b32.xlu1 %v1170_v48, %s1478_s29  ;;  %s1487_s26 = smov 33   ;;  %v1208_v46 = vld [vmem:[%s2456_s0 + $0x7] ss:$-7 sm:%s791_s28]   ;;  %s1506_s28 = smov 20  }
  0xab   :  { %s1511_s29 = smov 15  }
  0xac   :  { %v222_v51 = vpop.permute.xlu0 %221   ;;  %v229_v53 = vpop.permute.xlu1 %228  }
  0xad   :  { %1064 = vst.msk [vmem:[%s2457_s1 + $0x43] ss:$146 sm:$0x3] %vm4_vm0, %v222_v51   ;;  %1066 = vst.msk [vmem:[%s2457_s1 + $0x82] sm:$0x1] %vm4_vm0, %v229_v53  }
  0xae   :  { %657 = vrot.lane.b32.xlu0 %v1172_v50, %s1479_s8  ;;  %664 = vrot.lane.b32.xlu1 %v1174_v52, %s1480_s11  ;;  %s999_s8 = smov 3  ;;  %v1212_v50 = vld [vmem:[%s2456_s0 + $0x6] sm:$0x1]  }
  0xaf   :  { %v1263_v29 = vld [vmem:[%s2456_s0 + $0xb] ss:$-7 sm:%s999_s8]  }
  0xb0   :  { %v237_v55 = vpop.permute.xlu0 %236   ;;  %v244_v57 = vpop.permute.xlu1 %243   ;;  %v1002_v32 = vsel %vm1001_vm6, %v1263_v29, %v1262_v28 }
  0xb1   :  { %1068 = vst.msk [vmem:[%s2457_s1 + $0xc1] ss:$-147 sm:$0x3] %vm4_vm0, %v237_v55   ;;  %1070 = vst.msk [vmem:[%s2457_s1 + $0x6d] sm:$0x1] %vm4_vm0, %v244_v57  }
  0xb2   :  { %672 = vrot.lane.b32.xlu0 %v1176_v54, %s1481_s20  ;;  %679 = vrot.lane.b32.xlu1 %v1178_v56, %s1482_s23  ;;  %s1490_s20 = smov 30   ;;  %s1494_s23 = smov 3   ;;  %v1216_v54 = vld [vmem:[%s2456_s0 + $0x5] sm:$0x1]  }
  0xb3   :  { %v1218_v56 = vld [vmem:[%s2456_s0 + $0x1] ss:$7 sm:%s829_s24]   ;;  %s897_s24 = smov 3 }
  0xb4   :  { %v252_v59 = vpop.permute.xlu0 %251   ;;  %v260_v61 = vpop.permute.xlu1 %259   ;;  %v1236_v11 = vld [vmem:[%s2456_s0 + $0x7] ss:$-7 sm:%s897_s24]  }
  0xb5   :  { %1072 = vst.msk [vmem:[%s2457_s1 + $0xac] ss:$-146 sm:$0x3] %vm4_vm0, %v252_v59   ;;  %1074 = vst.msk [vmem:[%s2457_s1 + $0xeb] ss:$-146 sm:$0x3] %vm4_vm0, %v260_v61  }
  0xb6   :  { %687 = vrot.lane.b32.xlu0 %v1180_v58, %s1483_s2  ;;  %695 = vrot.lane.b32.xlu1 %v1182_v60, %s1484_s5  ;;  %s1488_s2 = smov 32   ;;  %v1220_v58 = vld [vmem:[%s2456_s0 + $0x4] sm:$0x1]  }
  0xb8   :  { %v267_v63 = vpop.permute.xlu0 %266   ;;  %v275_v1 = vpop.permute.xlu1 %274  }
  0xb9   :  { %1075 = vst.msk [vmem:[%s2457_s1 + $0x5] ss:$147 sm:$0x3] %vm4_vm0, %v267_v63   ;;  %1077 = vst.msk [vmem:[%s2457_s1 + $0x44] ss:$146 sm:$0x3] %vm4_vm0, %v275_v1  }
  0xba   :  { %702 = vrot.lane.b32.xlu0 %v1184_v62, %s1485_s13  ;;  %710 = vrot.lane.b32.xlu1 %v1186_v0, %s1486_s16  ;;  %s953_s16 = smov 3  ;;  %s814_s13 = smov 3  ;;  %v1224_v62 = vld [vmem:[%s2456_s0 + $0xa] ss:$-7 sm:%s852_s15]  }
  0xbb   :  { %v1251_v19 = vld [vmem:[%s2456_s0 + $0x2] ss:$7 sm:%s953_s16]   ;;  %v1226_v0 = vld [vmem:[%s2456_s0 + $0x6] sm:$0x1]   ;;  %s1513_s16 = smov 13  }
  0xbc   :  { %v282_v3 = vpop.permute.xlu0 %281   ;;  %v290_v5 = vpop.permute.xlu1 %289   ;;  %v956_v22 = vsel %vm955_vm3, %v1251_v19, %v1250_v18  ;;  %v1214_v52 = vld [vmem:[%s2456_s0 + $0x9] ss:$-7 sm:%s814_s13]   ;;  %vm1008_vm3 = vcmask 56328  }
  0xbd   :  { %1079 = vst.msk [vmem:[%s2457_s1 + $0x83] sm:$0x1] %vm4_vm0, %v282_v3   ;;  %1081 = vst.msk [vmem:[%s2457_s1 + $0xc2] ss:$-146 sm:$0x3] %vm4_vm0, %v290_v5  }
  0xbe   :  { %717 = vrot.lane.b32.xlu0 %v1188_v2, %s1487_s26  ;;  %725 = vrot.lane.b32.xlu1 %v1190_v4, %s1488_s2  ;;  %s980_s2 = smov 3  ;;  %s867_s26 = smov 3  ;;  %v1230_v4 = vld [vmem:[%s2456_s0 + $0x5] sm:$0x1]  }
  0xbf   :  { %v1258_v25 = vld [vmem:[%s2456_s0 + $0x7] ss:$-7 sm:%s980_s2]   ;;  %s799_s2 = smov 3  ;;  %v1228_v2 = vld [vmem:[%s2456_s0 + $0x9] ss:$-7 sm:%s867_s26]  }
  0xc0   :  { %v297_v9 = vpop.permute.xlu0 %296   ;;  %v305_v12 = vpop.permute.xlu1 %304   ;;  %v986_v30 = vsel %vm985_vm5, %v1259_v26, %v1258_v25  ;;  %v1210_v48 = vld [vmem:[%s2456_s0 + $0xa] ss:$-7 sm:%s799_s2]   ;;  %s1516_s2 = smov 10  }
  0xc1   :  { %1083 = vst.msk [vmem:[%s2457_s1 + $0x6e] sm:$0x1] %vm4_vm0, %v297_v9   ;;  %1085 = vst.msk [vmem:[%s2457_s1 + $0xad] ss:$-146 sm:$0x3] %vm4_vm0, %v305_v12  }
  0xc2   :  { %732 = vrot.lane.b32.xlu0 %v1192_v6, %s1489_s17  ;;  %740 = vrot.lane.b32.xlu1 %v1194_v7, %s1490_s20  ;;  %s1493_s20 = smov 4   ;;  %s776_s17 = smov 3  ;;  %v1234_v9 = vld [vmem:[%s2456_s0 + $0x4] sm:$0x1]  }
  0xc3   :  { %v1204_v42 = vld [vmem:[%s2456_s0 + $0x1] ss:$7 sm:%s776_s17]   ;;  %s1504_s17 = smov 22  }
  0xc4   :  { %v313_v16 = vpop.permute.xlu0 %312   ;;  %v320_v20 = vpop.permute.xlu1 %319  }
  0xc5   :  { %1087 = vst.msk [vmem:[%s2457_s1 + $0xec] ss:$-146 sm:$0x3] %vm4_vm0, %v313_v16   ;;  %1088 = vst.msk [vmem:[%s2457_s1 + $0x6] ss:$147 sm:$0x3] %vm4_vm0, %v320_v20  }
  0xc6   :  { %927 = vrot.lane.b32.xlu0 %v926_v14, %s1491_s4  ;;  %941 = vrot.lane.b32.xlu1 %v940_v17, %s1492_s9  ;;  %s1497_s9 = smov 29  }
  0xc8   :  { %v328_v23 = vpop.permute.xlu0 %327   ;;  %v335_v27 = vpop.permute.xlu1 %334  }
  0xc9   :  { %1090 = vst.msk [vmem:[%s2457_s1 + $0x45] ss:$147 sm:$0x3] %vm4_vm0, %v328_v23   ;;  %1092 = vst.msk [vmem:[%s2457_s1 + $0x84] sm:$0x1] %vm4_vm0, %v335_v27  }
  0xca   :  { %957 = vrot.lane.b32.xlu0 %v956_v22, %s1493_s20  ;;  %971 = vrot.lane.b32.xlu1 %v970_v24, %s1494_s23  ;;  %s1499_s20 = smov 27   ;;  %s1500_s23 = smov 26  }
  0xcc   :  { %v343_v31 = vpop.permute.xlu0 %342   ;;  %v350_v33 = vpop.permute.xlu1 %349  }
  0xcd   :  { %1094 = vst.msk [vmem:[%s2457_s1 + $0xc3] ss:$-146 sm:$0x3] %vm4_vm0, %v343_v31   ;;  %1096 = vst.msk [vmem:[%s2457_s1 + $0x70] sm:$0x1] %vm4_vm0, %v350_v33  }
  0xce   :  { %987 = vrot.lane.b32.xlu0 %v986_v30, %s1495_s27  ;;  %1003 = vrot.lane.b32.xlu1 %v1002_v32, %s1496_s30  ;;  %s905_s27 = smov 3 }
  0xcf   :  { %v1238_v13 = vld [vmem:[%s2456_s0 + $0xa] ss:$-7 sm:%s905_s27]  }
  0xd0   :  { %v358_v35 = vpop.permute.xlu0 %357   ;;  %v366_v37 = vpop.permute.xlu1 %365  }
  0xd1   :  { %1098 = vst.msk [vmem:[%s2457_s1 + $0xae] ss:$-146 sm:$0x3] %vm4_vm0, %v358_v35   ;;  %1100 = vst.msk [vmem:[%s2457_s1 + $0xed] ss:$-146 sm:$0x3] %vm4_vm0, %v366_v37  }
  0xd2   :  { %748 = vrot.lane.b32.xlu0 %v1196_v34, %s1497_s9  ;;  %755 = vrot.lane.b32.xlu1 %v1198_v36, %s1498_s12  ;;  %s882_s9 = smov 3  ;;  %s1518_s12 = smov 8  }
  0xd3   :  { %v1232_v7 = vld [vmem:[%s2456_s0 + $0x1] ss:$7 sm:%s882_s9]   ;;  %s1517_s9 = smov 9  }
  0xd4   :  { %v373_v39 = vpop.permute.xlu0 %372   ;;  %v381_v41 = vpop.permute.xlu1 %380  }
  0xd5   :  { %1101 = vst.msk [vmem:[%s2457_s1 + $0x8] ss:$146 sm:$0x3] %vm4_vm0, %v373_v39   ;;  %1103 = vst.msk [vmem:[%s2457_s1 + $0x46] ss:$147 sm:$0x3] %vm4_vm0, %v381_v41  }
  0xd6   :  { %763 = vrot.lane.b32.xlu0 %v1200_v38, %s1499_s20  ;;  %770 = vrot.lane.b32.xlu1 %v1202_v40, %s1500_s23 }
  0xd8   :  { %v388_v43 = vpop.permute.xlu0 %387   ;;  %v396_v45 = vpop.permute.xlu1 %395  }
  0xd9   :  { %1105 = vst.msk [vmem:[%s2457_s1 + $0x85] sm:$0x1] %vm4_vm0, %v388_v43   ;;  %1107 = vst.msk [vmem:[%s2457_s1 + $0xc4] ss:$-146 sm:$0x3] %vm4_vm0, %v396_v45  }
  0xda   :  { %778 = vrot.lane.b32.xlu0 %v1204_v42, %s1501_s3  ;;  %785 = vrot.lane.b32.xlu1 %v1206_v44, %s1502_s6  ;;  %s844_s6 = smov 3  ;;  %s1512_s3 = smov 14  }
  0xdb   :  { %v1222_v60 = vld [vmem:[%s2456_s0 + $0x7] ss:$-7 sm:%s844_s6]   ;;  %s2_s6 = smov 3 }
  0xdc   :  { %v403_v47 = vpop.permute.xlu0 %402   ;;  %v411_v49 = vpop.permute.xlu1 %410   ;;  %v3_v5 = vld [vmem:[%s2456_s0] ss:$7 sm:%s2_s6]  }
  0xdd   :  { %1109 = vst.msk [vmem:[%s2457_s1 + $0x71] sm:$0x1] %vm4_vm0, %v403_v47   ;;  %1111 = vst.msk [vmem:[%s2457_s1 + $0xb0] ss:$-147 sm:$0x3] %vm4_vm0, %v411_v49  }
  0xde   :  { %793 = vrot.lane.b32.xlu0 %v1208_v46, %s1503_s14  ;;  %801 = vrot.lane.b32.xlu1 %v1210_v48, %s1504_s17  ;;  %5 = vst.msk [vmem:[%s2457_s1] ss:$146 sm:$0x3] %vm4_vm0, %v3_v5  }
  0xe0   :  { %v419_v51 = vpop.permute.xlu0 %418   ;;  %v426_v53 = vpop.permute.xlu1 %425  }
  0xe1   :  { %1113 = vst.msk [vmem:[%s2457_s1 + $0xee] ss:$-146 sm:$0x3] %vm4_vm0, %v419_v51   ;;  %1114 = vst.msk [vmem:[%s2457_s1 + $0x9] ss:$146 sm:$0x3] %vm4_vm0, %v426_v53  }
  0xe2   :  { %808 = vrot.lane.b32.xlu0 %v1212_v50, %s1505_s25  ;;  %816 = vrot.lane.b32.xlu1 %v1214_v52, %s1506_s28  ;;  %s1515_s28 = smov 11  }
  0xe4   :  { %v434_v55 = vpop.permute.xlu0 %433   ;;  %v441_v57 = vpop.permute.xlu1 %440  }
  0xe5   :  { %1116 = vst.msk [vmem:[%s2457_s1 + $0x48] ss:$146 sm:$0x3] %vm4_vm0, %v434_v55   ;;  %1118 = vst.msk [vmem:[%s2457_s1 + $0x86] sm:$0x1] %vm4_vm0, %v441_v57  }
  0xe6   :  { %823 = vrot.lane.b32.xlu0 %v1216_v54, %s1507_s7  ;;  %831 = vrot.lane.b32.xlu1 %v1218_v56, %s1508_s10 }
  0xe8   :  { %v449_v59 = vpop.permute.xlu0 %448   ;;  %v456_v61 = vpop.permute.xlu1 %455  }
  0xe9   :  { %1120 = vst.msk [vmem:[%s2457_s1 + $0xc5] ss:$-146 sm:$0x3] %vm4_vm0, %v449_v59   ;;  %1122 = vst.msk [vmem:[%s2457_s1 + $0x72] sm:$0x1] %vm4_vm0, %v456_v61  }
  0xea   :  { %838 = vrot.lane.b32.xlu0 %v1220_v58, %s1509_s18  ;;  %846 = vrot.lane.b32.xlu1 %v1222_v60, %s1510_s21 }
  0xec   :  { %v464_v63 = vpop.permute.xlu0 %463   ;;  %v471_v1 = vpop.permute.xlu1 %470  }
  0xed   :  { %1124 = vst.msk [vmem:[%s2457_s1 + $0xb1] ss:$-147 sm:$0x3] %vm4_vm0, %v464_v63   ;;  %1126 = vst.msk [vmem:[%s2457_s1 + $0x5d] sm:$0x1] %vm4_vm0, %v471_v1  }
  0xee   :  { %854 = vrot.lane.b32.xlu0 %v1224_v62, %s1511_s29  ;;  %861 = vrot.lane.b32.xlu1 %v1226_v0, %s1512_s3 }
  0xf0   :  { %v478_v3 = vpop.permute.xlu0 %477   ;;  %v486_v6 = vpop.permute.xlu1 %485  }
  0xf1   :  { %1127 = vst.msk [vmem:[%s2457_s1 + $0xa] ss:$146 sm:$0x3] %vm4_vm0, %v478_v3   ;;  %1129 = vst.msk [vmem:[%s2457_s1 + $0x49] ss:$146 sm:$0x3] %vm4_vm0, %v486_v6  }
  0xf2   :  { %869 = vrot.lane.b32.xlu0 %v1228_v2, %s1513_s16  ;;  %876 = vrot.lane.b32.xlu1 %v1230_v4, %s1514_s19  ;;  %s1519_s16 = smov 7  }
  0xf4   :  { %v493_v8 = vpop.permute.xlu0 %492   ;;  %v501_v10 = vpop.permute.xlu1 %500  }
  0xf5   :  { %1131 = vst.msk [vmem:[%s2457_s1 + $0x88] sm:$0x1] %vm4_vm0, %v493_v8   ;;  %1133 = vst.msk [vmem:[%s2457_s1 + $0xc6] ss:$-146 sm:$0x3] %vm4_vm0, %v501_v10  }
  0xf6   :  { %884 = vrot.lane.b32.xlu0 %v1232_v7, %s1515_s28  ;;  %891 = vrot.lane.b32.xlu1 %v1234_v9, %s1516_s2 }
  0xf8   :  { %v508_v12 = vpop.permute.xlu0 %507   ;;  %v516_v14 = vpop.permute.xlu1 %515  }
  0xf9   :  { %1135 = vst.msk [vmem:[%s2457_s1 + $0x73] sm:$0x1] %vm4_vm0, %v508_v12   ;;  %1137 = vst.msk [vmem:[%s2457_s1 + $0x20] ss:$146 sm:$0x3] %vm4_vm0, %v516_v14  }
  0xfa   :  { %899 = vrot.lane.b32.xlu0 %v1236_v11, %s1517_s9  ;;  %907 = vrot.lane.b32.xlu1 %v1238_v13, %s1518_s12 }
  0xfc   :  { %v523_v16 = vpop.permute.xlu0 %522   ;;  %v530_v17 = vpop.permute.xlu1 %529  }
  0xfd   :  { %1139 = vst.msk [vmem:[%s2457_s1 + $0x5e] sm:$0x1] %vm4_vm0, %v523_v16   ;;  %1140 = vst.msk [vmem:[%s2457_s1 + $0xb] ss:$146 sm:$0x3] %vm4_vm0, %v530_v17  }
  0xfe   :  { %914 = vrot.lane.b32.xlu0 %v1240_v15, %s1519_s16 }
 0x100   :  { %v538_v18 = vpop.permute.xlu0 %537   ;;  %v545_v19 = vpop.permute.xlu1 %544  }
 0x101   :  { %1142 = vst.msk [vmem:[%s2457_s1 + $0x4a] ss:$146 sm:$0x3] %vm4_vm0, %v538_v18   ;;  %1144 = vst.msk [vmem:[%s2457_s1 + $0x89] sm:$0x1] %vm4_vm0, %v545_v19  }
 0x104   :  { %v553_v20 = vpop.permute.xlu0 %552   ;;  %v560_v21 = vpop.permute.xlu1 %559  }
 0x105   :  { %1146 = vst.msk [vmem:[%s2457_s1 + $0xc8] ss:$-147 sm:$0x3] %vm4_vm0, %v553_v20   ;;  %1148 = vst.msk [vmem:[%s2457_s1 + $0x74] sm:$0x1] %vm4_vm0, %v560_v21  }
 0x108   :  { %v568_v22 = vpop.permute.xlu0 %567   ;;  %v575_v23 = vpop.permute.xlu1 %574  }
 0x109   :  { %1150 = vst.msk [vmem:[%s2457_s1 + $0x21] ss:$146 sm:$0x3] %vm4_vm0, %v568_v22   ;;  %1152 = vst.msk [vmem:[%s2457_s1 + $0x60] sm:$0x1] %vm4_vm0, %v575_v23  }
 0x10c   :  { %v582_v24 = vpop.permute.xlu0 %581   ;;  %v590_v25 = vpop.permute.xlu1 %589  }
 0x10d   :  { %1153 = vst.msk [vmem:[%s2457_s1 + $0xc] ss:$146 sm:$0x3] %vm4_vm0, %v582_v24   ;;  %1155 = vst.msk [vmem:[%s2457_s1 + $0x4b] ss:$146 sm:$0x3] %vm4_vm0, %v590_v25  }
 0x110   :  { %v597_v26 = vpop.permute.xlu0 %596   ;;  %v605_v27 = vpop.permute.xlu1 %604  }
 0x111   :  { %1157 = vst.msk [vmem:[%s2457_s1 + $0x8a] sm:$0x1] %vm4_vm0, %v597_v26   ;;  %1159 = vst.msk [vmem:[%s2457_s1 + $0xc9] ss:$-147 sm:$0x3] %vm4_vm0, %v605_v27  }
 0x114   :  { %v612_v28 = vpop.permute.xlu0 %611   ;;  %v620_v29 = vpop.permute.xlu1 %619  }
 0x115   :  { %1161 = vst.msk [vmem:[%s2457_s1 + $0x75] sm:$0x1] %vm4_vm0, %v612_v28   ;;  %1163 = vst.msk [vmem:[%s2457_s1 + $0x22] ss:$146 sm:$0x3] %vm4_vm0, %v620_v29  }
 0x118   :  { %v627_v30 = vpop.permute.xlu0 %626   ;;  %v635_v31 = vpop.permute.xlu1 %634  }
 0x119   :  { %1165 = vst.msk [vmem:[%s2457_s1 + $0x61] sm:$0x1] %vm4_vm0, %v627_v30   ;;  %1167 = vst.msk [vmem:[%s2457_s1 + $0xa0] ss:$-147 sm:$0x3] %vm4_vm0, %v635_v31  }
 0x11c   :  { %v643_v32 = vpop.permute.xlu0 %642   ;;  %v650_v33 = vpop.permute.xlu1 %649  }
 0x11d   :  { %1169 = vst.msk [vmem:[%s2457_s1 + $0x4c] ss:$146 sm:$0x3] %vm4_vm0, %v643_v32   ;;  %1171 = vst.msk [vmem:[%s2457_s1 + $0x8b] sm:$0x1] %vm4_vm0, %v650_v33  }
 0x120   :  { %v658_v34 = vpop.permute.xlu0 %657   ;;  %v665_v35 = vpop.permute.xlu1 %664  }
 0x121   :  { %1173 = vst.msk [vmem:[%s2457_s1 + $0xca] ss:$-146 sm:$0x3] %vm4_vm0, %v658_v34   ;;  %1175 = vst.msk [vmem:[%s2457_s1 + $0x76] sm:$0x1] %vm4_vm0, %v665_v35  }
 0x124   :  { %v673_v36 = vpop.permute.xlu0 %672   ;;  %v680_v37 = vpop.permute.xlu1 %679  }
 0x125   :  { %1177 = vst.msk [vmem:[%s2457_s1 + $0x23] ss:$146 sm:$0x3] %vm4_vm0, %v673_v36   ;;  %1179 = vst.msk [vmem:[%s2457_s1 + $0x62] sm:$0x1] %vm4_vm0, %v680_v37  }
 0x128   :  { %v688_v38 = vpop.permute.xlu0 %687   ;;  %v696_v39 = vpop.permute.xlu1 %695  }
 0x129   :  { %1181 = vst.msk [vmem:[%s2457_s1 + $0xa1] ss:$-147 sm:$0x3] %vm4_vm0, %v688_v38   ;;  %1183 = vst.msk [vmem:[%s2457_s1 + $0xe0] ss:$-147 sm:$0x3] %vm4_vm0, %v696_v39  }
 0x12c   :  { %v703_v40 = vpop.permute.xlu0 %702   ;;  %v711_v41 = vpop.permute.xlu1 %710  }
 0x12d   :  { %1185 = vst.msk [vmem:[%s2457_s1 + $0x8c] sm:$0x1] %vm4_vm0, %v703_v40   ;;  %1187 = vst.msk [vmem:[%s2457_s1 + $0xcb] ss:$-146 sm:$0x3] %vm4_vm0, %v711_v41  }
 0x130   :  { %v718_v42 = vpop.permute.xlu0 %717   ;;  %v726_v43 = vpop.permute.xlu1 %725  }
 0x131   :  { %1189 = vst.msk [vmem:[%s2457_s1 + $0x78] sm:$0x1] %vm4_vm0, %v718_v42   ;;  %1191 = vst.msk [vmem:[%s2457_s1 + $0x24] ss:$146 sm:$0x3] %vm4_vm0, %v726_v43  }
 0x134   :  { %v733_v44 = vpop.permute.xlu0 %732   ;;  %v741_v45 = vpop.permute.xlu1 %740  }
 0x135   :  { %1193 = vst.msk [vmem:[%s2457_s1 + $0x63] sm:$0x1] %vm4_vm0, %v733_v44   ;;  %1195 = vst.msk [vmem:[%s2457_s1 + $0xa2] ss:$-146 sm:$0x3] %vm4_vm0, %v741_v45  }
 0x138   :  { %v928_v46 = vpop.permute.xlu0 %927   ;;  %v942_v47 = vpop.permute.xlu1 %941  }
 0x139   :  { %1244 = vst.msk [vmem:[%s2457_s1 + $0xd0] ss:$-147 sm:$0x3] %vm929_vm7, %v928_v46  }
 0x13a   :  { %1245 = vst.msk [vmem:[%s2457_s1 + $0xd0] ss:$-147 sm:$0x3] %vm932_vm8, %v928_v46  }
 0x13b   :  { %1248 = vst.msk [vmem:[%s2457_s1 + $0x7c] sm:$0x1] %vm943_vm9, %v942_v47  }
 0x13c   :  { %1249 = vst.msk [vmem:[%s2457_s1 + $0x7c] sm:$0x1] %vm946_vm10, %v942_v47   ;;  %v958_v48 = vpop.permute.xlu0 %957   ;;  %v972_v49 = vpop.permute.xlu1 %971  }
 0x13d   :  { %1252 = vst.msk [vmem:[%s2457_s1 + $0x29] ss:$146 sm:$0x3] %vm959_vm11, %v958_v48  }
 0x13e   :  { %1253 = vst.msk [vmem:[%s2457_s1 + $0x29] ss:$146 sm:$0x3] %vm962_vm12, %v958_v48  }
 0x13f   :  { %1256 = vst.msk [vmem:[%s2457_s1 + $0x68] sm:$0x1] %vm973_vm13, %v972_v49  }
 0x140   :  { %1257 = vst.msk [vmem:[%s2457_s1 + $0x68] sm:$0x1] %vm976_vm14, %v972_v49   ;;  %v988_v50 = vpop.permute.xlu0 %987   ;;  %v1004_v51 = vpop.permute.xlu1 %1003  }
 0x141   :  { %1260 = vst.msk [vmem:[%s2457_s1 + $0xa6] ss:$-146 sm:$0x3] %vm989_vm15, %v988_v50  }
 0x142   :  { %1261 = vst.msk [vmem:[%s2457_s1 + $0xa6] ss:$-146 sm:$0x3] %vm992_vm1, %v988_v50  }
 0x143   :  { %1264 = vst.msk [vmem:[%s2457_s1 + $0xe5] ss:$-146 sm:$0x3] %vm1005_vm2, %v1004_v51  }
 0x144   :  { %1265 = vst.msk [vmem:[%s2457_s1 + $0xe5] ss:$-146 sm:$0x3] %vm1008_vm3, %v1004_v51   ;;  %v749_v52 = vpop.permute.xlu0 %748   ;;  %v756_v53 = vpop.permute.xlu1 %755  }
 0x145   :  { %1197 = vst.msk [vmem:[%s2457_s1 + $0xe1] ss:$-147 sm:$0x3] %vm4_vm0, %v749_v52   ;;  %1199 = vst.msk [vmem:[%s2457_s1 + $0x8d] sm:$0x1] %vm4_vm0, %v756_v53  }
 0x148   :  { %v764_v54 = vpop.permute.xlu0 %763   ;;  %v771_v55 = vpop.permute.xlu1 %770  }
 0x149   :  { %1201 = vst.msk [vmem:[%s2457_s1 + $0xcc] ss:$-146 sm:$0x3] %vm4_vm0, %v764_v54   ;;  %1203 = vst.msk [vmem:[%s2457_s1 + $0x79] sm:$0x1] %vm4_vm0, %v771_v55  }
 0x14c   :  { %v779_v56 = vpop.permute.xlu0 %778   ;;  %v786_v57 = vpop.permute.xlu1 %785  }
 0x14d   :  { %1205 = vst.msk [vmem:[%s2457_s1 + $0x25] ss:$147 sm:$0x3] %vm4_vm0, %v779_v56   ;;  %1207 = vst.msk [vmem:[%s2457_s1 + $0x64] sm:$0x1] %vm4_vm0, %v786_v57  }
 0x150   :  { %v794_v58 = vpop.permute.xlu0 %793   ;;  %v802_v59 = vpop.permute.xlu1 %801  }
 0x151   :  { %1209 = vst.msk [vmem:[%s2457_s1 + $0xa3] ss:$-146 sm:$0x3] %vm4_vm0, %v794_v58   ;;  %1211 = vst.msk [vmem:[%s2457_s1 + $0xe2] ss:$-146 sm:$0x3] %vm4_vm0, %v802_v59  }
 0x154   :  { %v809_v60 = vpop.permute.xlu0 %808   ;;  %v817_v61 = vpop.permute.xlu1 %816  }
 0x155   :  { %1213 = vst.msk [vmem:[%s2457_s1 + $0x8e] sm:$0x1] %vm4_vm0, %v809_v60   ;;  %1215 = vst.msk [vmem:[%s2457_s1 + $0xcd] ss:$-146 sm:$0x3] %vm4_vm0, %v817_v61  }
 0x158   :  { %v824_v62 = vpop.permute.xlu0 %823   ;;  %v832_v63 = vpop.permute.xlu1 %831  }
 0x159   :  { %1217 = vst.msk [vmem:[%s2457_s1 + $0x7a] sm:$0x1] %vm4_vm0, %v824_v62   ;;  %1219 = vst.msk [vmem:[%s2457_s1 + $0x26] ss:$147 sm:$0x3] %vm4_vm0, %v832_v63  }
 0x15c   :  { %v839_v0 = vpop.permute.xlu0 %838   ;;  %v847_v1 = vpop.permute.xlu1 %846  }
 0x15d   :  { %1221 = vst.msk [vmem:[%s2457_s1 + $0x65] sm:$0x1] %vm4_vm0, %v839_v0   ;;  %1223 = vst.msk [vmem:[%s2457_s1 + $0xa4] ss:$-146 sm:$0x3] %vm4_vm0, %v847_v1  }
 0x160   :  { %v855_v2 = vpop.permute.xlu0 %854   ;;  %v862_v3 = vpop.permute.xlu1 %861  }
 0x161   :  { %1225 = vst.msk [vmem:[%s2457_s1 + $0xe3] ss:$-146 sm:$0x3] %vm4_vm0, %v855_v2   ;;  %1227 = vst.msk [vmem:[%s2457_s1 + $0x90] sm:$0x1] %vm4_vm0, %v862_v3  }
 0x164   :  { %v870_v4 = vpop.permute.xlu0 %869   ;;  %v877_v5 = vpop.permute.xlu1 %876  }
 0x165   :  { %1229 = vst.msk [vmem:[%s2457_s1 + $0xce] ss:$-146 sm:$0x3] %vm4_vm0, %v870_v4   ;;  %1231 = vst.msk [vmem:[%s2457_s1 + $0x7b] sm:$0x1] %vm4_vm0, %v877_v5  }
 0x168   :  { %v885_v6 = vpop.permute.xlu0 %884   ;;  %v892_v7 = vpop.permute.xlu1 %891  }
 0x169   :  { %1233 = vst.msk [vmem:[%s2457_s1 + $0x28] ss:$146 sm:$0x3] %vm4_vm0, %v885_v6   ;;  %1235 = vst.msk [vmem:[%s2457_s1 + $0x66] sm:$0x1] %vm4_vm0, %v892_v7  }
 0x16c   :  { %v900_v8 = vpop.permute.xlu0 %899   ;;  %v908_v9 = vpop.permute.xlu1 %907  }
 0x16d   :  { %1237 = vst.msk [vmem:[%s2457_s1 + $0xa5] ss:$-146 sm:$0x3] %vm4_vm0, %v900_v8   ;;  %1239 = vst.msk [vmem:[%s2457_s1 + $0xe4] ss:$-146 sm:$0x3] %vm4_vm0, %v908_v9  }
 0x170   :  { %v915_v10 = vpop.permute.xlu0 %914  }
 0x171   :  { %1241 = vst.msk [vmem:[%s2457_s1 + $0x91] sm:$0x1] %vm4_vm0, %v915_v10  }

// kernel: fwd.59
= control target key start
LH: loop header
LB: loop body
LE: loop exit
PB: predicated region body
PF: predicated region fallthrough
CT: control target
= control target key end

     0   :  { %s1953_s12 = smov 0   ;;  %s1955_s13 = smov 0   ;;  %s2442_s0 = inlined_call_operand.vmem [shape: bf16[8,256], index: 0, kind: input, shape index: {}]   ;;  %s2443_s1 = inlined_call_operand.vmem [shape: bf16[256,2048], index: 1, kind: input, shape index: {}]   ;;  %s2444_s2 = inlined_call_operand.vmem [shape: f32[1,2048], index: 2, kind: input, shape index: {}]   ;;  %s2445_s3 = inlined_call_operand.vmem [shape: f32[8,2048], index: 3, kind: output, shape index: {}]  }
   0x1   :  { %s1957_s14 = smov 0   ;;  %s1959_s15 = smov 0  }
   0x2   :  { %s1961_s16 = smov 0  }
   0x3 LB: > { %s28_s17 = sadd.s32 1, %s1927_s15  ;;  %p76_p1 = scmp.ne.s32.totalorder %s1919_s13, %s1915_s12  ;;  %s1931_s16 = sphi %s1961_s16, %s13_s16   ;;  %s1927_s15 = sphi %s1959_s15, %s2449_s15   ;;  %s1923_s14 = sphi %s1957_s14, %s2448_s14   ;;  %s1919_s13 = sphi %s1955_s13, %s2447_s13   ;;  %s1915_s12 = sphi %s1953_s12, %s2446_s12  }
   0x4   : > { %p30_p0 = scmp.ge.s32.totalorder %s28_s17, 2  ;;  %p77_p2 = scmp.eq.s32.totalorder %s1931_s16, 0 }
   0x5   : > { %s69_s19 = sadd.s32 1, %s1919_s13  ;;  %p1709_p5 = scmp.ge.s32.totalorder %s1931_s16, 2 }
   0x6   : > { %s2451_s17 = smov (%p30_p0, %s28_s17), 0  ;;  %p78_p3 = por %p77_p2, %p76_p1 }
   0x7   : > { %s65_s18 = ssub.s32 %s1927_s15, %s2451_s17  ;;  %169 = sbr.rel (%p1709_p5) target bundleno = 82 (0x52), region = 20 }
   0x8   : > { %p67_p4 = scmp.eq.s32.totalorder %s65_s18, 0 }
   0xa   : > { %s1988_s20 = scalar_select %p67_p4, %s1919_s13, %s69_s19  }
   0xe   : > { %172 = sbr.rel (!%p78_p3) target bundleno = 82 (0x52), region = 24  ;;  %s174_s21 = sand.u32 (%p78_p3), 1, %s1919_s13  }
   0xf   : > { %s1850_s22 = sshll.u32 (%p78_p3), %s1927_s15, 5  ;;  %s1710_s23 = sshll.u32 (%p78_p3), %s174_s21, 10 }
  0x10   : > { %s1996_s26 = scalar_lea.vmem (%p78_p3), %s2443_s1, %s1850_s22  ;;  %s2001_s27 = scalar_lea.vmem (%p78_p3), [#allocation3], %s1710_s23 }
  0x11   : > { %v195_v0 = vld [vmem:[%s1996_s26] sm:$0xff] (%p78_p3)  ;;  %v197_v1 = vld [vmem:[%s1996_s26 + $0x8] sm:$0xff] (%p78_p3)  ;;  %v199_v2 = vld [vmem:[%s1996_s26 + $0x10] sm:$0xff] (%p78_p3) }
  0x12   : > { %196 = vst [vmem:[%s2001_s27] sm:$0xff] (%p78_p3), %v195_v0  ;;  %198 = vst [vmem:[%s2001_s27 + $0x8] sm:$0xff] (%p78_p3), %v197_v1  ;;  %v201_v3 = vld [vmem:[%s1996_s26 + $0x18] sm:$0xff] (%p78_p3)  ;;  %v203_v4 = vld [vmem:[%s1996_s26 + $0x40] sm:$0xff] (%p78_p3) }
  0x13   : > { %200 = vst [vmem:[%s2001_s27 + $0x10] sm:$0xff] (%p78_p3), %v199_v2  ;;  %v205_v5 = vld [vmem:[%s1996_s26 + $0x48] sm:$0xff] (%p78_p3)  ;;  %202 = vst [vmem:[%s2001_s27 + $0x18] sm:$0xff] (%p78_p3), %v201_v3  ;;  %v207_v6 = vld [vmem:[%s1996_s26 + $0x50] sm:$0xff] (%p78_p3) }
  0x14   : > { %204 = vst [vmem:[%s2001_s27 + $0x20] sm:$0xff] (%p78_p3), %v203_v4  ;;  %206 = vst [vmem:[%s2001_s27 + $0x28] sm:$0xff] (%p78_p3), %v205_v5  ;;  %v209_v7 = vld [vmem:[%s1996_s26 + $0x58] sm:$0xff] (%p78_p3)  ;;  %v211_v8 = vld [vmem:[%s1996_s26 + $0x80] sm:$0xff] (%p78_p3) }
  0x15   : > { %208 = vst [vmem:[%s2001_s27 + $0x30] sm:$0xff] %v207_v6  ;;  %210 = vst [vmem:[%s2001_s27 + $0x38] sm:$0xff] %v209_v7  ;;  %v213_v9 = vld [vmem:[%s1996_s26 + $0x88] sm:$0xff]  ;;  %v215_v10 = vld [vmem:[%s1996_s26 + $0x90] sm:$0xff] }
  0x16   : > { %212 = vst [vmem:[%s2001_s27 + $0x40] sm:$0xff] %v211_v8  ;;  %v217_v11 = vld [vmem:[%s1996_s26 + $0x98] sm:$0xff]  ;;  %214 = vst [vmem:[%s2001_s27 + $0x48] sm:$0xff] %v213_v9  ;;  %v219_v12 = vld [vmem:[%s1996_s26 + $0xc0] sm:$0xff] }
  0x17   : > { %216 = vst [vmem:[%s2001_s27 + $0x50] sm:$0xff] %v215_v10  ;;  %218 = vst [vmem:[%s2001_s27 + $0x58] sm:$0xff] %v217_v11  ;;  %v221_v13 = vld [vmem:[%s1996_s26 + $0xc8] sm:$0xff]  ;;  %v223_v14 = vld [vmem:[%s1996_s26 + $0xd0] sm:$0xff] }
  0x18   : > { %220 = vst [vmem:[%s2001_s27 + $0x60] sm:$0xff] %v219_v12  ;;  %222 = vst [vmem:[%s2001_s27 + $0x68] sm:$0xff] %v221_v13  ;;  %v225_v15 = vld [vmem:[%s1996_s26 + $0xd8] sm:$0xff]  ;;  %v227_v16 = vld [vmem:[%s1996_s26 + $0x100] sm:$0xff] }
  0x19   : > { %224 = vst [vmem:[%s2001_s27 + $0x70] sm:$0xff] %v223_v14  ;;  %v229_v17 = vld [vmem:[%s1996_s26 + $0x108] sm:$0xff]  ;;  %226 = vst [vmem:[%s2001_s27 + $0x78] sm:$0xff] %v225_v15  ;;  %v231_v18 = vld [vmem:[%s1996_s26 + $0x110] sm:$0xff] }
  0x1a   : > { %228 = vst [vmem:[%s2001_s27 + $0x80] sm:$0xff] %v227_v16  ;;  %230 = vst [vmem:[%s2001_s27 + $0x88] sm:$0xff] %v229_v17  ;;  %v233_v19 = vld [vmem:[%s1996_s26 + $0x118] sm:$0xff]  ;;  %v235_v20 = vld [vmem:[%s1996_s26 + $0x140] sm:$0xff] }
  0x1b   : > { %232 = vst [vmem:[%s2001_s27 + $0x90] sm:$0xff] %v231_v18  ;;  %234 = vst [vmem:[%s2001_s27 + $0x98] sm:$0xff] %v233_v19  ;;  %v237_v21 = vld [vmem:[%s1996_s26 + $0x148] sm:$0xff]  ;;  %v239_v22 = vld [vmem:[%s1996_s26 + $0x150] sm:$0xff] }
  0x1c   : > { %236 = vst [vmem:[%s2001_s27 + $0xa0] sm:$0xff] %v235_v20  ;;  %v241_v23 = vld [vmem:[%s1996_s26 + $0x158] sm:$0xff]  ;;  %238 = vst [vmem:[%s2001_s27 + $0xa8] sm:$0xff] %v237_v21  ;;  %v243_v24 = vld [vmem:[%s1996_s26 + $0x180] sm:$0xff] }
  0x1d   : > { %240 = vst [vmem:[%s2001_s27 + $0xb0] sm:$0xff] %v239_v22  ;;  %242 = vst [vmem:[%s2001_s27 + $0xb8] sm:$0xff] %v241_v23  ;;  %v245_v25 = vld [vmem:[%s1996_s26 + $0x188] sm:$0xff]  ;;  %v247_v26 = vld [vmem:[%s1996_s26 + $0x190] sm:$0xff] }
  0x1e   : > { %244 = vst [vmem:[%s2001_s27 + $0xc0] sm:$0xff] %v243_v24  ;;  %246 = vst [vmem:[%s2001_s27 + $0xc8] sm:$0xff] %v245_v25  ;;  %v249_v27 = vld [vmem:[%s1996_s26 + $0x198] sm:$0xff]  ;;  %v251_v28 = vld [vmem:[%s1996_s26 + $0x1c0] sm:$0xff] }
  0x1f   : > { %248 = vst [vmem:[%s2001_s27 + $0xd0] sm:$0xff] %v247_v26  ;;  %v253_v29 = vld [vmem:[%s1996_s26 + $0x1c8] sm:$0xff]  ;;  %250 = vst [vmem:[%s2001_s27 + $0xd8] sm:$0xff] %v249_v27  ;;  %v255_v30 = vld [vmem:[%s1996_s26 + $0x1d0] sm:$0xff] }
  0x20   : > { %252 = vst [vmem:[%s2001_s27 + $0xe0] sm:$0xff] %v251_v28  ;;  %254 = vst [vmem:[%s2001_s27 + $0xe8] sm:$0xff] %v253_v29  ;;  %v257_v31 = vld [vmem:[%s1996_s26 + $0x1d8] sm:$0xff]  ;;  %v259_v32 = vld [vmem:[%s1996_s26 + $0x200] sm:$0xff] }
  0x21   : > { %256 = vst [vmem:[%s2001_s27 + $0xf0] sm:$0xff] %v255_v30  ;;  %258 = vst [vmem:[%s2001_s27 + $0xf8] sm:$0xff] %v257_v31  ;;  %v261_v33 = vld [vmem:[%s1996_s26 + $0x208] sm:$0xff]  ;;  %v263_v34 = vld [vmem:[%s1996_s26 + $0x210] sm:$0xff] }
  0x22   : > { %260 = vst [vmem:[%s2001_s27 + $0x100] sm:$0xff] %v259_v32  ;;  %v265_v35 = vld [vmem:[%s1996_s26 + $0x218] sm:$0xff]  ;;  %262 = vst [vmem:[%s2001_s27 + $0x108] sm:$0xff] %v261_v33  ;;  %v267_v36 = vld [vmem:[%s1996_s26 + $0x240] sm:$0xff] }
  0x23   : > { %264 = vst [vmem:[%s2001_s27 + $0x110] sm:$0xff] %v263_v34  ;;  %266 = vst [vmem:[%s2001_s27 + $0x118] sm:$0xff] %v265_v35  ;;  %v269_v37 = vld [vmem:[%s1996_s26 + $0x248] sm:$0xff]  ;;  %v271_v38 = vld [vmem:[%s1996_s26 + $0x250] sm:$0xff] }
  0x24   : > { %268 = vst [vmem:[%s2001_s27 + $0x120] sm:$0xff] %v267_v36  ;;  %270 = vst [vmem:[%s2001_s27 + $0x128] sm:$0xff] %v269_v37  ;;  %v273_v39 = vld [vmem:[%s1996_s26 + $0x258] sm:$0xff]  ;;  %v275_v40 = vld [vmem:[%s1996_s26 + $0x280] sm:$0xff] }
  0x25   : > { %272 = vst [vmem:[%s2001_s27 + $0x130] sm:$0xff] %v271_v38  ;;  %v277_v41 = vld [vmem:[%s1996_s26 + $0x288] sm:$0xff]  ;;  %274 = vst [vmem:[%s2001_s27 + $0x138] sm:$0xff] %v273_v39  ;;  %v279_v42 = vld [vmem:[%s1996_s26 + $0x290] sm:$0xff] }
  0x26   : > { %276 = vst [vmem:[%s2001_s27 + $0x140] sm:$0xff] %v275_v40  ;;  %278 = vst [vmem:[%s2001_s27 + $0x148] sm:$0xff] %v277_v41  ;;  %v281_v43 = vld [vmem:[%s1996_s26 + $0x298] sm:$0xff]  ;;  %v283_v44 = vld [vmem:[%s1996_s26 + $0x2c0] sm:$0xff] }
  0x27   : > { %280 = vst [vmem:[%s2001_s27 + $0x150] sm:$0xff] %v279_v42  ;;  %282 = vst [vmem:[%s2001_s27 + $0x158] sm:$0xff] %v281_v43  ;;  %v285_v45 = vld [vmem:[%s1996_s26 + $0x2c8] sm:$0xff]  ;;  %v287_v46 = vld [vmem:[%s1996_s26 + $0x2d0] sm:$0xff] }
  0x28   : > { %284 = vst [vmem:[%s2001_s27 + $0x160] sm:$0xff] %v283_v44  ;;  %v289_v47 = vld [vmem:[%s1996_s26 + $0x2d8] sm:$0xff]  ;;  %286 = vst [vmem:[%s2001_s27 + $0x168] sm:$0xff] %v285_v45  ;;  %v291_v48 = vld [vmem:[%s1996_s26 + $0x300] sm:$0xff] }
  0x29   : > { %288 = vst [vmem:[%s2001_s27 + $0x170] sm:$0xff] %v287_v46  ;;  %290 = vst [vmem:[%s2001_s27 + $0x178] sm:$0xff] %v289_v47  ;;  %v293_v49 = vld [vmem:[%s1996_s26 + $0x308] sm:$0xff]  ;;  %v295_v50 = vld [vmem:[%s1996_s26 + $0x310] sm:$0xff] }
  0x2a   : > { %292 = vst [vmem:[%s2001_s27 + $0x180] sm:$0xff] %v291_v48  ;;  %294 = vst [vmem:[%s2001_s27 + $0x188] sm:$0xff] %v293_v49  ;;  %v297_v51 = vld [vmem:[%s1996_s26 + $0x318] sm:$0xff]  ;;  %v299_v52 = vld [vmem:[%s1996_s26 + $0x340] sm:$0xff] }
  0x2b   : > { %296 = vst [vmem:[%s2001_s27 + $0x190] sm:$0xff] %v295_v50  ;;  %v301_v53 = vld [vmem:[%s1996_s26 + $0x348] sm:$0xff]  ;;  %298 = vst [vmem:[%s2001_s27 + $0x198] sm:$0xff] %v297_v51  ;;  %v303_v54 = vld [vmem:[%s1996_s26 + $0x350] sm:$0xff] }
  0x2c   : > { %300 = vst [vmem:[%s2001_s27 + $0x1a0] sm:$0xff] %v299_v52  ;;  %302 = vst [vmem:[%s2001_s27 + $0x1a8] sm:$0xff] %v301_v53  ;;  %v305_v55 = vld [vmem:[%s1996_s26 + $0x358] sm:$0xff]  ;;  %v307_v56 = vld [vmem:[%s1996_s26 + $0x380] sm:$0xff] }
  0x2d   : > { %304 = vst [vmem:[%s2001_s27 + $0x1b0] sm:$0xff] %v303_v54  ;;  %306 = vst [vmem:[%s2001_s27 + $0x1b8] sm:$0xff] %v305_v55  ;;  %v309_v57 = vld [vmem:[%s1996_s26 + $0x388] sm:$0xff]  ;;  %v311_v58 = vld [vmem:[%s1996_s26 + $0x390] sm:$0xff] }
  0x2e   : > { %308 = vst [vmem:[%s2001_s27 + $0x1c0] sm:$0xff] %v307_v56  ;;  %v313_v59 = vld [vmem:[%s1996_s26 + $0x398] sm:$0xff]  ;;  %310 = vst [vmem:[%s2001_s27 + $0x1c8] sm:$0xff] %v309_v57  ;;  %v315_v60 = vld [vmem:[%s1996_s26 + $0x3c0] sm:$0xff] }
  0x2f   : > { %312 = vst [vmem:[%s2001_s27 + $0x1d0] sm:$0xff] %v311_v58  ;;  %314 = vst [vmem:[%s2001_s27 + $0x1d8] sm:$0xff] %v313_v59  ;;  %v317_v61 = vld [vmem:[%s1996_s26 + $0x3c8] sm:$0xff]  ;;  %v319_v62 = vld [vmem:[%s1996_s26 + $0x3d0] sm:$0xff] }
  0x30   : > { %316 = vst [vmem:[%s2001_s27 + $0x1e0] sm:$0xff] %v315_v60  ;;  %318 = vst [vmem:[%s2001_s27 + $0x1e8] sm:$0xff] %v317_v61  ;;  %v321_v63 = vld [vmem:[%s1996_s26 + $0x3d8] sm:$0xff]  ;;  %v323_v0 = vld [vmem:[%s1996_s26 + $0x400] sm:$0xff] }
  0x31   : > { %320 = vst [vmem:[%s2001_s27 + $0x1f0] sm:$0xff] %v319_v62  ;;  %v325_v1 = vld [vmem:[%s1996_s26 + $0x408] sm:$0xff]  ;;  %322 = vst [vmem:[%s2001_s27 + $0x1f8] sm:$0xff] %v321_v63  ;;  %v327_v2 = vld [vmem:[%s1996_s26 + $0x410] sm:$0xff] }
  0x32   : > { %324 = vst [vmem:[%s2001_s27 + $0x200] sm:$0xff] %v323_v0  ;;  %326 = vst [vmem:[%s2001_s27 + $0x208] sm:$0xff] %v325_v1  ;;  %v329_v3 = vld [vmem:[%s1996_s26 + $0x418] sm:$0xff]  ;;  %v331_v4 = vld [vmem:[%s1996_s26 + $0x440] sm:$0xff] }
  0x33   : > { %328 = vst [vmem:[%s2001_s27 + $0x210] sm:$0xff] %v327_v2  ;;  %330 = vst [vmem:[%s2001_s27 + $0x218] sm:$0xff] %v329_v3  ;;  %v333_v5 = vld [vmem:[%s1996_s26 + $0x448] sm:$0xff]  ;;  %v335_v6 = vld [vmem:[%s1996_s26 + $0x450] sm:$0xff] }
  0x34   : > { %332 = vst [vmem:[%s2001_s27 + $0x220] sm:$0xff] %v331_v4  ;;  %v337_v7 = vld [vmem:[%s1996_s26 + $0x458] sm:$0xff]  ;;  %334 = vst [vmem:[%s2001_s27 + $0x228] sm:$0xff] %v333_v5  ;;  %v339_v8 = vld [vmem:[%s1996_s26 + $0x480] sm:$0xff] }
  0x35   : > { %336 = vst [vmem:[%s2001_s27 + $0x230] sm:$0xff] %v335_v6  ;;  %338 = vst [vmem:[%s2001_s27 + $0x238] sm:$0xff] %v337_v7  ;;  %v341_v9 = vld [vmem:[%s1996_s26 + $0x488] sm:$0xff]  ;;  %v343_v10 = vld [vmem:[%s1996_s26 + $0x490] sm:$0xff] }
  0x36   : > { %340 = vst [vmem:[%s2001_s27 + $0x240] sm:$0xff] %v339_v8  ;;  %342 = vst [vmem:[%s2001_s27 + $0x248] sm:$0xff] %v341_v9  ;;  %v345_v11 = vld [vmem:[%s1996_s26 + $0x498] sm:$0xff]  ;;  %v347_v12 = vld [vmem:[%s1996_s26 + $0x4c0] sm:$0xff] }
  0x37   : > { %344 = vst [vmem:[%s2001_s27 + $0x250] sm:$0xff] %v343_v10  ;;  %v349_v13 = vld [vmem:[%s1996_s26 + $0x4c8] sm:$0xff]  ;;  %346 = vst [vmem:[%s2001_s27 + $0x258] sm:$0xff] %v345_v11  ;;  %v351_v14 = vld [vmem:[%s1996_s26 + $0x4d0] sm:$0xff] }
  0x38   : > { %348 = vst [vmem:[%s2001_s27 + $0x260] sm:$0xff] %v347_v12  ;;  %350 = vst [vmem:[%s2001_s27 + $0x268] sm:$0xff] %v349_v13  ;;  %v353_v15 = vld [vmem:[%s1996_s26 + $0x4d8] sm:$0xff]  ;;  %v355_v16 = vld [vmem:[%s1996_s26 + $0x500] sm:$0xff] }
  0x39   : > { %352 = vst [vmem:[%s2001_s27 + $0x270] sm:$0xff] %v351_v14  ;;  %354 = vst [vmem:[%s2001_s27 + $0x278] sm:$0xff] %v353_v15  ;;  %v357_v17 = vld [vmem:[%s1996_s26 + $0x508] sm:$0xff]  ;;  %v359_v18 = vld [vmem:[%s1996_s26 + $0x510] sm:$0xff] }
  0x3a   : > { %356 = vst [vmem:[%s2001_s27 + $0x280] sm:$0xff] %v355_v16  ;;  %v361_v19 = vld [vmem:[%s1996_s26 + $0x518] sm:$0xff]  ;;  %358 = vst [vmem:[%s2001_s27 + $0x288] sm:$0xff] %v357_v17  ;;  %v363_v20 = vld [vmem:[%s1996_s26 + $0x540] sm:$0xff] }
  0x3b   : > { %360 = vst [vmem:[%s2001_s27 + $0x290] sm:$0xff] %v359_v18  ;;  %362 = vst [vmem:[%s2001_s27 + $0x298] sm:$0xff] %v361_v19  ;;  %v365_v21 = vld [vmem:[%s1996_s26 + $0x548] sm:$0xff]  ;;  %v367_v22 = vld [vmem:[%s1996_s26 + $0x550] sm:$0xff] }
  0x3c   : > { %364 = vst [vmem:[%s2001_s27 + $0x2a0] sm:$0xff] %v363_v20  ;;  %366 = vst [vmem:[%s2001_s27 + $0x2a8] sm:$0xff] %v365_v21  ;;  %v369_v23 = vld [vmem:[%s1996_s26 + $0x558] sm:$0xff]  ;;  %v371_v24 = vld [vmem:[%s1996_s26 + $0x580] sm:$0xff] }
  0x3d   : > { %368 = vst [vmem:[%s2001_s27 + $0x2b0] sm:$0xff] %v367_v22  ;;  %v373_v25 = vld [vmem:[%s1996_s26 + $0x588] sm:$0xff]  ;;  %370 = vst [vmem:[%s2001_s27 + $0x2b8] sm:$0xff] %v369_v23  ;;  %v375_v26 = vld [vmem:[%s1996_s26 + $0x590] sm:$0xff] }
  0x3e   : > { %372 = vst [vmem:[%s2001_s27 + $0x2c0] sm:$0xff] %v371_v24  ;;  %374 = vst [vmem:[%s2001_s27 + $0x2c8] sm:$0xff] %v373_v25  ;;  %v377_v27 = vld [vmem:[%s1996_s26 + $0x598] sm:$0xff]  ;;  %v379_v28 = vld [vmem:[%s1996_s26 + $0x5c0] sm:$0xff] }
  0x3f   : > { %376 = vst [vmem:[%s2001_s27 + $0x2d0] sm:$0xff] %v375_v26  ;;  %378 = vst [vmem:[%s2001_s27 + $0x2d8] sm:$0xff] %v377_v27  ;;  %v381_v29 = vld [vmem:[%s1996_s26 + $0x5c8] sm:$0xff]  ;;  %v383_v30 = vld [vmem:[%s1996_s26 + $0x5d0] sm:$0xff] }
  0x40   : > { %380 = vst [vmem:[%s2001_s27 + $0x2e0] sm:$0xff] %v379_v28  ;;  %v385_v31 = vld [vmem:[%s1996_s26 + $0x5d8] sm:$0xff]  ;;  %382 = vst [vmem:[%s2001_s27 + $0x2e8] sm:$0xff] %v381_v29  ;;  %v387_v32 = vld [vmem:[%s1996_s26 + $0x600] sm:$0xff] }
  0x41   : > { %384 = vst [vmem:[%s2001_s27 + $0x2f0] sm:$0xff] %v383_v30  ;;  %386 = vst [vmem:[%s2001_s27 + $0x2f8] sm:$0xff] %v385_v31  ;;  %v389_v33 = vld [vmem:[%s1996_s26 + $0x608] sm:$0xff]  ;;  %v391_v34 = vld [vmem:[%s1996_s26 + $0x610] sm:$0xff] }
  0x42   : > { %388 = vst [vmem:[%s2001_s27 + $0x300] sm:$0xff] %v387_v32  ;;  %390 = vst [vmem:[%s2001_s27 + $0x308] sm:$0xff] %v389_v33  ;;  %v393_v35 = vld [vmem:[%s1996_s26 + $0x618] sm:$0xff]  ;;  %v395_v36 = vld [vmem:[%s1996_s26 + $0x640] sm:$0xff] }
  0x43   : > { %392 = vst [vmem:[%s2001_s27 + $0x310] sm:$0xff] %v391_v34  ;;  %v397_v37 = vld [vmem:[%s1996_s26 + $0x648] sm:$0xff]  ;;  %394 = vst [vmem:[%s2001_s27 + $0x318] sm:$0xff] %v393_v35  ;;  %v399_v38 = vld [vmem:[%s1996_s26 + $0x650] sm:$0xff] }
  0x44   : > { %396 = vst [vmem:[%s2001_s27 + $0x320] sm:$0xff] %v395_v36  ;;  %398 = vst [vmem:[%s2001_s27 + $0x328] sm:$0xff] %v397_v37  ;;  %v401_v39 = vld [vmem:[%s1996_s26 + $0x658] sm:$0xff]  ;;  %v403_v40 = vld [vmem:[%s1996_s26 + $0x680] sm:$0xff] }
  0x45   : > { %400 = vst [vmem:[%s2001_s27 + $0x330] sm:$0xff] %v399_v38  ;;  %402 = vst [vmem:[%s2001_s27 + $0x338] sm:$0xff] %v401_v39  ;;  %v405_v41 = vld [vmem:[%s1996_s26 + $0x688] sm:$0xff]  ;;  %v407_v42 = vld [vmem:[%s1996_s26 + $0x690] sm:$0xff] }
  0x46   : > { %404 = vst [vmem:[%s2001_s27 + $0x340] sm:$0xff] %v403_v40  ;;  %v409_v43 = vld [vmem:[%s1996_s26 + $0x698] sm:$0xff]  ;;  %406 = vst [vmem:[%s2001_s27 + $0x348] sm:$0xff] %v405_v41  ;;  %v411_v44 = vld [vmem:[%s1996_s26 + $0x6c0] sm:$0xff] }
  0x47   : > { %408 = vst [vmem:[%s2001_s27 + $0x350] sm:$0xff] %v407_v42  ;;  %410 = vst [vmem:[%s2001_s27 + $0x358] sm:$0xff] %v409_v43  ;;  %v413_v45 = vld [vmem:[%s1996_s26 + $0x6c8] sm:$0xff]  ;;  %v415_v46 = vld [vmem:[%s1996_s26 + $0x6d0] sm:$0xff] }
  0x48   : > { %412 = vst [vmem:[%s2001_s27 + $0x360] sm:$0xff] %v411_v44  ;;  %414 = vst [vmem:[%s2001_s27 + $0x368] sm:$0xff] %v413_v45  ;;  %v417_v47 = vld [vmem:[%s1996_s26 + $0x6d8] sm:$0xff]  ;;  %v419_v48 = vld [vmem:[%s1996_s26 + $0x700] sm:$0xff] }
  0x49   : > { %416 = vst [vmem:[%s2001_s27 + $0x370] sm:$0xff] %v415_v46  ;;  %v421_v49 = vld [vmem:[%s1996_s26 + $0x708] sm:$0xff]  ;;  %418 = vst [vmem:[%s2001_s27 + $0x378] sm:$0xff] %v417_v47  ;;  %v423_v50 = vld [vmem:[%s1996_s26 + $0x710] sm:$0xff] }
  0x4a   : > { %420 = vst [vmem:[%s2001_s27 + $0x380] sm:$0xff] %v419_v48  ;;  %422 = vst [vmem:[%s2001_s27 + $0x388] sm:$0xff] %v421_v49  ;;  %v425_v51 = vld [vmem:[%s1996_s26 + $0x718] sm:$0xff]  ;;  %v427_v52 = vld [vmem:[%s1996_s26 + $0x740] sm:$0xff] }
  0x4b   : > { %424 = vst [vmem:[%s2001_s27 + $0x390] sm:$0xff] %v423_v50  ;;  %426 = vst [vmem:[%s2001_s27 + $0x398] sm:$0xff] %v425_v51  ;;  %v429_v53 = vld [vmem:[%s1996_s26 + $0x748] sm:$0xff]  ;;  %v431_v54 = vld [vmem:[%s1996_s26 + $0x750] sm:$0xff] }
  0x4c   : > { %428 = vst [vmem:[%s2001_s27 + $0x3a0] sm:$0xff] %v427_v52  ;;  %v433_v55 = vld [vmem:[%s1996_s26 + $0x758] sm:$0xff]  ;;  %430 = vst [vmem:[%s2001_s27 + $0x3a8] sm:$0xff] %v429_v53  ;;  %v435_v56 = vld [vmem:[%s1996_s26 + $0x780] sm:$0xff] }
  0x4d   : > { %432 = vst [vmem:[%s2001_s27 + $0x3b0] sm:$0xff] %v431_v54  ;;  %434 = vst [vmem:[%s2001_s27 + $0x3b8] sm:$0xff] %v433_v55  ;;  %v437_v57 = vld [vmem:[%s1996_s26 + $0x788] sm:$0xff]  ;;  %v439_v58 = vld [vmem:[%s1996_s26 + $0x790] sm:$0xff] }
  0x4e   : > { %436 = vst [vmem:[%s2001_s27 + $0x3c0] sm:$0xff] %v435_v56  ;;  %438 = vst [vmem:[%s2001_s27 + $0x3c8] sm:$0xff] %v437_v57  ;;  %v441_v59 = vld [vmem:[%s1996_s26 + $0x798] sm:$0xff]  ;;  %v443_v60 = vld [vmem:[%s1996_s26 + $0x7c0] sm:$0xff] }
  0x4f   : > { %440 = vst [vmem:[%s2001_s27 + $0x3d0] sm:$0xff] %v439_v58  ;;  %v445_v61 = vld [vmem:[%s1996_s26 + $0x7c8] sm:$0xff]  ;;  %442 = vst [vmem:[%s2001_s27 + $0x3d8] sm:$0xff] %v441_v59  ;;  %v447_v62 = vld [vmem:[%s1996_s26 + $0x7d0] sm:$0xff] }
  0x50   : > { %444 = vst [vmem:[%s2001_s27 + $0x3e0] sm:$0xff] %v443_v60  ;;  %446 = vst [vmem:[%s2001_s27 + $0x3e8] sm:$0xff] %v445_v61  ;;  %v449_v63 = vld [vmem:[%s1996_s26 + $0x7d8] sm:$0xff] }
  0x51   : > { %448 = vst [vmem:[%s2001_s27 + $0x3f0] sm:$0xff] %v447_v62  ;;  %450 = vst [vmem:[%s2001_s27 + $0x3f8] sm:$0xff] %v449_v63 }
  0x52 PF: > { %p1713_p6 = scmp.ge.s32.totalorder %s1931_s16, 1  ;;  %p463_p7 = scmp.lt.s32.totalorder %s1931_s16, 3 }
  0x54   : > { %p464_p8 = pnand %p1713_p6, %p463_p7 }
  0x55   : > { %s470_s28 = sand.u32 (!%p464_p8), 1, %s1915_s12   ;;  %v2262_v0 = vld [vmem:[%s2442_s0] sm:$0xff] (!%p464_p8)  ;;  %s1715_s6 = sshll.u32 (!%p464_p8), %s1923_s14, 3 }
  0x56   : > { %467 = sbr.rel (%p464_p8) target bundleno = 436 (0x1b4), region = 51  ;;  %s1714_s4 = sshll.u32 (!%p464_p8), %s470_s28, 10  ;;  %v2266_v1 = vcombine.high (!%p464_p8), %v2262_v0, %v2262_v0 }
  0x57   : > { %s2268_s5 = scalar_lea.vmem (!%p464_p8), [#allocation3], %s1714_s4  ;;  %p523_p9 = scmp.lt.s32.totalorder (!%p464_p8), %s1715_s6, 15 }
  0x58   : > { %v558_v2 = vld [vmem:[%s2268_s5] sm:$0xff] (!%p464_p8)  ;;  %v559_v4 = vld [vmem:[%s2268_s5 + $0x8] sm:$0xff] (!%p464_p8)  ;;  %1365 = vmatprep.mubr.bf16.mxu0 (!%p464_p8), %v2266_v1  ;;  %1406 = vmatprep.mubr.bf16.mxu1 (!%p464_p8), %v2266_v1 }
  0x59   : > { %v562_v3 = vld [vmem:[%s2268_s5 + $0x20] sm:$0xff] (!%p464_p8)  ;;  %v563_v6 = vld [vmem:[%s2268_s5 + $0x28] sm:$0xff] (!%p464_p8) }
  0x5a   : > { %v1721_v5 = vcombine.high (!%p464_p8), %v558_v2, %v562_v3  ;;  %v1720_v7 = vcombine.low (!%p464_p8), %v558_v2, %v562_v3  ;;  %v566_v8 = vld [vmem:[%s2268_s5 + $0x40] sm:$0xff] (!%p464_p8)  ;;  %v1723_v10 = vcombine.high (!%p464_p8), %v559_v4, %v563_v6  ;;  %v1722_v11 = vcombine.low (!%p464_p8), %v559_v4, %v563_v6  ;;  %v567_v13 = vld [vmem:[%s2268_s5 + $0x48] sm:$0xff] (!%p464_p8) }
  0x5b   : > { %v570_v9 = vld [vmem:[%s2268_s5 + $0x60] sm:$0xff] (!%p464_p8)  ;;  %v571_v14 = vld [vmem:[%s2268_s5 + $0x68] sm:$0xff] (!%p464_p8) }
  0x5c   : > { %v1729_v12 = vcombine.high (!%p464_p8), %v566_v8, %v570_v9  ;;  %v574_v15 = vld [vmem:[%s2268_s5 + $0x80] sm:$0xff] (!%p464_p8)  ;;  %1333 = vmatprep.subr.bf16.mxu0 (!%p464_p8), %v1721_v5  ;;  %v1731_v16 = vcombine.high (!%p464_p8), %v567_v13, %v571_v14  ;;  %v575_v18 = vld [vmem:[%s2268_s5 + $0x88] sm:$0xff] (!%p464_p8)  ;;  %1374 = vmatprep.subr.bf16.mxu1 (!%p464_p8), %v1723_v10  ;;  %v1728_v20 = vcombine.low (!%p464_p8), %v566_v8, %v570_v9 }
  0x5d   : > { %v578_v17 = vld [vmem:[%s2268_s5 + $0xa0] sm:$0xff]  ;;  %v579_v19 = vld [vmem:[%s2268_s5 + $0xa8] sm:$0xff]  ;;  %1334 = vmatpush1.bf16.msra.mxu0 %v1720_v7  ;;  %1375 = vmatpush1.bf16.msra.mxu1 %v1722_v11  ;;  %v1730_v21 = vcombine.low %v567_v13, %v571_v14  ;;  %s2453_s6 = smov (!%p523_p9, %s1715_s6), 15 }
  0x5e   : > { %1335 = vmatprep.subr.bf16.mxu0 %v1729_v12  ;;  %v1737_v22 = vcombine.high %v574_v15, %v578_v17  ;;  %1376 = vmatprep.subr.bf16.mxu1 %v1731_v16  ;;  %v1739_v23 = vcombine.high %v575_v18, %v579_v19  ;;  %v582_v24 = vld [vmem:[%s2268_s5 + $0xc0] sm:$0xff]  ;;  %v583_v26 = vld [vmem:[%s2268_s5 + $0xc8] sm:$0xff]  ;;  %v1736_v28 = vcombine.low %v574_v15, %v578_v17  ;;  %s525_s9 = scalar_lea.vmem %s2444_s2, %s2453_s6  ;;  %s1717_s10 = sshll.u32 %s2453_s6, 3 }
  0x5f   : > { %v586_v25 = vld [vmem:[%s2268_s5 + $0xe0] sm:$0xff]  ;;  %v587_v27 = vld [vmem:[%s2268_s5 + $0xe8] sm:$0xff]  ;;  %v1738_v29 = vcombine.low %v575_v18, %v579_v19  ;;  %s2417_s14 = scalar_lea.vmem %s2445_s3, %s1717_s10 }
  0x60   : > { %v1745_v30 = vcombine.high %v582_v24, %v586_v25  ;;  %v1747_v31 = vcombine.high %v583_v26, %v587_v27  ;;  %v590_v32 = vld [vmem:[%s2268_s5 + $0x100] sm:$0xff]  ;;  %v591_v34 = vld [vmem:[%s2268_s5 + $0x108] sm:$0xff]  ;;  %v1744_v36 = vcombine.low %v582_v24, %v586_v25  ;;  %v1746_v37 = vcombine.low %v583_v26, %v587_v27 }
  0x61   : > { %1336 = vmatpush1.bf16.msra.mxu0 %v1728_v20  ;;  %1377 = vmatpush1.bf16.msra.mxu1 %v1730_v21  ;;  %v594_v33 = vld [vmem:[%s2268_s5 + $0x120] sm:$0xff]  ;;  %v595_v35 = vld [vmem:[%s2268_s5 + $0x128] sm:$0xff] }
  0x62   : > { %1337 = vmatprep.subr.bf16.mxu0 %v1737_v22  ;;  %1378 = vmatprep.subr.bf16.mxu1 %v1739_v23  ;;  %v1753_v38 = vcombine.high %v590_v32, %v594_v33  ;;  %v1755_v39 = vcombine.high %v591_v34, %v595_v35  ;;  %v598_v40 = vld [vmem:[%s2268_s5 + $0x140] sm:$0xff]  ;;  %v599_v42 = vld [vmem:[%s2268_s5 + $0x148] sm:$0xff]  ;;  %v1752_v44 = vcombine.low %v590_v32, %v594_v33 }
  0x63   : > { %v602_v41 = vld [vmem:[%s2268_s5 + $0x160] sm:$0xff]  ;;  %v603_v43 = vld [vmem:[%s2268_s5 + $0x168] sm:$0xff]  ;;  %v1754_v45 = vcombine.low %v591_v34, %v595_v35 }
  0x64   : > { %v1761_v46 = vcombine.high %v598_v40, %v602_v41  ;;  %v1763_v47 = vcombine.high %v599_v42, %v603_v43  ;;  %v606_v48 = vld [vmem:[%s2268_s5 + $0x180] sm:$0xff]  ;;  %v607_v50 = vld [vmem:[%s2268_s5 + $0x188] sm:$0xff]  ;;  %v1760_v52 = vcombine.low %v598_v40, %v602_v41  ;;  %v1762_v53 = vcombine.low %v599_v42, %v603_v43 }
  0x65   : > { %1338 = vmatpush1.bf16.msra.mxu0 %v1736_v28  ;;  %1379 = vmatpush1.bf16.msra.mxu1 %v1738_v29  ;;  %v610_v49 = vld [vmem:[%s2268_s5 + $0x1a0] sm:$0xff]  ;;  %v611_v51 = vld [vmem:[%s2268_s5 + $0x1a8] sm:$0xff] }
  0x66   : > { %1339 = vmatprep.subr.bf16.mxu0 %v1745_v30  ;;  %1380 = vmatprep.subr.bf16.mxu1 %v1747_v31  ;;  %v1769_v54 = vcombine.high %v606_v48, %v610_v49  ;;  %v1771_v55 = vcombine.high %v607_v50, %v611_v51  ;;  %v614_v56 = vld [vmem:[%s2268_s5 + $0x1c0] sm:$0xff]  ;;  %v615_v58 = vld [vmem:[%s2268_s5 + $0x1c8] sm:$0xff]  ;;  %v1768_v60 = vcombine.low %v606_v48, %v610_v49 }
  0x67   : > { %v618_v57 = vld [vmem:[%s2268_s5 + $0x1e0] sm:$0xff]  ;;  %v619_v59 = vld [vmem:[%s2268_s5 + $0x1e8] sm:$0xff]  ;;  %v1770_v61 = vcombine.low %v607_v50, %v611_v51 }
  0x68   : > { %v1777_v62 = vcombine.high %v614_v56, %v618_v57  ;;  %v1779_v63 = vcombine.high %v615_v58, %v619_v59  ;;  %v622_v2 = vld [vmem:[%s2268_s5 + $0x200] sm:$0xff]  ;;  %v623_v4 = vld [vmem:[%s2268_s5 + $0x208] sm:$0xff]  ;;  %v1776_v6 = vcombine.low %v614_v56, %v618_v57  ;;  %v1778_v7 = vcombine.low %v615_v58, %v619_v59 }
  0x69   : > { %1340 = vmatpush1.bf16.msra.mxu0 %v1744_v36  ;;  %1381 = vmatpush1.bf16.msra.mxu1 %v1746_v37  ;;  %v626_v3 = vld [vmem:[%s2268_s5 + $0x220] sm:$0xff]  ;;  %v627_v5 = vld [vmem:[%s2268_s5 + $0x228] sm:$0xff] }
  0x6a   : > { %1341 = vmatprep.subr.bf16.mxu0 %v1753_v38  ;;  %1382 = vmatprep.subr.bf16.mxu1 %v1755_v39  ;;  %v1785_v8 = vcombine.high %v622_v2, %v626_v3  ;;  %v1787_v9 = vcombine.high %v623_v4, %v627_v5  ;;  %v630_v10 = vld [vmem:[%s2268_s5 + $0x240] sm:$0xff]  ;;  %v631_v12 = vld [vmem:[%s2268_s5 + $0x248] sm:$0xff]  ;;  %v1784_v14 = vcombine.low %v622_v2, %v626_v3 }
  0x6b   : > { %v634_v11 = vld [vmem:[%s2268_s5 + $0x260] sm:$0xff]  ;;  %v635_v13 = vld [vmem:[%s2268_s5 + $0x268] sm:$0xff]  ;;  %v1786_v15 = vcombine.low %v623_v4, %v627_v5  ;;  %v560_v4 = vld [vmem:[%s2268_s5 + $0x10] sm:$0xff] }
  0x6c   : > { %v1793_v16 = vcombine.high %v630_v10, %v634_v11  ;;  %v1795_v17 = vcombine.high %v631_v12, %v635_v13  ;;  %v638_v18 = vld [vmem:[%s2268_s5 + $0x280] sm:$0xff]  ;;  %v639_v20 = vld [vmem:[%s2268_s5 + $0x288] sm:$0xff]  ;;  %v1792_v22 = vcombine.low %v630_v10, %v634_v11  ;;  %v1794_v23 = vcombine.low %v631_v12, %v635_v13  ;;  %v564_v5 = vld [vmem:[%s2268_s5 + $0x30] sm:$0xff] }
  0x6d   : > { %1342 = vmatpush1.bf16.msra.mxu0 %v1752_v44  ;;  %1383 = vmatpush1.bf16.msra.mxu1 %v1754_v45  ;;  %v642_v19 = vld [vmem:[%s2268_s5 + $0x2a0] sm:$0xff]  ;;  %v643_v21 = vld [vmem:[%s2268_s5 + $0x2a8] sm:$0xff]  ;;  %v1725_v10 = vcombine.high %v560_v4, %v564_v5  ;;  %v568_v12 = vld [vmem:[%s2268_s5 + $0x50] sm:$0xff] }
  0x6e   : > { %1343 = vmatprep.subr.bf16.mxu0 %v1761_v46  ;;  %1384 = vmatprep.subr.bf16.mxu1 %v1763_v47  ;;  %v1801_v24 = vcombine.high %v638_v18, %v642_v19  ;;  %v1803_v25 = vcombine.high %v639_v20, %v643_v21  ;;  %v646_v26 = vld [vmem:[%s2268_s5 + $0x2c0] sm:$0xff]  ;;  %v647_v28 = vld [vmem:[%s2268_s5 + $0x2c8] sm:$0xff]  ;;  %v1800_v30 = vcombine.low %v638_v18, %v642_v19  ;;  %v572_v13 = vld [vmem:[%s2268_s5 + $0x70] sm:$0xff] }
  0x6f   : > { %v650_v27 = vld [vmem:[%s2268_s5 + $0x2e0] sm:$0xff]  ;;  %v651_v29 = vld [vmem:[%s2268_s5 + $0x2e8] sm:$0xff]  ;;  %v1802_v31 = vcombine.low %v639_v20, %v643_v21  ;;  %v1733_v19 = vcombine.high %v568_v12, %v572_v13  ;;  %v576_v21 = vld [vmem:[%s2268_s5 + $0x90] sm:$0xff] }
  0x70   : > { %v1809_v32 = vcombine.high %v646_v26, %v650_v27  ;;  %v1811_v33 = vcombine.high %v647_v28, %v651_v29  ;;  %v654_v34 = vld [vmem:[%s2268_s5 + $0x300] sm:$0xff]  ;;  %v655_v36 = vld [vmem:[%s2268_s5 + $0x308] sm:$0xff]  ;;  %v1808_v38 = vcombine.low %v646_v26, %v650_v27  ;;  %v1810_v39 = vcombine.low %v647_v28, %v651_v29  ;;  %v584_v28 = vld [vmem:[%s2268_s5 + $0xd0] sm:$0xff] }
  0x71   : > { %1344 = vmatpush1.bf16.msra.mxu0 %v1760_v52  ;;  %1385 = vmatpush1.bf16.msra.mxu1 %v1762_v53  ;;  %v658_v35 = vld [vmem:[%s2268_s5 + $0x320] sm:$0xff]  ;;  %v659_v37 = vld [vmem:[%s2268_s5 + $0x328] sm:$0xff]  ;;  %v588_v29 = vld [vmem:[%s2268_s5 + $0xf0] sm:$0xff] }
  0x72   : > { %1345 = vmatprep.subr.bf16.mxu0 %v1769_v54  ;;  %1386 = vmatprep.subr.bf16.mxu1 %v1771_v55  ;;  %v1817_v40 = vcombine.high %v654_v34, %v658_v35  ;;  %v1819_v41 = vcombine.high %v655_v36, %v659_v37  ;;  %v662_v42 = vld [vmem:[%s2268_s5 + $0x340] sm:$0xff]  ;;  %v663_v44 = vld [vmem:[%s2268_s5 + $0x348] sm:$0xff]  ;;  %v1816_v46 = vcombine.low %v654_v34, %v658_v35 }
  0x73   : > { %v666_v43 = vld [vmem:[%s2268_s5 + $0x360] sm:$0xff]  ;;  %v667_v45 = vld [vmem:[%s2268_s5 + $0x368] sm:$0xff]  ;;  %v1818_v47 = vcombine.low %v655_v36, %v659_v37  ;;  %v1749_v34 = vcombine.high %v584_v28, %v588_v29  ;;  %v592_v36 = vld [vmem:[%s2268_s5 + $0x110] sm:$0xff] }
  0x74   : > { %v1825_v48 = vcombine.high %v662_v42, %v666_v43  ;;  %v1827_v49 = vcombine.high %v663_v44, %v667_v45  ;;  %v670_v50 = vld [vmem:[%s2268_s5 + $0x380] sm:$0xff]  ;;  %v671_v52 = vld [vmem:[%s2268_s5 + $0x388] sm:$0xff]  ;;  %v1824_v54 = vcombine.low %v662_v42, %v666_v43  ;;  %v1826_v55 = vcombine.low %v663_v44, %v667_v45  ;;  %v596_v37 = vld [vmem:[%s2268_s5 + $0x130] sm:$0xff] }
  0x75   : > { %1346 = vmatpush1.bf16.msra.mxu0 %v1768_v60  ;;  %1387 = vmatpush1.bf16.msra.mxu1 %v1770_v61  ;;  %v674_v51 = vld [vmem:[%s2268_s5 + $0x3a0] sm:$0xff]  ;;  %v675_v53 = vld [vmem:[%s2268_s5 + $0x3a8] sm:$0xff]  ;;  %v600_v43 = vld [vmem:[%s2268_s5 + $0x150] sm:$0xff] }
  0x76   : > { %1347 = vmatprep.subr.bf16.mxu0 %v1777_v62  ;;  %1388 = vmatprep.subr.bf16.mxu1 %v1779_v63  ;;  %v1833_v56 = vcombine.high %v670_v50, %v674_v51  ;;  %v1835_v57 = vcombine.high %v671_v52, %v675_v53  ;;  %v678_v58 = vld [vmem:[%s2268_s5 + $0x3c0] sm:$0xff]  ;;  %v679_v60 = vld [vmem:[%s2268_s5 + $0x3c8] sm:$0xff]  ;;  %v1832_v62 = vcombine.low %v670_v50, %v674_v51  ;;  %v604_v44 = vld [vmem:[%s2268_s5 + $0x170] sm:$0xff] }
  0x77   : > { %v682_v59 = vld [vmem:[%s2268_s5 + $0x3e0] sm:$0xff]  ;;  %v683_v61 = vld [vmem:[%s2268_s5 + $0x3e8] sm:$0xff]  ;;  %v1834_v63 = vcombine.low %v671_v52, %v675_v53  ;;  %v601_v45 = vld [vmem:[%s2268_s5 + $0x158] sm:$0xff] }
  0x78   : > { %v1841_v2 = vcombine.high %v678_v58, %v682_v59  ;;  %v1843_v3 = vcombine.high %v679_v60, %v683_v61  ;;  %v608_v51 = vld [vmem:[%s2268_s5 + $0x190] sm:$0xff]  ;;  %v609_v53 = vld [vmem:[%s2268_s5 + $0x198] sm:$0xff] }
  0x79   : > { %1348 = vmatpush1.bf16.msra.mxu0 %v1776_v6  ;;  %1389 = vmatpush1.bf16.msra.mxu1 %v1778_v7  ;;  %v561_v6 = vld [vmem:[%s2268_s5 + $0x18] sm:$0xff]  ;;  %v612_v52 = vld [vmem:[%s2268_s5 + $0x1b0] sm:$0xff] }
  0x7a   : > { %1349 = vmatprep.subr.bf16.mxu0 %v1785_v8  ;;  %1390 = vmatprep.subr.bf16.mxu1 %v1787_v9  ;;  %v565_v7 = vld [vmem:[%s2268_s5 + $0x38] sm:$0xff]  ;;  %v1840_v8 = vcombine.low %v678_v58, %v682_v59  ;;  %v1842_v9 = vcombine.low %v679_v60, %v683_v61  ;;  %v616_v59 = vld [vmem:[%s2268_s5 + $0x1d0] sm:$0xff] }
  0x7b   : > { %v1727_v11 = vcombine.high %v561_v6, %v565_v7  ;;  %v1726_v18 = vcombine.low %v561_v6, %v565_v7  ;;  %v620_v60 = vld [vmem:[%s2268_s5 + $0x1f0] sm:$0xff]  ;;  %v617_v61 = vld [vmem:[%s2268_s5 + $0x1d8] sm:$0xff] }
  0x7c   : > { %v628_v6 = vld [vmem:[%s2268_s5 + $0x230] sm:$0xff]  ;;  %v625_v7 = vld [vmem:[%s2268_s5 + $0x218] sm:$0xff] }
  0x7d   : > { %1350 = vmatpush1.bf16.msra.mxu0 %v1784_v14  ;;  %1391 = vmatpush1.bf16.msra.mxu1 %v1786_v15  ;;  %v2344_v14 = vcombine.low %v2262_v0, %v2262_v0  ;;  %v569_v15 = vld [vmem:[%s2268_s5 + $0x58] sm:$0xff] }
  0x7e   : > { %1351 = vmatprep.subr.bf16.mxu0 %v1793_v16  ;;  %1392 = vmatprep.subr.bf16.mxu1 %v1795_v17  ;;  %v573_v16 = vld [vmem:[%s2268_s5 + $0x78] sm:$0xff]  ;;  %v1724_v17 = vcombine.low %v560_v4, %v564_v5  ;;  %v624_v5 = vld [vmem:[%s2268_s5 + $0x210] sm:$0xff] }
  0x7f   : > { %v1735_v20 = vcombine.high %v569_v15, %v573_v16  ;;  %v577_v0 = vld [vmem:[%s2268_s5 + $0x98] sm:$0xff] }
  0x81   : > { %1352 = vmatpush1.bf16.msra.mxu0 %v1792_v22  ;;  %1393 = vmatpush1.bf16.msra.mxu1 %v1794_v23  ;;  %v580_v22 = vld [vmem:[%s2268_s5 + $0xb0] sm:$0xff]  ;;  %v581_v23 = vld [vmem:[%s2268_s5 + $0xb8] sm:$0xff] }
  0x82   : > { %1353 = vmatprep.subr.bf16.mxu0 %v1801_v24  ;;  %1394 = vmatprep.subr.bf16.mxu1 %v1803_v25  ;;  %v1732_v24 = vcombine.low %v568_v12, %v572_v13  ;;  %v1734_v25 = vcombine.low %v569_v15, %v573_v16  ;;  %v1741_v26 = vcombine.high %v576_v21, %v580_v22  ;;  %v632_v13 = vld [vmem:[%s2268_s5 + $0x250] sm:$0xff]  ;;  %v633_v16 = vld [vmem:[%s2268_s5 + $0x258] sm:$0xff] }
  0x83   : > { %v1743_v27 = vcombine.high %v577_v0, %v581_v23  ;;  %v636_v15 = vld [vmem:[%s2268_s5 + $0x270] sm:$0xff] }
  0x85   : > { %1354 = vmatpush1.bf16.msra.mxu0 %v1800_v30  ;;  %1395 = vmatpush1.bf16.msra.mxu1 %v1802_v31  ;;  %v585_v30 = vld [vmem:[%s2268_s5 + $0xd8] sm:$0xff] }
  0x86   : > { %1355 = vmatprep.subr.bf16.mxu0 %v1809_v32  ;;  %1396 = vmatprep.subr.bf16.mxu1 %v1811_v33  ;;  %v589_v31 = vld [vmem:[%s2268_s5 + $0xf8] sm:$0xff]  ;;  %v1740_v32 = vcombine.low %v576_v21, %v580_v22  ;;  %v1742_v33 = vcombine.low %v577_v0, %v581_v23  ;;  %v640_v22 = vld [vmem:[%s2268_s5 + $0x290] sm:$0xff] }
  0x87   : > { %v1751_v35 = vcombine.high %v585_v30, %v589_v31  ;;  %v644_v0 = vld [vmem:[%s2268_s5 + $0x2b0] sm:$0xff]  ;;  %v641_v23 = vld [vmem:[%s2268_s5 + $0x298] sm:$0xff] }
  0x89   : > { %1356 = vmatpush1.bf16.msra.mxu0 %v1808_v38  ;;  %1397 = vmatpush1.bf16.msra.mxu1 %v1810_v39  ;;  %v593_v38 = vld [vmem:[%s2268_s5 + $0x118] sm:$0xff] }
  0x8a   : > { %1357 = vmatprep.subr.bf16.mxu0 %v1817_v40  ;;  %1398 = vmatprep.subr.bf16.mxu1 %v1819_v41  ;;  %v597_v39 = vld [vmem:[%s2268_s5 + $0x138] sm:$0xff]  ;;  %v1748_v40 = vcombine.low %v584_v28, %v588_v29  ;;  %v1757_v41 = vcombine.high %v592_v36, %v596_v37  ;;  %v648_v29 = vld [vmem:[%s2268_s5 + $0x2d0] sm:$0xff] }
  0x8b   : > { %v1759_v42 = vcombine.high %v593_v38, %v597_v39 }
  0x8d   : > { %1358 = vmatpush1.bf16.msra.mxu0 %v1816_v46  ;;  %1399 = vmatpush1.bf16.msra.mxu1 %v1818_v47  ;;  %v605_v46 = vld [vmem:[%s2268_s5 + $0x178] sm:$0xff]  ;;  %v1756_v47 = vcombine.low %v592_v36, %v596_v37  ;;  %v656_v37 = vld [vmem:[%s2268_s5 + $0x310] sm:$0xff] }
  0x8e   : > { %1359 = vmatprep.subr.bf16.mxu0 %v1825_v48  ;;  %1400 = vmatprep.subr.bf16.mxu1 %v1827_v49  ;;  %v1758_v48 = vcombine.low %v593_v38, %v597_v39  ;;  %v1765_v49 = vcombine.high %v600_v43, %v604_v44  ;;  %v1767_v50 = vcombine.high %v601_v45, %v605_v46  ;;  %v660_v38 = vld [vmem:[%s2268_s5 + $0x330] sm:$0xff]  ;;  %v657_v39 = vld [vmem:[%s2268_s5 + $0x318] sm:$0xff] }
  0x91   : > { %1360 = vmatpush1.bf16.msra.mxu0 %v1824_v54  ;;  %1401 = vmatpush1.bf16.msra.mxu1 %v1826_v55  ;;  %v613_v54 = vld [vmem:[%s2268_s5 + $0x1b8] sm:$0xff]  ;;  %v1764_v55 = vcombine.low %v600_v43, %v604_v44  ;;  %v664_v44 = vld [vmem:[%s2268_s5 + $0x350] sm:$0xff] }
  0x92   : > { %1361 = vmatprep.subr.bf16.mxu0 %v1833_v56  ;;  %1402 = vmatprep.subr.bf16.mxu1 %v1835_v57  ;;  %v1766_v56 = vcombine.low %v601_v45, %v605_v46  ;;  %v1773_v57 = vcombine.high %v608_v51, %v612_v52  ;;  %v1775_v58 = vcombine.high %v609_v53, %v613_v54  ;;  %v668_v45 = vld [vmem:[%s2268_s5 + $0x370] sm:$0xff]  ;;  %v665_v46 = vld [vmem:[%s2268_s5 + $0x358] sm:$0xff] }
  0x95   : > { %1362 = vmatpush1.bf16.msra.mxu0 %v1832_v62  ;;  %1403 = vmatpush1.bf16.msra.mxu1 %v1834_v63  ;;  %v621_v62 = vld [vmem:[%s2268_s5 + $0x1f8] sm:$0xff]  ;;  %v1772_v63 = vcombine.low %v608_v51, %v612_v52  ;;  %v672_v52 = vld [vmem:[%s2268_s5 + $0x390] sm:$0xff] }
  0x96   : > { %1363 = vmatprep.subr.bf16.mxu0 %v1841_v2  ;;  %1404 = vmatprep.subr.bf16.mxu1 %v1843_v3  ;;  %v1774_v2 = vcombine.low %v609_v53, %v613_v54  ;;  %v1781_v3 = vcombine.high %v616_v59, %v620_v60  ;;  %v1783_v4 = vcombine.high %v617_v61, %v621_v62  ;;  %v676_v53 = vld [vmem:[%s2268_s5 + $0x3b0] sm:$0xff]  ;;  %v673_v54 = vld [vmem:[%s2268_s5 + $0x398] sm:$0xff] }
  0x99   : > { %1364 = vmatpush1.bf16.msra.mxu0 %v1840_v8  ;;  %1405 = vmatpush1.bf16.msra.mxu1 %v1842_v9  ;;  %v629_v8 = vld [vmem:[%s2268_s5 + $0x238] sm:$0xff]  ;;  %v1780_v9 = vcombine.low %v616_v59, %v620_v60  ;;  %v680_v60 = vld [vmem:[%s2268_s5 + $0x3d0] sm:$0xff] }
  0x9a   : > { %1415 = vmatprep.subr.bf16.mxu0 %v1725_v10  ;;  %1456 = vmatprep.subr.bf16.mxu1 %v1727_v11  ;;  %v1782_v10 = vcombine.low %v617_v61, %v621_v62  ;;  %v1789_v11 = vcombine.high %v624_v5, %v628_v6  ;;  %v1791_v12 = vcombine.high %v625_v7, %v629_v8  ;;  %v684_v61 = vld [vmem:[%s2268_s5 + $0x3f0] sm:$0xff]  ;;  %v681_v62 = vld [vmem:[%s2268_s5 + $0x3d8] sm:$0xff] }
  0x9c   : > { %1366 = vmatmul.mubr.bf16.vlgmr.msra.gmra.mrb[0].mxu0 %v2344_v14  ;;  %1407 = vmatmul.mubr.bf16.vlgmr.msra.gmra.mrb[0].mxu1 %v2344_v14 }
  0x9d   : > { %1416 = vmatpush1.bf16.msra.mxu0 %v1724_v17  ;;  %1457 = vmatpush1.bf16.msra.mxu1 %v1726_v18  ;;  %v637_v17 = vld [vmem:[%s2268_s5 + $0x278] sm:$0xff]  ;;  %v1788_v18 = vcombine.low %v624_v5, %v628_v6  ;;  %v1844_v6 = vcombine.low %v680_v60, %v684_v61 }
  0x9e   : > { %1417 = vmatprep.subr.bf16.mxu0 %v1733_v19  ;;  %1458 = vmatprep.subr.bf16.mxu1 %v1735_v20  ;;  %v1790_v19 = vcombine.low %v625_v7, %v629_v8  ;;  %v1797_v20 = vcombine.high %v632_v13, %v636_v15  ;;  %v1799_v21 = vcombine.high %v633_v16, %v637_v17  ;;  %v1526_v8 = vlaneseq }
  0x9f   : > { %1447 = vmatprep.mubr.bf16.mxu0 %v2266_v1  ;;  %1488 = vmatprep.mubr.bf16.mxu1 %v2266_v1  ;;  %v1750_v1 = vcombine.low %v585_v30, %v589_v31  ;;  %v652_v30 = vld [vmem:[%s2268_s5 + $0x2f0] sm:$0xff]  ;;  %v649_v31 = vld [vmem:[%s2268_s5 + $0x2d8] sm:$0xff] }
  0xa1   : > { %1418 = vmatpush1.bf16.msra.mxu0 %v1732_v24  ;;  %1459 = vmatpush1.bf16.msra.mxu1 %v1734_v25  ;;  %v645_v24 = vld [vmem:[%s2268_s5 + $0x2b8] sm:$0xff]  ;;  %v1796_v25 = vcombine.low %v632_v13, %v636_v15 }
  0xa2   : > { %1419 = vmatprep.subr.bf16.mxu0 %v1741_v26  ;;  %1460 = vmatprep.subr.bf16.mxu1 %v1743_v27  ;;  %v1798_v26 = vcombine.low %v633_v16, %v637_v17  ;;  %v1805_v27 = vcombine.high %v640_v22, %v644_v0  ;;  %v1807_v28 = vcombine.high %v641_v23, %v645_v24 }
  0xa5   : > { %1420 = vmatpush1.bf16.msra.mxu0 %v1740_v32  ;;  %1461 = vmatpush1.bf16.msra.mxu1 %v1742_v33  ;;  %v653_v32 = vld [vmem:[%s2268_s5 + $0x2f8] sm:$0xff]  ;;  %v1804_v33 = vcombine.low %v640_v22, %v644_v0 }
  0xa6   : > { %1421 = vmatprep.subr.bf16.mxu0 %v1749_v34  ;;  %1462 = vmatprep.subr.bf16.mxu1 %v1751_v35  ;;  %v1806_v34 = vcombine.low %v641_v23, %v645_v24  ;;  %v1813_v35 = vcombine.high %v648_v29, %v652_v30  ;;  %v1815_v36 = vcombine.high %v649_v31, %v653_v32 }
  0xa9   : > { %1422 = vmatpush1.bf16.msra.mxu0 %v1748_v40  ;;  %1463 = vmatpush1.bf16.msra.mxu1 %v1750_v1  ;;  %v661_v40 = vld [vmem:[%s2268_s5 + $0x338] sm:$0xff]  ;;  %v1812_v1 = vcombine.low %v648_v29, %v652_v30 }
  0xaa   : > { %1423 = vmatprep.subr.bf16.mxu0 %v1757_v41  ;;  %1464 = vmatprep.subr.bf16.mxu1 %v1759_v42  ;;  %v1814_v41 = vcombine.low %v649_v31, %v653_v32  ;;  %v1821_v42 = vcombine.high %v656_v37, %v660_v38  ;;  %v1823_v43 = vcombine.high %v657_v39, %v661_v40 }
  0xad   : > { %1424 = vmatpush1.bf16.msra.mxu0 %v1756_v47  ;;  %1465 = vmatpush1.bf16.msra.mxu1 %v1758_v48  ;;  %v669_v47 = vld [vmem:[%s2268_s5 + $0x378] sm:$0xff]  ;;  %v1820_v48 = vcombine.low %v656_v37, %v660_v38 }
  0xae   : > { %1425 = vmatprep.subr.bf16.mxu0 %v1765_v49  ;;  %1466 = vmatprep.subr.bf16.mxu1 %v1767_v50  ;;  %v1822_v49 = vcombine.low %v657_v39, %v661_v40  ;;  %v1829_v50 = vcombine.high %v664_v44, %v668_v45  ;;  %v1831_v51 = vcombine.high %v665_v46, %v669_v47 }
  0xb1   : > { %1426 = vmatpush1.bf16.msra.mxu0 %v1764_v55  ;;  %1467 = vmatpush1.bf16.msra.mxu1 %v1766_v56  ;;  %v677_v55 = vld [vmem:[%s2268_s5 + $0x3b8] sm:$0xff]  ;;  %v1828_v56 = vcombine.low %v664_v44, %v668_v45 }
  0xb2   : > { %1427 = vmatprep.subr.bf16.mxu0 %v1773_v57  ;;  %1468 = vmatprep.subr.bf16.mxu1 %v1775_v58  ;;  %v1830_v57 = vcombine.low %v665_v46, %v669_v47  ;;  %v1837_v58 = vcombine.high %v672_v52, %v676_v53  ;;  %v1839_v59 = vcombine.high %v673_v54, %v677_v55 }
  0xb5   : > { %1428 = vmatpush1.bf16.msra.mxu0 %v1772_v63  ;;  %1469 = vmatpush1.bf16.msra.mxu1 %v1774_v2  ;;  %v685_v63 = vld [vmem:[%s2268_s5 + $0x3f8] sm:$0xff]  ;;  %v1836_v2 = vcombine.low %v672_v52, %v676_v53 }
  0xb6   : > { %1429 = vmatprep.subr.bf16.mxu0 %v1781_v3  ;;  %1470 = vmatprep.subr.bf16.mxu1 %v1783_v4  ;;  %v1838_v3 = vcombine.low %v673_v54, %v677_v55  ;;  %v1845_v4 = vcombine.high %v680_v60, %v684_v61  ;;  %v1847_v5 = vcombine.high %v681_v62, %v685_v63 }
  0xb7   : > { %v1846_v7 = vcombine.low %v681_v62, %v685_v63 }
  0xb9   : > { %1430 = vmatpush1.bf16.msra.mxu0 %v1780_v9  ;;  %1471 = vmatpush1.bf16.msra.mxu1 %v1782_v10  ;;  %v1527_v9 = vshrl.u32 %v1526_v8, 7 }
  0xba   : > { %1431 = vmatprep.subr.bf16.mxu0 %v1789_v11  ;;  %1472 = vmatprep.subr.bf16.mxu1 %v1791_v12  ;;  %v1524_v12 = vld [vmem:[%s525_s9] sm:$0xff] }
  0xbb   : > { %v1544_v10 = vsub.s32 4, %v1527_v9  ;;  %v1552_v11 = vsub.s32 6, %v1527_v9  ;;  %v1548_v13 = vsub.s32 5, %v1527_v9  ;;  %v1556_v15 = vsub.s32 7, %v1527_v9 }
  0xbc   : > { %v1540_v22 = vsub.s32 3, %v1527_v9 }
  0xbd   : > { %1432 = vmatpush1.bf16.msra.mxu0 %v1788_v18  ;;  %1473 = vmatpush1.bf16.msra.mxu1 %v1790_v19  ;;  %v1545_v16 = vrot.slane %v1524_v12, %v1544_v10  ;;  %v1553_v17 = vrot.slane %v1524_v12, %v1552_v11  ;;  %v1549_v18 = vrot.slane %v1524_v12, %v1548_v13 }
  0xbe   : > { %1433 = vmatprep.subr.bf16.mxu0 %v1797_v20  ;;  %1474 = vmatprep.subr.bf16.mxu1 %v1799_v21  ;;  %v1557_v19 = vrot.slane %v1524_v12, %v1556_v15  ;;  %v1528_v20 = vsub.s32 0, %v1527_v9  ;;  %v1532_v21 = vsub.s32 1, %v1527_v9 }
  0xc0   : > { %v1529_v0 = vrot.slane %v1524_v12, %v1528_v20  ;;  %v1533_v24 = vrot.slane %v1524_v12, %v1532_v21 }
  0xc1   : > { %1434 = vmatpush1.bf16.msra.mxu0 %v1796_v25  ;;  %1475 = vmatpush1.bf16.msra.mxu1 %v1798_v26  ;;  %v1541_v25 = vrot.slane %v1524_v12, %v1540_v22 }
  0xc2   : > { %1435 = vmatprep.subr.bf16.mxu0 %v1805_v27  ;;  %1476 = vmatprep.subr.bf16.mxu1 %v1807_v28 }
  0xc5   : > { %1436 = vmatpush1.bf16.msra.mxu0 %v1804_v33  ;;  %1477 = vmatpush1.bf16.msra.mxu1 %v1806_v34 }
  0xc6   : > { %1437 = vmatprep.subr.bf16.mxu0 %v1813_v35  ;;  %1478 = vmatprep.subr.bf16.mxu1 %v1815_v36 }
  0xc9   : > { %1438 = vmatpush1.bf16.msra.mxu0 %v1812_v1  ;;  %1479 = vmatpush1.bf16.msra.mxu1 %v1814_v41 }
  0xca   : > { %1439 = vmatprep.subr.bf16.mxu0 %v1821_v42  ;;  %1480 = vmatprep.subr.bf16.mxu1 %v1823_v43 }
  0xcd   : > { %1440 = vmatpush1.bf16.msra.mxu0 %v1820_v48  ;;  %1481 = vmatpush1.bf16.msra.mxu1 %v1822_v49 }
  0xce   : > { %1441 = vmatprep.subr.bf16.mxu0 %v1829_v50  ;;  %1482 = vmatprep.subr.bf16.mxu1 %v1831_v51 }
  0xd1   : > { %1442 = vmatpush1.bf16.msra.mxu0 %v1828_v56  ;;  %1483 = vmatpush1.bf16.msra.mxu1 %v1830_v57 }
  0xd2   : > { %1443 = vmatprep.subr.bf16.mxu0 %v1837_v58  ;;  %1484 = vmatprep.subr.bf16.mxu1 %v1839_v59 }
  0xd5   : > { %1444 = vmatpush1.bf16.msra.mxu0 %v1836_v2  ;;  %1485 = vmatpush1.bf16.msra.mxu1 %v1838_v3 }
  0xd6   : > { %1445 = vmatprep.subr.bf16.mxu0 %v1845_v4  ;;  %1486 = vmatprep.subr.bf16.mxu1 %v1847_v5 }
  0xd9   : > { %1446 = vmatpush1.bf16.msra.mxu0 %v1844_v6  ;;  %1487 = vmatpush1.bf16.msra.mxu1 %v1846_v7 }
  0xdc   : > { %1448 = vmatmul.mubr.bf16.vlgmr.msra.gmra.mrb[4].mxu0 %v2344_v14  ;;  %1489 = vmatmul.mubr.bf16.vlgmr.msra.gmra.mrb[4].mxu1 %v2344_v14  ;;  %v1536_v14 = vsub.s32 2, %v1527_v9 }
  0xde   : > { %v1537_v23 = vrot.slane %v1524_v12, %v1536_v14 }
 0x16f   : > { %v1367_v26 = vpop.f32.mrb[0].mxu0  ;;  %v1408_v28 = vpop.f32.mrb[0].mxu1 }
 0x170   : > { %v1566_v27 = vadd.f32 %v1529_v0, %v1367_v26  ;;  %v1369_v29 = vpop.f32.mrb[1].mxu0  ;;  %v1568_v30 = vadd.f32 %v1537_v23, %v1408_v28  ;;  %v1410_v32 = vpop.f32.mrb[1].mxu1 }
 0x171   : > { %v1567_v31 = vadd.f32 %v1533_v24, %v1369_v29  ;;  %v1371_v33 = vpop.f32.mrb[2].mxu0  ;;  %v1569_v34 = vadd.f32 %v1541_v25, %v1410_v32  ;;  %v1412_v35 = vpop.f32.mrb[2].mxu1 }
 0x172   : > { %1574 = vst [vmem:[%s2417_s14] sm:$0xff] %v1566_v27  ;;  %v1372_v36 = vpop.f32.mrb[3].mxu0  ;;  %1576 = vst [vmem:[%s2417_s14 + $0x10] sm:$0xff] %v1568_v30  ;;  %v1413_v37 = vpop.f32.mrb[3].mxu1 }
 0x173   : > { %1575 = vst [vmem:[%s2417_s14 + $0x8] sm:$0xff] %v1567_v31  ;;  %1577 = vst [vmem:[%s2417_s14 + $0x18] sm:$0xff] %v1569_v34 }
 0x1af   : > { %v1449_v38 = vpop.f32.mrb[4].mxu0  ;;  %v1490_v40 = vpop.f32.mrb[4].mxu1 }
 0x1b0   : > { %v1570_v39 = vadd.f32 %v1545_v16, %v1449_v38  ;;  %v1451_v1 = vpop.f32.mrb[5].mxu0  ;;  %v1572_v41 = vadd.f32 %v1553_v17, %v1490_v40  ;;  %v1492_v43 = vpop.f32.mrb[5].mxu1 }
 0x1b1   : > { %v1571_v42 = vadd.f32 %v1549_v18, %v1451_v1  ;;  %v1453_v44 = vpop.f32.mrb[6].mxu0  ;;  %v1573_v45 = vadd.f32 %v1557_v19, %v1492_v43  ;;  %v1494_v46 = vpop.f32.mrb[6].mxu1 }
 0x1b2   : > { %1578 = vst [vmem:[%s2417_s14 + $0x20] sm:$0xff] %v1570_v39  ;;  %v1454_v47 = vpop.f32.mrb[7].mxu0  ;;  %1580 = vst [vmem:[%s2417_s14 + $0x30] sm:$0xff] %v1572_v41  ;;  %v1495_v48 = vpop.f32.mrb[7].mxu1 }
 0x1b3   : > { %1579 = vst [vmem:[%s2417_s14 + $0x28] sm:$0xff] %v1571_v42  ;;  %1581 = vst [vmem:[%s2417_s14 + $0x38] sm:$0xff] %v1573_v45 }
 0x1b4 PF: > { %s13_s16 = sadd.s32 1, %s1931_s16   ;;  %s2446_s12 = smov %s1919_s13 }
 0x1b5   : > { %p10_p10 = scmp.ge.s32.totalorder %s13_s16, 4   ;;  %s2447_s13 = smov %s1988_s20 }
 0x1b6   : > { %s2448_s14 = smov %s1927_s15  ;;  %s2449_s15 = smov %s2451_s17 }
 0x1b7   :  { %12 = sbr.rel (!%p10_p10) target bundleno = 3 (0x3), region = 104 }

</bundles_post_ra>
